<compile_context>
chip_gen: v5e
topology: v5e:2x2
jax: 0.10.0
libtpu: 0.0.40
codegen_flags: <defaults>
</compile_context>

<pallas_src>
import functools

import jax
import jax.numpy as jnp
from jax import lax
from jax.experimental import pallas as pl
from jax.experimental.pallas import tpu as pltpu

INPUT_DIM = 784
HIDDEN_DIM = 400
LATENT_DIM = 20

# Lane-padded dims (multiples of 128) so every matmul input/output is lane-dense.
IN_PAD = 896       # 7 * 128   (784 -> 896)
HID_PAD = 512      # 4 * 128   (400 -> 512)
HEAD_PAD = 128     # fused mu|logvar head: mu -> lanes [0:20], logvar -> [64:84]
LV_OFF = 64        # lane offset of logvar inside the fused head output
assert LATENT_DIM <= LV_OFF


def _vae_kernel(x_ref, w1_ref, b1_ref, wh_ref, bh_ref, w3_ref, b3_ref,
                w4_ref, b4_ref, eps_ref, recon_ref, head_ref):
    # ---- encoder: Linear(784->400) + ReLU  (padded 896 -> 512, bf16 MXU, f32 acc)
    h = jnp.dot(x_ref[...], w1_ref[...],
                preferred_element_type=jnp.float32) + b1_ref[...]
    h = jnp.maximum(h, 0.0)                                        # (TB, 512) f32

    # ---- fused mu|logvar head: one lane-dense (512 -> 128) matmul
    head = jnp.dot(h.astype(jnp.bfloat16), wh_ref[...],
                   preferred_element_type=jnp.float32) + bh_ref[...]
    head_ref[...] = head            # mu in lanes [0:20], logvar in lanes [64:84]

    # ---- reparameterize in the padded 128-lane layout
    # half-vreg roll brings logvar lanes [64:84] on top of mu lanes [0:20] (XLU slot)
    lv = pltpu.roll(head, 64, 1)
    lane = lax.broadcasted_iota(jnp.int32, head.shape, 1)
    lv = jnp.where(lane < LATENT_DIM, lv, 0.0)      # keep exp() bounded off-latent
    std = jnp.exp(0.5 * lv)
    # eps is zero-padded beyond lane 20, so off-latent lanes add nothing; the logvar
    # values still sitting in lanes [64:84] of `head` are killed by zero rows of w3.
    z = head + eps_ref[...] * std                                   # (TB, 128) f32

    # ---- decoder: Linear(20->400)+ReLU, Linear(400->784)+Sigmoid (padded)
    h2 = jnp.dot(z.astype(jnp.bfloat16), w3_ref[...],
                 preferred_element_type=jnp.float32) + b3_ref[...]
    h2 = jnp.maximum(h2, 0.0)
    logits = jnp.dot(h2.astype(jnp.bfloat16), w4_ref[...],
                     preferred_element_type=jnp.float32) + b4_ref[...]
    # sigmoid: exp + approximate reciprocal both land on the otherwise-idle EUP slot
    recon_ref[...] = pl.reciprocal(1.0 + jnp.exp(-logits), approx=True)


def prepare_params(params):
    """Zero-pad to lane multiples, fuse mu|logvar head, cast weights to bf16 (once)."""
    bf16 = jnp.bfloat16

    w1p = jnp.pad(params["w1"], ((0, IN_PAD - INPUT_DIM),
                                 (0, HID_PAD - HIDDEN_DIM))).astype(bf16)
    b1p = jnp.pad(params["b1"], ((0, 0), (0, HID_PAD - HIDDEN_DIM)))

    wh = jnp.zeros((HID_PAD, HEAD_PAD), jnp.float32)
    wh = wh.at[:HIDDEN_DIM, :LATENT_DIM].set(params["wmu"])
    wh = wh.at[:HIDDEN_DIM, LV_OFF:LV_OFF + LATENT_DIM].set(params["wlv"])
    bh = jnp.zeros((1, HEAD_PAD), jnp.float32)
    bh = bh.at[:, :LATENT_DIM].set(params["bmu"])
    bh = bh.at[:, LV_OFF:LV_OFF + LATENT_DIM].set(params["blv"])

    w3p = jnp.pad(params["w3"], ((0, HEAD_PAD - LATENT_DIM),
                                 (0, HID_PAD - HIDDEN_DIM))).astype(bf16)
    b3p = jnp.pad(params["b3"], ((0, 0), (0, HID_PAD - HIDDEN_DIM)))
    w4p = jnp.pad(params["w4"], ((0, HID_PAD - HIDDEN_DIM),
                                 (0, IN_PAD - INPUT_DIM))).astype(bf16)
    b4p = jnp.pad(params["b4"], ((0, 0), (0, IN_PAD - INPUT_DIM)))

    return dict(w1=w1p, b1=b1p, wh=wh.astype(bf16), bh=bh,
                w3=w3p, b3=b3p, w4=w4p, b4=b4p)


def vae_forward(x_nchw, pparams, eps, *, tb=256):
    """pparams: output of prepare_params(). Returns (recon, mu, logvar)."""
    B = x_nchw.shape[0]
    TB = min(tb, B)                       # 256 fills the v6e/v7x MXU; still fine on v5e
    n_tiles = pl.cdiv(B, TB)
    B_pad = n_tiles * TB

    x = x_nchw.reshape(B, INPUT_DIM).astype(jnp.float32)       # glue: view(-1, 784)
    x = jnp.pad(x, ((0, B_pad - B), (0, IN_PAD - INPUT_DIM))).astype(jnp.bfloat16)
    eps_p = jnp.pad(eps.astype(jnp.float32),
                    ((0, B_pad - B), (0, HEAD_PAD - LATENT_DIM)))

    batch_spec = lambda n: pl.BlockSpec((TB, n), lambda i: (i, 0))
    resident = lambda arr: pl.BlockSpec(arr.shape, lambda i: (0, 0))  # stays in VMEM

    flops = 2 * B_pad * (IN_PAD * HID_PAD + HID_PAD * HEAD_PAD
                         + HEAD_PAD * HID_PAD + HID_PAD * IN_PAD)
    transcendentals = B_pad * (IN_PAD + HEAD_PAD)
    param_bytes = sum(int(a.size) * a.dtype.itemsize for a in pparams.values())
    bytes_accessed = (param_bytes + int(x.size) * 2 + int(eps_p.size) * 4
                      + B_pad * IN_PAD * 4 + B_pad * HEAD_PAD * 4)

    recon_pad, head = pl.pallas_call(
        _vae_kernel,
        out_shape=(jax.ShapeDtypeStruct((B_pad, IN_PAD), jnp.float32),
                   jax.ShapeDtypeStruct((B_pad, HEAD_PAD), jnp.float32)),
        grid=(n_tiles,),
        in_specs=[
            batch_spec(IN_PAD),                                   # x tile
            resident(pparams["w1"]), resident(pparams["b1"]),
            resident(pparams["wh"]), resident(pparams["bh"]),
            resident(pparams["w3"]), resident(pparams["b3"]),
            resident(pparams["w4"]), resident(pparams["b4"]),
            batch_spec(HEAD_PAD),                                 # eps tile
        ],
        out_specs=(batch_spec(IN_PAD), batch_spec(HEAD_PAD)),
        compiler_params=pltpu.CompilerParams(
            dimension_semantics=("parallel",)),                   # megacore on v7x
        cost_estimate=pl.CostEstimate(flops=flops,
                                      transcendentals=transcendentals,
                                      bytes_accessed=bytes_accessed),
    )(x, pparams["w1"], pparams["b1"], pparams["wh"], pparams["bh"],
      pparams["w3"], pparams["b3"], pparams["w4"], pparams["b4"], eps_p)

    recon = recon_pad[:B, :INPUT_DIM]
    mu = head[:B, :LATENT_DIM]
    logvar = head[:B, LV_OFF:LV_OFF + LATENT_DIM]
    return recon, mu, logvar


def init_params(key):
    """Deterministic nn.Linear-style init, weights stored as (in, out), f32."""
    def linear(key, fan_in, fan_out):
        kw, kb = jax.random.split(key)
        bound = 1.0 / jnp.sqrt(fan_in)
        w = jax.random.uniform(kw, (fan_in, fan_out), jnp.float32, -bound, bound)
        b = jax.random.uniform(kb, (1, fan_out), jnp.float32, -bound, bound)
        return w, b

    k1, k2, k3, k4, k5 = jax.random.split(key, 5)
    w1, b1 = linear(k1, INPUT_DIM, HIDDEN_DIM)
    wmu, bmu = linear(k2, HIDDEN_DIM, LATENT_DIM)
    wlv, blv = linear(k3, HIDDEN_DIM, LATENT_DIM)
    w3, b3 = linear(k4, LATENT_DIM, HIDDEN_DIM)
    w4, b4 = linear(k5, HIDDEN_DIM, INPUT_DIM)
    return dict(w1=w1, b1=b1, wmu=wmu, bmu=bmu, wlv=wlv, blv=blv,
                w3=w3, b3=b3, w4=w4, b4=b4)


def vae_reference(x_nchw, params, eps):
    """Pure-JAX f32 reference (mirrors the PyTorch forward)."""
    x = x_nchw.reshape(-1, INPUT_DIM)
    h = jnp.maximum(x @ params["w1"] + params["b1"], 0.0)
    mu = h @ params["wmu"] + params["bmu"]
    logvar = h @ params["wlv"] + params["blv"]
    z = mu + eps * jnp.exp(0.5 * logvar)
    h2 = jnp.maximum(z @ params["w3"] + params["b3"], 0.0)
    recon = jax.nn.sigmoid(h2 @ params["w4"] + params["b4"])
    return recon, mu, logvar


if __name__ == "__main__":
    key = jax.random.PRNGKey(0)
    k_param, k_x, k_eps = jax.random.split(key, 3)

    B = 2
    params = init_params(k_param)
    pparams = prepare_params(params)

    # MNIST-like NCHW input in [0, 1]; eps ~ N(0,1) drawn outside the kernel for
    # determinism (stands in for torch.randn_like inside reparameterize()).
    x = jax.random.uniform(k_x, (B, 1, 28, 28), jnp.float32)
    eps = jax.random.normal(k_eps, (B, LATENT_DIM), jnp.float32)

    fwd = jax.jit(functools.partial(vae_forward, tb=256))
    recon, mu, logvar = fwd(x, pparams, eps)
    jax.block_until_ready((recon, mu, logvar))

    assert recon.shape == (B, INPUT_DIM)
    assert mu.shape == (B, LATENT_DIM)
    assert logvar.shape == (B, LATENT_DIM)

    # Loose tolerance: kernel uses bf16 matmul inputs + approx-reciprocal sigmoid.
    r_ref, mu_ref, lv_ref = vae_reference(x, params, eps)
    assert jnp.max(jnp.abs(recon - r_ref)) < 0.06
    assert jnp.max(jnp.abs(mu - mu_ref)) < 0.06
    assert jnp.max(jnp.abs(logvar - lv_ref)) < 0.06

    print("KERNEL_OK")
</pallas_src>

<mosaic_0001>
module attributes {stable_mosaic.version = 11 : i64} {
  func.func @_vae_kernel(%arg0: i32, %arg1: memref<2x896xbf16, #tpu.memory_space<vmem>>, %arg2: memref<896x512xbf16, #tpu.memory_space<vmem>>, %arg3: memref<1x512xf32, #tpu.memory_space<vmem>>, %arg4: memref<512x128xbf16, #tpu.memory_space<vmem>>, %arg5: memref<1x128xf32, #tpu.memory_space<vmem>>, %arg6: memref<128x512xbf16, #tpu.memory_space<vmem>>, %arg7: memref<1x512xf32, #tpu.memory_space<vmem>>, %arg8: memref<512x896xbf16, #tpu.memory_space<vmem>>, %arg9: memref<1x896xf32, #tpu.memory_space<vmem>>, %arg10: memref<2x128xf32, #tpu.memory_space<vmem>>, %arg11: memref<2x896xf32, #tpu.memory_space<vmem>>, %arg12: memref<2x128xf32, #tpu.memory_space<vmem>>) attributes {dimension_semantics = [#tpu.dimension_semantics<parallel>], iteration_bounds = array<i64: 1>, scalar_prefetch = 0 : i64, scratch_operands = 0 : i64, tpu.core_type = #tpu.core_type<tc>, window_params = [{transform_indices = @transform_0, window_bounds = array<i64: 2, 896>}, {pipeline_mode = #tpu.pipeline_mode<synchronous>, transform_indices = @transform_1, window_bounds = array<i64: 896, 512>}, {pipeline_mode = #tpu.pipeline_mode<synchronous>, transform_indices = @transform_2, window_bounds = array<i64: 1, 512>}, {pipeline_mode = #tpu.pipeline_mode<synchronous>, transform_indices = @transform_3, window_bounds = array<i64: 512, 128>}, {pipeline_mode = #tpu.pipeline_mode<synchronous>, transform_indices = @transform_4, window_bounds = array<i64: 1, 128>}, {pipeline_mode = #tpu.pipeline_mode<synchronous>, transform_indices = @transform_5, window_bounds = array<i64: 128, 512>}, {pipeline_mode = #tpu.pipeline_mode<synchronous>, transform_indices = @transform_6, window_bounds = array<i64: 1, 512>}, {pipeline_mode = #tpu.pipeline_mode<synchronous>, transform_indices = @transform_7, window_bounds = array<i64: 512, 896>}, {pipeline_mode = #tpu.pipeline_mode<synchronous>, transform_indices = @transform_8, window_bounds = array<i64: 1, 896>}, {transform_indices = @transform_9, window_bounds = array<i64: 2, 128>}, {transform_indices = @transform_10, window_bounds = array<i64: 2, 896>}, {transform_indices = @transform_11, window_bounds = array<i64: 2, 128>}]} {
    %c0 = arith.constant 0 : index
    %c0_0 = arith.constant 0 : index
    %0 = vector.load %arg1[%c0, %c0_0] : memref<2x896xbf16, #tpu.memory_space<vmem>>, vector<2x896xbf16>
    %c0_1 = arith.constant 0 : index
    %c0_2 = arith.constant 0 : index
    %1 = vector.load %arg2[%c0_1, %c0_2] : memref<896x512xbf16, #tpu.memory_space<vmem>>, vector<896x512xbf16>
    %cst = arith.constant dense<0.000000e+00> : vector<2x512xf32>
    %2 = tpu.matmul %0, %1, %cst {dimension_numbers = #tpu.dot_dimension_numbers<[1], [0], [0], [1], [0, 0, 1, 1], [], []>} : vector<2x896xbf16>, vector<896x512xbf16>, vector<2x512xf32> -> vector<2x512xf32>
    %c0_3 = arith.constant 0 : index
    %c0_4 = arith.constant 0 : index
    %3 = vector.load %arg3[%c0_3, %c0_4] : memref<1x512xf32, #tpu.memory_space<vmem>>, vector<1x512xf32>
    %4 = vector.broadcast %3 : vector<1x512xf32> to vector<2x512xf32>
    %5 = arith.addf %2, %4 : vector<2x512xf32>
    %cst_5 = arith.constant 0.000000e+00 : f32
    %6 = vector.broadcast %cst_5 : f32 to vector<2x512xf32>
    %7 = arith.maximumf %5, %6 : vector<2x512xf32>
    %8 = arith.truncf %7 : vector<2x512xf32> to vector<2x512xbf16>
    %c0_6 = arith.constant 0 : index
    %c0_7 = arith.constant 0 : index
    %9 = vector.load %arg4[%c0_6, %c0_7] : memref<512x128xbf16, #tpu.memory_space<vmem>>, vector<512x128xbf16>
    %cst_8 = arith.constant dense<0.000000e+00> : vector<2x128xf32>
    %10 = tpu.matmul %8, %9, %cst_8 {dimension_numbers = #tpu.dot_dimension_numbers<[1], [0], [0], [1], [0, 0, 1, 1], [], []>} : vector<2x512xbf16>, vector<512x128xbf16>, vector<2x128xf32> -> vector<2x128xf32>
    %c0_9 = arith.constant 0 : index
    %c0_10 = arith.constant 0 : index
    %11 = vector.load %arg5[%c0_9, %c0_10] : memref<1x128xf32, #tpu.memory_space<vmem>>, vector<1x128xf32>
    %12 = vector.broadcast %11 : vector<1x128xf32> to vector<2x128xf32>
    %13 = arith.addf %10, %12 : vector<2x128xf32>
    %c0_11 = arith.constant 0 : index
    %c0_12 = arith.constant 0 : index
    %14 = vector.load %arg12[%c0_11, %c0_12] : memref<2x128xf32, #tpu.memory_space<vmem>>, vector<2x128xf32>
    tpu.vector_store %arg12[%c0_11, %c0_12], %13 {strides = array<i32>} : memref<2x128xf32, #tpu.memory_space<vmem>>, vector<2x128xf32>,
    %c64_i32 = arith.constant 64 : i32
    %15 = tpu.dynamic_rotate %13 by %c64_i32 dim 1 : vector<2x128xf32>, i32 -> vector<2x128xf32>
    %16 = tpu.iota {dimensions = array<i32: 1>} : vector<2x128xi32>
    %c20_i32 = arith.constant 20 : i32
    %17 = vector.broadcast %c20_i32 : i32 to vector<2x128xi32>
    %18 = arith.cmpi slt, %16, %17 : vector<2x128xi32>
    %cst_13 = arith.constant 0.000000e+00 : f32
    %19 = vector.broadcast %cst_13 : f32 to vector<2x128xf32>
    %20 = arith.select %18, %15, %19 : vector<2x128xi1>, vector<2x128xf32>
    %cst_14 = arith.constant 5.000000e-01 : f32
    %21 = vector.broadcast %cst_14 : f32 to vector<2x128xf32>
    %22 = arith.mulf %21, %20 : vector<2x128xf32>
    %23 = math.exp %22 : vector<2x128xf32>
    %c0_15 = arith.constant 0 : index
    %c0_16 = arith.constant 0 : index
    %24 = vector.load %arg10[%c0_15, %c0_16] : memref<2x128xf32, #tpu.memory_space<vmem>>, vector<2x128xf32>
    %25 = arith.mulf %24, %23 : vector<2x128xf32>
    %26 = arith.addf %13, %25 : vector<2x128xf32>
    %27 = arith.truncf %26 : vector<2x128xf32> to vector<2x128xbf16>
    %c0_17 = arith.constant 0 : index
    %c0_18 = arith.constant 0 : index
    %28 = vector.load %arg6[%c0_17, %c0_18] : memref<128x512xbf16, #tpu.memory_space<vmem>>, vector<128x512xbf16>
    %cst_19 = arith.constant dense<0.000000e+00> : vector<2x512xf32>
    %29 = tpu.matmul %27, %28, %cst_19 {dimension_numbers = #tpu.dot_dimension_numbers<[1], [0], [0], [1], [0, 0, 1, 1], [], []>} : vector<2x128xbf16>, vector<128x512xbf16>, vector<2x512xf32> -> vector<2x512xf32>
    %c0_20 = arith.constant 0 : index
    %c0_21 = arith.constant 0 : index
    %30 = vector.load %arg7[%c0_20, %c0_21] : memref<1x512xf32, #tpu.memory_space<vmem>>, vector<1x512xf32>
    %31 = vector.broadcast %30 : vector<1x512xf32> to vector<2x512xf32>
    %32 = arith.addf %29, %31 : vector<2x512xf32>
    %cst_22 = arith.constant 0.000000e+00 : f32
    %33 = vector.broadcast %cst_22 : f32 to vector<2x512xf32>
    %34 = arith.maximumf %32, %33 : vector<2x512xf32>
    %35 = arith.truncf %34 : vector<2x512xf32> to vector<2x512xbf16>
    %c0_23 = arith.constant 0 : index
    %c0_24 = arith.constant 0 : index
    %36 = vector.load %arg8[%c0_23, %c0_24] : memref<512x896xbf16, #tpu.memory_space<vmem>>, vector<512x896xbf16>
    %cst_25 = arith.constant dense<0.000000e+00> : vector<2x896xf32>
    %37 = tpu.matmul %35, %36, %cst_25 {dimension_numbers = #tpu.dot_dimension_numbers<[1], [0], [0], [1], [0, 0, 1, 1], [], []>} : vector<2x512xbf16>, vector<512x896xbf16>, vector<2x896xf32> -> vector<2x896xf32>
    %c0_26 = arith.constant 0 : index
    %c0_27 = arith.constant 0 : index
    %38 = vector.load %arg9[%c0_26, %c0_27] : memref<1x896xf32, #tpu.memory_space<vmem>>, vector<1x896xf32>
    %39 = vector.broadcast %38 : vector<1x896xf32> to vector<2x896xf32>
    %40 = arith.addf %37, %39 : vector<2x896xf32>
    %cst_28 = arith.constant 0.000000e+00 : f32
    %41 = vector.broadcast %cst_28 : f32 to vector<2x896xf32>
    %42 = arith.subf %41, %40 : vector<2x896xf32>
    %43 = math.exp %42 : vector<2x896xf32>
    %cst_29 = arith.constant 1.000000e+00 : f32
    %44 = vector.broadcast %cst_29 : f32 to vector<2x896xf32>
    %45 = arith.addf %44, %43 : vector<2x896xf32>
    %46 = tpu.reciprocal %45 {approx = true} : vector<2x896xf32> -> vector<2x896xf32>
    %c0_30 = arith.constant 0 : index
    %c0_31 = arith.constant 0 : index
    %47 = vector.load %arg11[%c0_30, %c0_31] : memref<2x896xf32, #tpu.memory_space<vmem>>, vector<2x896xf32>
    tpu.vector_store %arg11[%c0_30, %c0_31], %46 {strides = array<i32>} : memref<2x896xf32, #tpu.memory_space<vmem>>, vector<2x896xf32>,
    return
  }
  func.func @transform_0(%arg0: i32) -> (i32, i32) {
    %c0_i32 = arith.constant 0 : i32
    %c0_i32_0 = arith.constant 0 : i32
    return %arg0, %c0_i32 : i32, i32
  }
  func.func @transform_1(%arg0: i32) -> (i32, i32) {
    %c0_i32 = arith.constant 0 : i32
    %c0_i32_0 = arith.constant 0 : i32
    %c0_i32_1 = arith.constant 0 : i32
    return %c0_i32, %c0_i32_0 : i32, i32
  }
  func.func @transform_2(%arg0: i32) -> (i32, i32) {
    %c0_i32 = arith.constant 0 : i32
    %c0_i32_0 = arith.constant 0 : i32
    %c0_i32_1 = arith.constant 0 : i32
    return %c0_i32, %c0_i32_0 : i32, i32
  }
  func.func @transform_3(%arg0: i32) -> (i32, i32) {
    %c0_i32 = arith.constant 0 : i32
    %c0_i32_0 = arith.constant 0 : i32
    %c0_i32_1 = arith.constant 0 : i32
    return %c0_i32, %c0_i32_0 : i32, i32
  }
  func.func @transform_4(%arg0: i32) -> (i32, i32) {
    %c0_i32 = arith.constant 0 : i32
    %c0_i32_0 = arith.constant 0 : i32
    %c0_i32_1 = arith.constant 0 : i32
    return %c0_i32, %c0_i32_0 : i32, i32
  }
  func.func @transform_5(%arg0: i32) -> (i32, i32) {
    %c0_i32 = arith.constant 0 : i32
    %c0_i32_0 = arith.constant 0 : i32
    %c0_i32_1 = arith.constant 0 : i32
    return %c0_i32, %c0_i32_0 : i32, i32
  }
  func.func @transform_6(%arg0: i32) -> (i32, i32) {
    %c0_i32 = arith.constant 0 : i32
    %c0_i32_0 = arith.constant 0 : i32
    %c0_i32_1 = arith.constant 0 : i32
    return %c0_i32, %c0_i32_0 : i32, i32
  }
  func.func @transform_7(%arg0: i32) -> (i32, i32) {
    %c0_i32 = arith.constant 0 : i32
    %c0_i32_0 = arith.constant 0 : i32
    %c0_i32_1 = arith.constant 0 : i32
    return %c0_i32, %c0_i32_0 : i32, i32
  }
  func.func @transform_8(%arg0: i32) -> (i32, i32) {
    %c0_i32 = arith.constant 0 : i32
    %c0_i32_0 = arith.constant 0 : i32
    %c0_i32_1 = arith.constant 0 : i32
    return %c0_i32, %c0_i32_0 : i32, i32
  }
  func.func @transform_9(%arg0: i32) -> (i32, i32) {
    %c0_i32 = arith.constant 0 : i32
    %c0_i32_0 = arith.constant 0 : i32
    return %arg0, %c0_i32 : i32, i32
  }
  func.func @transform_10(%arg0: i32) -> (i32, i32) {
    %c0_i32 = arith.constant 0 : i32
    %c0_i32_0 = arith.constant 0 : i32
    return %arg0, %c0_i32 : i32, i32
  }
  func.func @transform_11(%arg0: i32) -> (i32, i32) {
    %c0_i32 = arith.constant 0 : i32
    %c0_i32_0 = arith.constant 0 : i32
    return %arg0, %c0_i32 : i32, i32
  }
}

</mosaic_0001>

<bundles_post_ra>
// kernel: vae_forward.1
= control target key start
LH: loop header
LB: loop body
LE: loop exit
PB: predicated region body
PF: predicated region fallthrough
CT: control target
= control target key end

     0   :  { %17 = vsyncpa [#allocation3], 0  ;;  %s7275_s0 = inlined_call_operand.vmem [shape: bf16[2,896], index: 0, kind: input, shape index: {}]   ;;  %s7276_s1 = inlined_call_operand.hbm [shape: bf16[896,512], index: 1, kind: input, shape index: {}]   ;;  %s7277_s2 = inlined_call_operand.vmem [shape: f32[1,512], index: 2, kind: input, shape index: {}]   ;;  %s7278_s3 = inlined_call_operand.hbm [shape: bf16[512,128], index: 3, kind: input, shape index: {}]   ;;  %s7279_s4 = inlined_call_operand.vmem [shape: f32[1,128], index: 4, kind: input, shape index: {}]   ;;  %s7280_s5 = inlined_call_operand.hbm [shape: bf16[128,512], index: 5, kind: input, shape index: {}]   ;;  %s7281_s6 = inlined_call_operand.vmem [shape: f32[1,512], index: 6, kind: input, shape index: {}]   ;;  %s7282_s7 = inlined_call_operand.hbm [shape: bf16[512,896], index: 7, kind: input, shape index: {}]   ;;  %s7283_s8 = inlined_call_operand.vmem [shape: f32[1,896], index: 8, kind: input, shape index: {}]   ;;  %s7284_s9 = inlined_call_operand.vmem [shape: f32[2,128], index: 9, kind: input, shape index: {}]   ;;  %s7285_s10 = inlined_call_operand.hbm [shape: f32[2,896], index: 10, kind: output, shape index: {0}]   ;;  %s7286_s11 = inlined_call_operand.vmem [shape: f32[2,128], index: 11, kind: output, shape index: {1}]  }
   0x1   :  { %18 = vsyncpa [#allocation6], 0 }
   0x2   :  { %19 = vsyncpa [#allocation9], 0  ;;  %s42_s19 = sshll.u32 %s7278_s3, 4  ;;  %s43_s19 = int_to_ptr.hbm [resolvable:$true] %s42_s19 }
   0x3   :  { %20 = vsyncpa [#allocation4], 0  ;;  %s7039_s20 = smov [#allocation5]   ;;  %s27_s24 = sshll.u32 %s7276_s1, 4  ;;  %s28_s24 = int_to_ptr.hbm [resolvable:$true] %s27_s24 }
   0x4   :  { %s44_s21 = sshll.u32 %s7039_s20, 4  ;;  %s7040_s25 = smov 64   ;;  %s45_s21 = int_to_ptr.vmem [resolvable:$true] %s44_s21 }
   0x5   :  { %s7041_s26 = smov 4   ;;  %s7042_s27 = smov [#allocation2]  }
   0x6   :  { %50 = dma.hbm_to_vmem [thread:$0]  %s43_s19, 4096, %s45_s21, [#allocation6], %s7040_s25, %s7040_s25, %s7041_s26  }
   0x7   :  { %s29_s28 = sshll.u32 %s7042_s27, 4  ;;  %s7043_s29 = smov 256   ;;  %s30_s28 = int_to_ptr.vmem [resolvable:$true] %s29_s28 }
   0x8   :  { %s7044_s3 = smov 16   ;;  %s57_s13 = sshll.u32 %s7280_s5, 4  ;;  %s58_s13 = int_to_ptr.hbm [resolvable:$true] %s57_s13 }
   0x9   :  { %35 = dma.hbm_to_vmem [thread:$0]  %s28_s24, 28672, %s30_s28, [#allocation3], %s7043_s29, %s7043_s29, %s7044_s3  }
   0xa   :  { %s7045_s14 = smov [#allocation7]   ;;  %s72_s17 = sshll.u32 %s7282_s7, 4  ;;  %s73_s17 = int_to_ptr.hbm [resolvable:$true] %s72_s17 }
   0xb   :  { %s59_s15 = sshll.u32 %s7045_s14, 4  ;;  %s7046_s18 = smov [#allocation8]   ;;  %s60_s15 = int_to_ptr.vmem [resolvable:$true] %s59_s15 }
   0xc   :  { %65 = dma.hbm_to_vmem [thread:$0]  %s58_s13, 4096, %s60_s15, [#allocation6], %s7043_s29, %s7043_s29, %s7044_s3  }
   0xd   :  { %s74_s19 = sshll.u32 %s7046_s18, 4  ;;  %s7047_s20 = smov 448   ;;  %s75_s19 = int_to_ptr.vmem [resolvable:$true] %s74_s19 }
   0xe   :  { %s7048_s21 = smov 28  }
   0xf   :  { %80 = dma.hbm_to_vmem [thread:$0]  %s73_s17, 28672, %s75_s19, [#allocation9], %s7047_s20, %s7047_s20, %s7048_s21  }
  0x10   :  { %7031 = dma.done.wait [#allocation3], 28672  }
  0x11   :  { %7032 = vsyncadd [#allocation3], 4294938624 }
  0x12   :  { %7033 = dma.done.wait [#allocation6], 8192  }
  0x13   :  { %7034 = vsyncadd [#allocation6], 4294959104 }
  0x14   :  { %7035 = dma.done.wait [#allocation9], 28672  }
  0x15   :  { %7036 = vsyncadd [#allocation9], 4294938624  ;;  %v4416_v0 = vld [vmem:[#allocation2 + $0xe0] sm:$0xf]  ;;  %v6380_v1 = vld [vmem:[#allocation2 + $0xec] sm:$0xf0] }
  0x16   :  { %v4544_v2 = vld [vmem:[#allocation2 + $0x1e0] sm:$0xf]  ;;  %v4417_v3 = vor.u32 %v6380_v1, %v4416_v0  ;;  %v6412_v4 = vld [vmem:[#allocation2 + $0x1ec] sm:$0xf0]  ;;  %vm4267_vm1 = vcmask 1041408   ;;  %vm4269_vm2 = vcmask 1045508  }
  0x17   :  { %v4672_v5 = vld [vmem:[#allocation2 + $0x2e0] sm:$0xf]  ;;  %v6444_v6 = vld [vmem:[#allocation2 + $0x2ec] sm:$0xf0]  ;;  %v4545_v7 = vor.u32 %v6412_v4, %v4544_v2  ;;  %vm4271_vm3 = vcmask 1043456   ;;  %s4286_s30 = sshll.u32 %s7285_s10, 4  ;;  %s4287_s30 = int_to_ptr.hbm [resolvable:$true] %s4286_s30 }
  0x18   :  { %v4673_v8 = vor.u32 %v6444_v6, %v4672_v5  ;;  %v4800_v9 = vld [vmem:[#allocation2 + $0x3e0] sm:$0xf]  ;;  %v6476_v10 = vld [vmem:[#allocation2 + $0x3ec] sm:$0xf0]  ;;  %1472 = vmatpush.bf16.msra.mxu0 %v4417_v3 }
  0x19   :  { %v4400_v11 = vld [vmem:[#allocation2 + $0xc0] sm:$0xf]  ;;  %v4801_v12 = vor.u32 %v6476_v10, %v4800_v9  ;;  %v6376_v13 = vld [vmem:[#allocation2 + $0xcc] sm:$0xf0]  ;;  %1485 = vmatpush.bf16.msra.mxu1 %v4545_v7 }
  0x1a   :  { %v4528_v14 = vld [vmem:[#allocation2 + $0x1c0] sm:$0xf]  ;;  %v6408_v15 = vld [vmem:[#allocation2 + $0x1cc] sm:$0xf0]  ;;  %1498 = vmatpush.bf16.msra.mxu2 %v4673_v8  ;;  %v4401_v16 = vor.u32 %v6376_v13, %v4400_v11 }
  0x1b   :  { %v4529_v17 = vor.u32 %v6408_v15, %v4528_v14  ;;  %v4656_v18 = vld [vmem:[#allocation2 + $0x2c0] sm:$0xf]  ;;  %v6440_v19 = vld [vmem:[#allocation2 + $0x2cc] sm:$0xf0]  ;;  %1511 = vmatpush.bf16.msra.mxu3 %v4801_v12 }
  0x1c   :  { %v4784_v20 = vld [vmem:[#allocation2 + $0x3c0] sm:$0xf]  ;;  %v4657_v21 = vor.u32 %v6440_v19, %v4656_v18  ;;  %v6472_v22 = vld [vmem:[#allocation2 + $0x3cc] sm:$0xf0]  ;;  %1473 = vmatpush.bf16.msra.mxu0 %v4401_v16 }
  0x1d   :  { %v4384_v23 = vld [vmem:[#allocation2 + $0xa0] sm:$0xf]  ;;  %v6372_v24 = vld [vmem:[#allocation2 + $0xac] sm:$0xf0]  ;;  %v4785_v25 = vor.u32 %v6472_v22, %v4784_v20  ;;  %1486 = vmatpush.bf16.msra.mxu1 %v4529_v17 }
  0x1e   :  { %v4512_v26 = vld [vmem:[#allocation2 + $0x1a0] sm:$0xf]  ;;  %v6404_v27 = vld [vmem:[#allocation2 + $0x1ac] sm:$0xf0]  ;;  %v4385_v29 = vor.u32 %v6372_v24, %v4384_v23  ;;  %1499 = vmatpush.bf16.msra.mxu2 %v4657_v21 }
  0x1f   :  { %v4640_v28 = vld [vmem:[#allocation2 + $0x2a0] sm:$0xf]  ;;  %v6436_v30 = vld [vmem:[#allocation2 + $0x2ac] sm:$0xf0]  ;;  %v4513_v33 = vor.u32 %v6404_v27, %v4512_v26  ;;  %1512 = vmatpush.bf16.msra.mxu3 %v4785_v25 }
  0x20   :  { %v4768_v31 = vld [vmem:[#allocation2 + $0x3a0] sm:$0xf]  ;;  %v6468_v32 = vld [vmem:[#allocation2 + $0x3ac] sm:$0xf0]  ;;  %v4641_v34 = vor.u32 %v6436_v30, %v4640_v28  ;;  %1474 = vmatpush.bf16.msra.mxu0 %v4385_v29 }
  0x21   :  { %v4368_v35 = vld [vmem:[#allocation2 + $0x80] sm:$0xf]  ;;  %v6368_v36 = vld [vmem:[#allocation2 + $0x8c] sm:$0xf0]  ;;  %v4769_v38 = vor.u32 %v6468_v32, %v4768_v31  ;;  %1487 = vmatpush.bf16.msra.mxu1 %v4513_v33 }
  0x22   :  { %v4496_v37 = vld [vmem:[#allocation2 + $0x180] sm:$0xf]  ;;  %v6400_v39 = vld [vmem:[#allocation2 + $0x18c] sm:$0xf0]  ;;  %v4369_v44 = vor.u32 %v6368_v36, %v4368_v35  ;;  %1500 = vmatpush.bf16.msra.mxu2 %v4641_v34 }
  0x23   :  { %v4624_v40 = vld [vmem:[#allocation2 + $0x280] sm:$0xf]  ;;  %v6432_v41 = vld [vmem:[#allocation2 + $0x28c] sm:$0xf0]  ;;  %v4497_v45 = vor.u32 %v6400_v39, %v4496_v37  ;;  %1513 = vmatpush.bf16.msra.mxu3 %v4769_v38  ;;  %v6378_v37 = vld [vmem:[#allocation2 + $0xe4] sm:$0xf] }
  0x24   :  { %v4752_v42 = vld [vmem:[#allocation2 + $0x380] sm:$0xf]  ;;  %v6464_v43 = vld [vmem:[#allocation2 + $0x38c] sm:$0xf0]  ;;  %v4625_v46 = vor.u32 %v6432_v41, %v4624_v40  ;;  %1475 = vmatpush.bf16.msra.mxu0 %v4369_v44  ;;  %v4418_v38 = vld [vmem:[#allocation2 + $0xf0] sm:$0xf0] }
  0x25   :  { %v4352_v47 = vld [vmem:[#allocation2 + $0x60] sm:$0xf]  ;;  %v6364_v48 = vld [vmem:[#allocation2 + $0x6c] sm:$0xf0]  ;;  %v4753_v50 = vor.u32 %v6464_v43, %v4752_v42  ;;  %1488 = vmatpush.bf16.msra.mxu1 %v4497_v45 }
  0x26   :  { %v4480_v49 = vld [vmem:[#allocation2 + $0x160] sm:$0xf]  ;;  %v6396_v51 = vld [vmem:[#allocation2 + $0x16c] sm:$0xf0]  ;;  %v4353_v56 = vor.u32 %v6364_v48, %v4352_v47  ;;  %1501 = vmatpush.bf16.msra.mxu2 %v4625_v46  ;;  %v4421_v46 = vor.u32 %v6378_v37, %v4418_v38 }
  0x27   :  { %v4608_v52 = vld [vmem:[#allocation2 + $0x260] sm:$0xf]  ;;  %v6428_v53 = vld [vmem:[#allocation2 + $0x26c] sm:$0xf0]  ;;  %v4481_v57 = vor.u32 %v6396_v51, %v4480_v49  ;;  %1514 = vmatpush.bf16.msra.mxu3 %v4753_v50  ;;  %v6374_v50 = vld [vmem:[#allocation2 + $0xc4] sm:$0xf] }
  0x28   :  { %v4736_v54 = vld [vmem:[#allocation2 + $0x360] sm:$0xf]  ;;  %v6460_v55 = vld [vmem:[#allocation2 + $0x36c] sm:$0xf0]  ;;  %v4609_v58 = vor.u32 %v6428_v53, %v4608_v52  ;;  %1476 = vmatpush.bf16.msra.mxu0 %v4353_v56  ;;  %v4402_v51 = vld [vmem:[#allocation2 + $0xd0] sm:$0xf0] }
  0x29   :  { %v4336_v59 = vld [vmem:[#allocation2 + $0x40] sm:$0xf]  ;;  %v6360_v60 = vld [vmem:[#allocation2 + $0x4c] sm:$0xf0]  ;;  %v4737_v62 = vor.u32 %v6460_v55, %v4736_v54  ;;  %1489 = vmatpush.bf16.msra.mxu1 %v4481_v57 }
  0x2a   :  { %v4464_v61 = vld [vmem:[#allocation2 + $0x140] sm:$0xf]  ;;  %v6392_v63 = vld [vmem:[#allocation2 + $0x14c] sm:$0xf0]  ;;  %v4337_v4 = vor.u32 %v6360_v60, %v4336_v59  ;;  %1502 = vmatpush.bf16.msra.mxu2 %v4609_v58  ;;  %v4405_v58 = vor.u32 %v6374_v50, %v4402_v51  ;;  %v6354_v51 = vld [vmem:[#allocation2 + $0x24] sm:$0xf] }
  0x2b   :  { %v4592_v0 = vld [vmem:[#allocation2 + $0x240] sm:$0xf]  ;;  %v6424_v1 = vld [vmem:[#allocation2 + $0x24c] sm:$0xf0]  ;;  %v4465_v5 = vor.u32 %v6392_v63, %v4464_v61  ;;  %1515 = vmatpush.bf16.msra.mxu3 %v4737_v62  ;;  %v6370_v62 = vld [vmem:[#allocation2 + $0xa4] sm:$0xf] }
  0x2c   :  { %v4720_v2 = vld [vmem:[#allocation2 + $0x340] sm:$0xf]  ;;  %v6456_v3 = vld [vmem:[#allocation2 + $0x34c] sm:$0xf0]  ;;  %v4593_v6 = vor.u32 %v6424_v1, %v4592_v0  ;;  %1477 = vmatpush.bf16.msra.mxu0 %v4337_v4  ;;  %v4386_v63 = vld [vmem:[#allocation2 + $0xb0] sm:$0xf0] }
  0x2d   :  { %v4320_v7 = vld [vmem:[#allocation2 + $0x20] sm:$0xf]  ;;  %v6356_v8 = vld [vmem:[#allocation2 + $0x2c] sm:$0xf0]  ;;  %v4721_v10 = vor.u32 %v6456_v3, %v4720_v2  ;;  %1490 = vmatpush.bf16.msra.mxu1 %v4465_v5  ;;  %v101_v2 = vld [vmem:[%s7275_s0] sm:$0x7f] }
  0x2e   :  { %v4448_v9 = vld [vmem:[#allocation2 + $0x120] sm:$0xf]  ;;  %v6388_v11 = vld [vmem:[#allocation2 + $0x12c] sm:$0xf0]  ;;  %v4321_v16 = vor.u32 %v6356_v8, %v4320_v7  ;;  %1503 = vmatpush.bf16.msra.mxu2 %v4593_v6  ;;  %337 = vst [vmem:[#allocation1] ss:$9 sm:$0xff] %v101_v2  ;;  %v4389_v7 = vor.u32 %v6370_v62, %v4386_v63 }
  0x2f   :  { %v4576_v12 = vld [vmem:[#allocation2 + $0x220] sm:$0xf]  ;;  %v6420_v13 = vld [vmem:[#allocation2 + $0x22c] sm:$0xf0]  ;;  %v4449_v19 = vor.u32 %v6388_v11, %v4448_v9  ;;  %1516 = vmatpush.bf16.msra.mxu3 %v4721_v10  ;;  %v6366_v11 = vld [vmem:[#allocation2 + $0x84] sm:$0xf] }
  0x30   :  { %v4704_v14 = vld [vmem:[#allocation2 + $0x320] sm:$0xf]  ;;  %v6452_v15 = vld [vmem:[#allocation2 + $0x32c] sm:$0xf0]  ;;  %v4577_v20 = vor.u32 %v6420_v13, %v4576_v12  ;;  %1478 = vmatpush.bf16.msra.mxu0 %v4321_v16  ;;  %v4370_v12 = vld [vmem:[#allocation2 + $0x90] sm:$0xf0] }
  0x31   :  { %v4304_v17 = vld [vmem:[#allocation2] sm:$0xf]  ;;  %v6352_v18 = vld [vmem:[#allocation2 + $0xc] sm:$0xf0]  ;;  %v4705_v24 = vor.u32 %v6452_v15, %v4704_v14  ;;  %1491 = vmatpush.bf16.msra.mxu1 %v4449_v19  ;;  %v4373_v19 = vor.u32 %v6366_v11, %v4370_v12  ;;  %v6350_v63 = vld [vmem:[#allocation2 + $0x4] sm:$0xf] }
  0x32   :  { %v4432_v21 = vld [vmem:[#allocation2 + $0x100] sm:$0xf]  ;;  %v6384_v22 = vld [vmem:[#allocation2 + $0x10c] sm:$0xf0]  ;;  %v4305_v31 = vor.u32 %v6352_v18, %v4304_v17  ;;  %1504 = vmatpush.bf16.msra.mxu2 %v4577_v20  ;;  %v4546_v2 = vld [vmem:[#allocation2 + $0x1f0] sm:$0xf0] }
  0x33   :  { %v4560_v23 = vld [vmem:[#allocation2 + $0x200] sm:$0xf]  ;;  %v6416_v25 = vld [vmem:[#allocation2 + $0x20c] sm:$0xf0]  ;;  %v4433_v35 = vor.u32 %v6384_v22, %v4432_v21  ;;  %1517 = vmatpush.bf16.msra.mxu3 %v4705_v24  ;;  %v4354_v24 = vld [vmem:[#allocation2 + $0x70] sm:$0xf0] }
  0x34   :  { %v4688_v26 = vld [vmem:[#allocation2 + $0x300] sm:$0xf]  ;;  %v6448_v27 = vld [vmem:[#allocation2 + $0x30c] sm:$0xf0]  ;;  %v4561_v36 = vor.u32 %v6416_v25, %v4560_v23  ;;  %1479 = vmatpush.bf16.msra.mxu0 %v4305_v31  ;;  %v6362_v23 = vld [vmem:[#allocation2 + $0x64] sm:$0xf] }
  0x35   :  { %v4928_v28 = vld [vmem:[#allocation2 + $0x4e0] sm:$0xf]  ;;  %v6508_v29 = vld [vmem:[#allocation2 + $0x4ec] sm:$0xf0]  ;;  %v4689_v39 = vor.u32 %v6448_v27, %v4688_v26  ;;  %1492 = vmatpush.bf16.msra.mxu1 %v4433_v35  ;;  %v4357_v35 = vor.u32 %v6362_v23, %v4354_v24  ;;  %v4930_v11 = vld [vmem:[#allocation2 + $0x4f0] sm:$0xf0] }
  0x36   :  { %v5056_v30 = vld [vmem:[#allocation2 + $0x5e0] sm:$0xf]  ;;  %v6540_v32 = vld [vmem:[#allocation2 + $0x5ec] sm:$0xf0]  ;;  %v4929_v40 = vor.u32 %v6508_v29, %v4928_v28  ;;  %1505 = vmatpush.bf16.msra.mxu2 %v4561_v36  ;;  %v7129_v28 = vld [vmem:[#allocation1] sm:$0xff] }
  0x37   :  { %v5184_v33 = vld [vmem:[#allocation2 + $0x6e0] sm:$0xf]  ;;  %v6572_v34 = vld [vmem:[#allocation2 + $0x6ec] sm:$0xf0]  ;;  %v5057_v41 = vor.u32 %v6540_v32, %v5056_v30  ;;  %1518 = vmatpush.bf16.msra.mxu3 %v4689_v39  ;;  %v6358_v39 = vld [vmem:[#allocation2 + $0x44] sm:$0xf]  ;;  %1480 = vmatmul.bf16.vlgmr.msra.gmra.mxu0 %v7129_v28 }
  0x38   :  { %v5185_v42 = vor.u32 %v6572_v34, %v5184_v33  ;;  %v4912_v43 = vld [vmem:[#allocation2 + $0x4c0] sm:$0xf]  ;;  %v6504_v44 = vld [vmem:[#allocation2 + $0x4cc] sm:$0xf0]  ;;  %1524 = vmatpush.bf16.msrb.mxu0 %v4929_v40  ;;  %v4338_v40 = vld [vmem:[#allocation2 + $0x50] sm:$0xf0] }
  0x39   :  { %v5040_v45 = vld [vmem:[#allocation2 + $0x5c0] sm:$0xf]  ;;  %v6536_v47 = vld [vmem:[#allocation2 + $0x5cc] sm:$0xf0]  ;;  %v4913_v52 = vor.u32 %v6504_v44, %v4912_v43  ;;  %1537 = vmatpush.bf16.msrb.mxu1 %v5057_v41  ;;  %v6502_v23 = vld [vmem:[#allocation2 + $0x4c4] sm:$0xf] }
  0x3a   :  { %v5168_v48 = vld [vmem:[#allocation2 + $0x6c0] sm:$0xf]  ;;  %v6568_v49 = vld [vmem:[#allocation2 + $0x6cc] sm:$0xf0]  ;;  %1550 = vmatpush.bf16.msrb.mxu2 %v5185_v42  ;;  %v5041_v53 = vor.u32 %v6536_v47, %v5040_v45  ;;  %v4341_v47 = vor.u32 %v6358_v39, %v4338_v40  ;;  %v4914_v24 = vld [vmem:[#allocation2 + $0x4d0] sm:$0xf0] }
  0x3b   :  { %v5169_v54 = vor.u32 %v6568_v49, %v5168_v48  ;;  %v4896_v55 = vld [vmem:[#allocation2 + $0x4a0] sm:$0xf]  ;;  %v6500_v56 = vld [vmem:[#allocation2 + $0x4ac] sm:$0xf0]  ;;  %1563 = vmatpush.bf16.msrb.mxu3 %v4421_v46  ;;  %v4642_v39 = vld [vmem:[#allocation2 + $0x2b0] sm:$0xf0] }
  0x3c   :  { %v5024_v57 = vld [vmem:[#allocation2 + $0x5a0] sm:$0xf]  ;;  %v6532_v59 = vld [vmem:[#allocation2 + $0x5ac] sm:$0xf0]  ;;  %1525 = vmatpush.bf16.msrb.mxu0 %v4913_v52  ;;  %v4897_v0 = vor.u32 %v6500_v56, %v4896_v55  ;;  %v4322_v52 = vld [vmem:[#allocation2 + $0x30] sm:$0xf0] }
  0x3d   :  { %v5152_v60 = vld [vmem:[#allocation2 + $0x6a0] sm:$0xf]  ;;  %v6564_v61 = vld [vmem:[#allocation2 + $0x6ac] sm:$0xf0]  ;;  %1538 = vmatpush.bf16.msrb.mxu1 %v5041_v53  ;;  %v5025_v3 = vor.u32 %v6532_v59, %v5024_v57  ;;  %v6466_v40 = vld [vmem:[#allocation2 + $0x3a4] sm:$0xf] }
  0x3e   :  { %v4880_v1 = vld [vmem:[#allocation2 + $0x480] sm:$0xf]  ;;  %1551 = vmatpush.bf16.msrb.mxu2 %v5169_v54  ;;  %v5153_v4 = vor.u32 %v6564_v61, %v5152_v60  ;;  %v6496_v5 = vld [vmem:[#allocation2 + $0x48c] sm:$0xf0]  ;;  %v4325_v61 = vor.u32 %v6354_v51, %v4322_v52  ;;  %v4626_v51 = vld [vmem:[#allocation2 + $0x290] sm:$0xf0] }
  0x3f   :  { %v5008_v6 = vld [vmem:[#allocation2 + $0x580] sm:$0xf]  ;;  %1564 = vmatpush.bf16.msrb.mxu3 %v4405_v58  ;;  %v6528_v8 = vld [vmem:[#allocation2 + $0x58c] sm:$0xf0]  ;;  %v4881_v13 = vor.u32 %v6496_v5, %v4880_v1  ;;  %v6410_v1 = vld [vmem:[#allocation2 + $0x1e4] sm:$0xf] }
  0x40   :  { %v5136_v9 = vld [vmem:[#allocation2 + $0x680] sm:$0xf]  ;;  %v6560_v10 = vld [vmem:[#allocation2 + $0x68c] sm:$0xf0]  ;;  %1526 = vmatpush.bf16.msrb.mxu0 %v4897_v0  ;;  %v5009_v14 = vor.u32 %v6528_v8, %v5008_v6  ;;  %v4306_v0 = vld [vmem:[#allocation2 + $0x10] sm:$0xf0] }
  0x41   :  { %1539 = vmatpush.bf16.msrb.mxu1 %v5025_v3  ;;  %v5137_v15 = vor.u32 %v6560_v10, %v5136_v9  ;;  %v4864_v16 = vld [vmem:[#allocation2 + $0x460] sm:$0xf]  ;;  %v6492_v17 = vld [vmem:[#allocation2 + $0x46c] sm:$0xf0]  ;;  %v6442_v3 = vld [vmem:[#allocation2 + $0x2e4] sm:$0xf]  ;;  %v4309_v12 = vor.u32 %v6350_v63, %v4306_v0 }
  0x42   :  { %1552 = vmatpush.bf16.msrb.mxu2 %v5153_v4  ;;  %v4992_v18 = vld [vmem:[#allocation2 + $0x560] sm:$0xf]  ;;  %v6524_v20 = vld [vmem:[#allocation2 + $0x56c] sm:$0xf0]  ;;  %v4865_v26 = vor.u32 %v6492_v17, %v4864_v16  ;;  %v4674_v5 = vld [vmem:[#allocation2 + $0x2f0] sm:$0xf0] }
  0x43   :  { %1565 = vmatpush.bf16.msrb.mxu3 %v4389_v7  ;;  %v5120_v21 = vld [vmem:[#allocation2 + $0x660] sm:$0xf]  ;;  %v6556_v22 = vld [vmem:[#allocation2 + $0x66c] sm:$0xf0]  ;;  %v4993_v30 = vor.u32 %v6524_v20, %v4992_v18  ;;  %v6474_v6 = vld [vmem:[#allocation2 + $0x3e4] sm:$0xf] }
  0x44   :  { %v4848_v25 = vld [vmem:[#allocation2 + $0x440] sm:$0xf]  ;;  %1527 = vmatpush.bf16.msrb.mxu0 %v4881_v13  ;;  %v7127_v27 = vld [vmem:[#allocation1 + $0x12] sm:$0xff]  ;;  %v7131_v29 = vld [vmem:[#allocation1 + $0x1b] sm:$0xff]  ;;  %v5121_v31 = vor.u32 %v6556_v22, %v5120_v21  ;;  %v4549_v13 = vor.u32 %v6410_v1, %v4546_v2 }
  0x45   :  { %1540 = vmatpush.bf16.msrb.mxu1 %v5009_v14  ;;  %v6488_v32 = vld [vmem:[#allocation2 + $0x44c] sm:$0xf0]  ;;  %v4976_v33 = vld [vmem:[#allocation2 + $0x540] sm:$0xf]  ;;  %1506 = vmatmul.bf16.vlgmr.msra.gmra.mxu2 %v7127_v27  ;;  %v4802_v7 = vld [vmem:[#allocation2 + $0x3f0] sm:$0xf0]  ;;  %v4677_v14 = vor.u32 %v6442_v3, %v4674_v5 }
  0x46   :  { %1553 = vmatpush.bf16.msrb.mxu2 %v5137_v15  ;;  %v7133_v34 = vld [vmem:[#allocation1 + $0x9] sm:$0xff]  ;;  %v6520_v36 = vld [vmem:[#allocation2 + $0x54c] sm:$0xf0]  ;;  %1519 = vmatmul.bf16.vlgmr.msra.gmra.mxu3 %v7131_v29  ;;  %v4849_v41 = vor.u32 %v6488_v32, %v4848_v25  ;;  %v4805_v15 = vor.u32 %v6474_v6, %v4802_v7  ;;  %v4530_v17 = vld [vmem:[#allocation2 + $0x1d0] sm:$0xf0] }
  0x47   :  { %1566 = vmatpush.bf16.msrb.mxu3 %v4373_v19  ;;  %v5104_v37 = vld [vmem:[#allocation2 + $0x640] sm:$0xf]  ;;  %v6552_v38 = vld [vmem:[#allocation2 + $0x64c] sm:$0xf0]  ;;  %1493 = vmatmul.bf16.vlgmr.msra.gmra.mxu1 %v7133_v34  ;;  %v4977_v42 = vor.u32 %v6520_v36, %v4976_v33  ;;  %v6506_v10 = vld [vmem:[#allocation2 + $0x4e4] sm:$0xf] }
  0x48   :  { %1528 = vmatpush.bf16.msrb.mxu0 %v4865_v26  ;;  %v5105_v43 = vor.u32 %v6552_v38, %v5104_v37  ;;  %v4832_v44 = vld [vmem:[#allocation2 + $0x420] sm:$0xf]  ;;  %v6484_v45 = vld [vmem:[#allocation2 + $0x42c] sm:$0xf0]  ;;  %v6406_v16 = vld [vmem:[#allocation2 + $0x1c4] sm:$0xf]  ;;  %v4933_v19 = vor.u32 %v6506_v10, %v4930_v11  ;;  %v4917_v38 = vor.u32 %v6502_v23, %v4914_v24 }
  0x49   :  { %1541 = vmatpush.bf16.msrb.mxu1 %v4993_v30  ;;  %v4960_v46 = vld [vmem:[#allocation2 + $0x520] sm:$0xf]  ;;  %v6516_v48 = vld [vmem:[#allocation2 + $0x52c] sm:$0xf0]  ;;  %v4833_v53 = vor.u32 %v6484_v45, %v4832_v44  ;;  %v6438_v18 = vld [vmem:[#allocation2 + $0x2c4] sm:$0xf]  ;;  %v4533_v26 = vor.u32 %v6406_v16, %v4530_v17 }
  0x4a   :  { %1554 = vmatpush.bf16.msrb.mxu2 %v5121_v31  ;;  %v5088_v49 = vld [vmem:[#allocation2 + $0x620] sm:$0xf]  ;;  %v6548_v50 = vld [vmem:[#allocation2 + $0x62c] sm:$0xf0]  ;;  %v4961_v56 = vor.u32 %v6516_v48, %v4960_v46  ;;  %v4658_v20 = vld [vmem:[#allocation2 + $0x2d0] sm:$0xf0] }
  0x4b   :  { %1567 = vmatpush.bf16.msrb.mxu3 %v4357_v35  ;;  %v4816_v54 = vld [vmem:[#allocation2 + $0x400] sm:$0xf]  ;;  %v6480_v55 = vld [vmem:[#allocation2 + $0x40c] sm:$0xf0]  ;;  %v5089_v57 = vor.u32 %v6548_v50, %v5088_v49  ;;  %v6470_v21 = vld [vmem:[#allocation2 + $0x3c4] sm:$0xf]  ;;  %v4661_v32 = vor.u32 %v6438_v18, %v4658_v20 }
  0x4c   :  { %1529 = vmatpush.bf16.msrb.mxu0 %v4849_v41  ;;  %v4944_v58 = vld [vmem:[#allocation2 + $0x500] sm:$0xf]  ;;  %v6512_v59 = vld [vmem:[#allocation2 + $0x50c] sm:$0xf0]  ;;  %v4817_v4 = vor.u32 %v6480_v55, %v4816_v54  ;;  %v4786_v22 = vld [vmem:[#allocation2 + $0x3d0] sm:$0xf0] }
  0x4d   :  { %1542 = vmatpush.bf16.msrb.mxu1 %v4977_v42  ;;  %v5072_v60 = vld [vmem:[#allocation2 + $0x600] sm:$0xf]  ;;  %v6544_v62 = vld [vmem:[#allocation2 + $0x60c] sm:$0xf0]  ;;  %v4945_v8 = vor.u32 %v6512_v59, %v4944_v58  ;;  %v7143_v31 = vld [vmem:[#allocation1 + $0x2d] sm:$0xff]  ;;  %v4789_v33 = vor.u32 %v6470_v21, %v4786_v22 }
  0x4e   :  { %1555 = vmatpush.bf16.msrb.mxu2 %v5105_v43  ;;  %v5073_v9 = vor.u32 %v6544_v62, %v5072_v60  ;;  %v7139_v25 = vld [vmem:[#allocation1 + $0x36] sm:$0xff]  ;;  %v7141_v30 = vld [vmem:[#allocation1 + $0x24] sm:$0xff]  ;;  %v6402_v35 = vld [vmem:[#allocation2 + $0x1a4] sm:$0xf] }
  0x4f   :  { %1568 = vmatpush.bf16.msrb.mxu3 %v4341_v47  ;;  %v4514_v36 = vld [vmem:[#allocation2 + $0x1b0] sm:$0xf0]  ;;  %v6434_v37 = vld [vmem:[#allocation2 + $0x2a4] sm:$0xf] }
  0x50   :  { %1530 = vmatpush.bf16.msrb.mxu0 %v4833_v53  ;;  %v4770_v41 = vld [vmem:[#allocation2 + $0x3b0] sm:$0xf0]  ;;  %v6498_v42 = vld [vmem:[#allocation2 + $0x4a4] sm:$0xf]  ;;  %v4517_v44 = vor.u32 %v6402_v35, %v4514_v36  ;;  %v4645_v45 = vor.u32 %v6434_v37, %v4642_v39 }
  0x51   :  { %1543 = vmatpush.bf16.msrb.mxu1 %v4961_v56  ;;  %v4898_v43 = vld [vmem:[#allocation2 + $0x4b0] sm:$0xf0]  ;;  %v4773_v46 = vor.u32 %v6466_v40, %v4770_v41  ;;  %v6398_v47 = vld [vmem:[#allocation2 + $0x184] sm:$0xf] }
  0x52   :  { %1556 = vmatpush.bf16.msrb.mxu2 %v5089_v57  ;;  %v4498_v48 = vld [vmem:[#allocation2 + $0x190] sm:$0xf0]  ;;  %v6430_v49 = vld [vmem:[#allocation2 + $0x284] sm:$0xf]  ;;  %v4901_v50 = vor.u32 %v6498_v42, %v4898_v43 }
  0x53   :  { %1569 = vmatpush.bf16.msrb.mxu3 %v4325_v61  ;;  %v6462_v52 = vld [vmem:[#allocation2 + $0x384] sm:$0xf]  ;;  %v4754_v53 = vld [vmem:[#allocation2 + $0x390] sm:$0xf0]  ;;  %v4501_v56 = vor.u32 %v6398_v47, %v4498_v48  ;;  %v4629_v57 = vor.u32 %v6430_v49, %v4626_v51 }
  0x54   :  { %1531 = vmatpush.bf16.msrb.mxu0 %v4817_v4  ;;  %v6494_v54 = vld [vmem:[#allocation2 + $0x484] sm:$0xf]  ;;  %v4882_v55 = vld [vmem:[#allocation2 + $0x490] sm:$0xf0]  ;;  %v4757_v58 = vor.u32 %v6462_v52, %v4754_v53  ;;  %v4424_v52 = vld [vmem:[#allocation2 + $0xe8] sm:$0xf] }
  0x55   :  { %1544 = vmatpush.bf16.msrb.mxu1 %v4945_v8  ;;  %v6394_v59 = vld [vmem:[#allocation2 + $0x164] sm:$0xf]  ;;  %v4482_v60 = vld [vmem:[#allocation2 + $0x170] sm:$0xf0]  ;;  %v4885_v62 = vor.u32 %v6494_v54, %v4882_v55  ;;  %v6381_v53 = vld [vmem:[#allocation2 + $0xf4] sm:$0xf0] }
  0x56   :  { %1557 = vmatpush.bf16.msrb.mxu2 %v5073_v9  ;;  %v6426_v61 = vld [vmem:[#allocation2 + $0x264] sm:$0xf]  ;;  %v4610_v63 = vld [vmem:[#allocation2 + $0x270] sm:$0xf0]  ;;  %v4485_v4 = vor.u32 %v6394_v59, %v4482_v60 }
  0x57   :  { %1570 = vmatpush.bf16.msrb.mxu3 %v4309_v12  ;;  %1532 = vmatmul.bf16.vlgmr.msrb.gmra.mxu0 %v7141_v30  ;;  %v6458_v0 = vld [vmem:[#allocation2 + $0x364] sm:$0xf]  ;;  %v4738_v1 = vld [vmem:[#allocation2 + $0x370] sm:$0xf0]  ;;  %v4613_v5 = vor.u32 %v6426_v61, %v4610_v63  ;;  %v4425_v61 = vor.u32 %v6381_v53, %v4424_v52 }
  0x58   :  { %1576 = vmatpush.bf16.msra.mxu0 %v4549_v13  ;;  %1545 = vmatmul.bf16.vlgmr.msrb.gmra.mxu1 %v7143_v31  ;;  %v6490_v2 = vld [vmem:[#allocation2 + $0x464] sm:$0xf]  ;;  %v4866_v3 = vld [vmem:[#allocation2 + $0x470] sm:$0xf0]  ;;  %v4741_v6 = vor.u32 %v6458_v0, %v4738_v1 }
  0x59   :  { %1589 = vmatpush.bf16.msra.mxu1 %v4677_v14  ;;  %1558 = vmatmul.bf16.vlgmr.msrb.gmra.mxu2 %v7139_v25  ;;  %v6390_v7 = vld [vmem:[#allocation2 + $0x144] sm:$0xf]  ;;  %v4466_v8 = vld [vmem:[#allocation2 + $0x150] sm:$0xf0]  ;;  %v4869_v10 = vor.u32 %v6490_v2, %v4866_v3  ;;  %v4408_v3 = vld [vmem:[#allocation2 + $0xc8] sm:$0xf] }
  0x5a   :  { %1602 = vmatpush.bf16.msra.mxu2 %v4805_v15  ;;  %1571 = vmatmul.bf16.vlgmr.msrb.gmra.mxu3 %v7129_v28  ;;  %v6422_v9 = vld [vmem:[#allocation2 + $0x244] sm:$0xf]  ;;  %v4594_v11 = vld [vmem:[#allocation2 + $0x250] sm:$0xf0]  ;;  %v4469_v16 = vor.u32 %v6390_v7, %v4466_v8 }
  0x5b   :  { %1615 = vmatpush.bf16.msra.mxu3 %v4933_v19  ;;  %v6454_v12 = vld [vmem:[#allocation2 + $0x344] sm:$0xf]  ;;  %v4722_v13 = vld [vmem:[#allocation2 + $0x350] sm:$0xf0]  ;;  %v4597_v17 = vor.u32 %v6422_v9, %v4594_v11 }
  0x5c   :  { %1577 = vmatpush.bf16.msra.mxu0 %v4533_v26  ;;  %v6486_v14 = vld [vmem:[#allocation2 + $0x444] sm:$0xf]  ;;  %v4850_v15 = vld [vmem:[#allocation2 + $0x450] sm:$0xf0]  ;;  %v4725_v18 = vor.u32 %v6454_v12, %v4722_v13 }
  0x5d   :  { %1590 = vmatpush.bf16.msra.mxu1 %v4661_v32  ;;  %v6386_v19 = vld [vmem:[#allocation2 + $0x124] sm:$0xf]  ;;  %v4450_v20 = vld [vmem:[#allocation2 + $0x130] sm:$0xf0]  ;;  %v4853_v22 = vor.u32 %v6486_v14, %v4850_v15  ;;  %v4392_v15 = vld [vmem:[#allocation2 + $0xa8] sm:$0xf] }
  0x5e   :  { %1603 = vmatpush.bf16.msra.mxu2 %v4789_v33  ;;  %v6418_v21 = vld [vmem:[#allocation2 + $0x224] sm:$0xf]  ;;  %v4578_v23 = vld [vmem:[#allocation2 + $0x230] sm:$0xf0]  ;;  %v4453_v35 = vor.u32 %v6386_v19, %v4450_v20 }
  0x5f   :  { %1616 = vmatpush.bf16.msra.mxu3 %v4917_v38  ;;  %v6450_v24 = vld [vmem:[#allocation2 + $0x324] sm:$0xf]  ;;  %v4706_v26 = vld [vmem:[#allocation2 + $0x330] sm:$0xf0]  ;;  %v4581_v38 = vor.u32 %v6418_v21, %v4578_v23 }
  0x60   :  { %1578 = vmatpush.bf16.msra.mxu0 %v4517_v44  ;;  %v6482_v32 = vld [vmem:[#allocation2 + $0x424] sm:$0xf]  ;;  %v4834_v33 = vld [vmem:[#allocation2 + $0x430] sm:$0xf0]  ;;  %v4709_v39 = vor.u32 %v6450_v24, %v4706_v26 }
  0x61   :  { %1591 = vmatpush.bf16.msra.mxu1 %v4645_v45  ;;  %v6382_v36 = vld [vmem:[#allocation2 + $0x104] sm:$0xf]  ;;  %v4434_v37 = vld [vmem:[#allocation2 + $0x110] sm:$0xf0]  ;;  %v4837_v43 = vor.u32 %v6482_v32, %v4834_v33  ;;  %v4376_v33 = vld [vmem:[#allocation2 + $0x88] sm:$0xf] }
  0x62   :  { %1604 = vmatpush.bf16.msra.mxu2 %v4773_v46  ;;  %v6414_v40 = vld [vmem:[#allocation2 + $0x204] sm:$0xf]  ;;  %v4562_v41 = vld [vmem:[#allocation2 + $0x210] sm:$0xf0] }
  0x63   :  { %1617 = vmatpush.bf16.msra.mxu3 %v4901_v50  ;;  %v6446_v42 = vld [vmem:[#allocation2 + $0x304] sm:$0xf]  ;;  %v4690_v44 = vld [vmem:[#allocation2 + $0x310] sm:$0xf0]  ;;  %v4437_v50 = vor.u32 %v6382_v36, %v4434_v37  ;;  %v4565_v54 = vor.u32 %v6414_v40, %v4562_v41  ;;  %v4504_v36 = vld [vmem:[#allocation2 + $0x188] sm:$0xf] }
  0x64   :  { %1579 = vmatpush.bf16.msra.mxu0 %v4501_v56  ;;  %v6478_v45 = vld [vmem:[#allocation2 + $0x404] sm:$0xf]  ;;  %v4818_v46 = vld [vmem:[#allocation2 + $0x410] sm:$0xf0]  ;;  %v4693_v55 = vor.u32 %v6446_v42, %v4690_v44  ;;  %v4552_v56 = vld [vmem:[#allocation2 + $0x1e8] sm:$0xf] }
  0x65   :  { %1592 = vmatpush.bf16.msra.mxu1 %v4629_v57  ;;  %v6538_v47 = vld [vmem:[#allocation2 + $0x5e4] sm:$0xf]  ;;  %v5058_v48 = vld [vmem:[#allocation2 + $0x5f0] sm:$0xf0]  ;;  %v6413_v57 = vld [vmem:[#allocation2 + $0x1f4] sm:$0xf0] }
  0x66   :  { %1605 = vmatpush.bf16.msra.mxu2 %v4757_v58  ;;  %v6570_v49 = vld [vmem:[#allocation2 + $0x6e4] sm:$0xf]  ;;  %v5186_v51 = vld [vmem:[#allocation2 + $0x6f0] sm:$0xf0]  ;;  %v4821_v58 = vor.u32 %v6478_v45, %v4818_v46  ;;  %v5061_v59 = vor.u32 %v6538_v47, %v5058_v48  ;;  %v4553_v1 = vor.u32 %v6413_v57, %v4552_v56  ;;  %v6401_v37 = vld [vmem:[#allocation2 + $0x194] sm:$0xf0] }
  0x67   :  { %1618 = vmatpush.bf16.msra.mxu3 %v4885_v62  ;;  %v5189_v60 = vor.u32 %v6570_v49, %v5186_v51  ;;  %v6534_v62 = vld [vmem:[#allocation2 + $0x5c4] sm:$0xf]  ;;  %v5042_v63 = vld [vmem:[#allocation2 + $0x5d0] sm:$0xf0]  ;;  %v4505_v44 = vor.u32 %v6401_v37, %v4504_v36  ;;  %v4360_v46 = vld [vmem:[#allocation2 + $0x68] sm:$0xf] }
  0x68   :  { %1580 = vmatpush.bf16.msra.mxu0 %v4485_v4  ;;  %v6566_v0 = vld [vmem:[#allocation2 + $0x6c4] sm:$0xf]  ;;  %v5170_v2 = vld [vmem:[#allocation2 + $0x6d0] sm:$0xf0]  ;;  %v6377_v4 = vld [vmem:[#allocation2 + $0xd4] sm:$0xf0]  ;;  %v5045_v7 = vor.u32 %v6534_v62, %v5042_v63 }
  0x69   :  { %1593 = vmatpush.bf16.msra.mxu1 %v4613_v5  ;;  %v4536_v5 = vld [vmem:[#allocation2 + $0x1c8] sm:$0xf]  ;;  %v5173_v8 = vor.u32 %v6566_v0, %v5170_v2  ;;  %v4409_v9 = vor.u32 %v6377_v4, %v4408_v3  ;;  %v5026_v11 = vld [vmem:[#allocation2 + $0x5b0] sm:$0xf0]  ;;  %v6562_v12 = vld [vmem:[#allocation2 + $0x6a4] sm:$0xf] }
  0x6a   :  { %1606 = vmatpush.bf16.msra.mxu2 %v4741_v6  ;;  %v6409_v6 = vld [vmem:[#allocation2 + $0x1d4] sm:$0xf0]  ;;  %v5154_v14 = vld [vmem:[#allocation2 + $0x6b0] sm:$0xf0]  ;;  %v6558_v24 = vld [vmem:[#allocation2 + $0x684] sm:$0xf] }
  0x6b   :  { %1619 = vmatpush.bf16.msra.mxu3 %v4869_v10  ;;  %v6530_v10 = vld [vmem:[#allocation2 + $0x5a4] sm:$0xf]  ;;  %v4537_v13 = vor.u32 %v6409_v6, %v4536_v5  ;;  %v5157_v20 = vor.u32 %v6562_v12, %v5154_v14  ;;  %v5010_v23 = vld [vmem:[#allocation2 + $0x590] sm:$0xf0]  ;;  %v6365_v47 = vld [vmem:[#allocation2 + $0x74] sm:$0xf0] }
  0x6c   :  { %1581 = vmatpush.bf16.msra.mxu0 %v4469_v16  ;;  %v6373_v16 = vld [vmem:[#allocation2 + $0xb4] sm:$0xf0]  ;;  %v5029_v19 = vor.u32 %v6530_v10, %v5026_v11  ;;  %v5138_v32 = vld [vmem:[#allocation2 + $0x690] sm:$0xf0]  ;;  %v6522_v41 = vld [vmem:[#allocation2 + $0x564] sm:$0xf]  ;;  %v4361_v52 = vor.u32 %v6365_v47, %v4360_v46 }
  0x6d   :  { %1594 = vmatpush.bf16.msra.mxu1 %v4597_v17  ;;  %v4520_v17 = vld [vmem:[#allocation2 + $0x1a8] sm:$0xf]  ;;  %v4393_v21 = vor.u32 %v6373_v16, %v4392_v15  ;;  %v4994_v42 = vld [vmem:[#allocation2 + $0x570] sm:$0xf0]  ;;  %v6397_v49 = vld [vmem:[#allocation2 + $0x174] sm:$0xf0] }
  0x6e   :  { %1607 = vmatpush.bf16.msra.mxu2 %v4725_v18  ;;  %v6405_v18 = vld [vmem:[#allocation2 + $0x1b4] sm:$0xf0]  ;;  %v5122_v45 = vld [vmem:[#allocation2 + $0x670] sm:$0xf0]  ;;  %v4488_v48 = vld [vmem:[#allocation2 + $0x168] sm:$0xf] }
  0x6f   :  { %1620 = vmatpush.bf16.msra.mxu3 %v4853_v22  ;;  %v6526_v22 = vld [vmem:[#allocation2 + $0x584] sm:$0xf]  ;;  %v4521_v26 = vor.u32 %v6405_v18, %v4520_v17  ;;  %v4489_v56 = vor.u32 %v6397_v49, %v4488_v48  ;;  %v5106_v57 = vld [vmem:[#allocation2 + $0x650] sm:$0xf0]  ;;  %v4328_v6 = vld [vmem:[#allocation2 + $0x28] sm:$0xf] }
  0x70   :  { %1582 = vmatpush.bf16.msra.mxu0 %v4453_v35  ;;  %v6369_v35 = vld [vmem:[#allocation2 + $0x94] sm:$0xf0]  ;;  %v6518_v53 = vld [vmem:[#allocation2 + $0x544] sm:$0xf]  ;;  %v4962_v2 = vld [vmem:[#allocation2 + $0x530] sm:$0xf0] }
  0x71   :  { %1595 = vmatpush.bf16.msra.mxu1 %v4581_v38  ;;  %v5013_v38 = vor.u32 %v6526_v22, %v5010_v23  ;;  %v4377_v40 = vor.u32 %v6369_v35, %v4376_v33  ;;  %v6546_v3 = vld [vmem:[#allocation2 + $0x624] sm:$0xf]  ;;  %v5090_v5 = vld [vmem:[#allocation2 + $0x630] sm:$0xf0]  ;;  %v4312_v17 = vld [vmem:[#allocation2 + $0x8] sm:$0xf] }
  0x72   :  { %1608 = vmatpush.bf16.msra.mxu2 %v4709_v39  ;;  %v5141_v39 = vor.u32 %v6558_v24, %v5138_v32  ;;  %v6510_v11 = vld [vmem:[#allocation2 + $0x504] sm:$0xf]  ;;  %v4946_v12 = vld [vmem:[#allocation2 + $0x510] sm:$0xf0]  ;;  %v4680_v22 = vld [vmem:[#allocation2 + $0x2e8] sm:$0xf] }
  0x73   :  { %1621 = vmatpush.bf16.msra.mxu3 %v4837_v43  ;;  %v6554_v43 = vld [vmem:[#allocation2 + $0x664] sm:$0xf]  ;;  %v5074_v16 = vld [vmem:[#allocation2 + $0x610] sm:$0xf0]  ;;  %v6445_v23 = vld [vmem:[#allocation2 + $0x2f4] sm:$0xf0] }
  0x74   :  { %1583 = vmatpush.bf16.msra.mxu0 %v4437_v50  ;;  %v4997_v50 = vor.u32 %v6522_v41, %v4994_v42  ;;  %v5125_v51 = vor.u32 %v6554_v43, %v5122_v45  ;;  %v6542_v15 = vld [vmem:[#allocation2 + $0x604] sm:$0xf]  ;;  %v4808_v24 = vld [vmem:[#allocation2 + $0x3e8] sm:$0xf]  ;;  %v6477_v32 = vld [vmem:[#allocation2 + $0x3f4] sm:$0xf0]  ;;  %v4681_v41 = vor.u32 %v6445_v23, %v4680_v22 }
  0x75   :  { %1596 = vmatpush.bf16.msra.mxu1 %v4565_v54  ;;  %v4978_v54 = vld [vmem:[#allocation2 + $0x550] sm:$0xf0]  ;;  %v4936_v33 = vld [vmem:[#allocation2 + $0x4e8] sm:$0xf]  ;;  %v6509_v35 = vld [vmem:[#allocation2 + $0x4f4] sm:$0xf0]  ;;  %v5077_v36 = vor.u32 %v6542_v15, %v5074_v16  ;;  %v4809_v42 = vor.u32 %v6477_v32, %v4808_v24 }
  0x76   :  { %1609 = vmatpush.bf16.msra.mxu2 %v4693_v55  ;;  %v6550_v55 = vld [vmem:[#allocation2 + $0x644] sm:$0xf]  ;;  %v4981_v62 = vor.u32 %v6518_v53, %v4978_v54  ;;  %v4937_v43 = vor.u32 %v6509_v35, %v4936_v33  ;;  %v6441_v45 = vld [vmem:[#allocation2 + $0x2d4] sm:$0xf0]  ;;  %v4792_v46 = vld [vmem:[#allocation2 + $0x3c8] sm:$0xf] }
  0x77   :  { %1622 = vmatpush.bf16.msra.mxu3 %v4821_v58  ;;  %1584 = vmatmul.bf16.vlgmr.msra.gmra.mxu0 %v7133_v34  ;;  %v4344_v58 = vld [vmem:[#allocation2 + $0x48] sm:$0xf]  ;;  %v5109_v63 = vor.u32 %v6550_v55, %v5106_v57  ;;  %v6473_v48 = vld [vmem:[#allocation2 + $0x3d4] sm:$0xf0] }
  0x78   :  { %1628 = vmatpush.bf16.msrb.mxu0 %v5061_v59  ;;  %1597 = vmatmul.bf16.vlgmr.msra.gmra.mxu1 %v7127_v27  ;;  %v6361_v59 = vld [vmem:[#allocation2 + $0x54] sm:$0xf0]  ;;  %v4920_v49 = vld [vmem:[#allocation2 + $0x4c8] sm:$0xf]  ;;  %v4793_v54 = vor.u32 %v6473_v48, %v4792_v46 }
  0x79   :  { %1641 = vmatpush.bf16.msrb.mxu1 %v5189_v60  ;;  %1610 = vmatmul.bf16.vlgmr.msra.gmra.mxu2 %v7131_v29  ;;  %v4472_v60 = vld [vmem:[#allocation2 + $0x148] sm:$0xf]  ;;  %v4345_v0 = vor.u32 %v6361_v59, %v4344_v58  ;;  %v6437_v57 = vld [vmem:[#allocation2 + $0x2b4] sm:$0xf0] }
  0x7a   :  { %1654 = vmatpush.bf16.msrb.mxu2 %v4425_v61  ;;  %1623 = vmatmul.bf16.vlgmr.msra.gmra.mxu3 %v7141_v30  ;;  %v6393_v61 = vld [vmem:[#allocation2 + $0x154] sm:$0xf0]  ;;  %v4776_v58 = vld [vmem:[#allocation2 + $0x3a8] sm:$0xf] }
  0x7b   :  { %1667 = vmatpush.bf16.msrb.mxu3 %v4553_v1  ;;  %v6514_v1 = vld [vmem:[#allocation2 + $0x524] sm:$0xf]  ;;  %v4473_v4 = vor.u32 %v6393_v61, %v4472_v60  ;;  %v6469_v60 = vld [vmem:[#allocation2 + $0x3b4] sm:$0xf0]  ;;  %v4904_v61 = vld [vmem:[#allocation2 + $0x4a8] sm:$0xf] }
  0x7c   :  { %1629 = vmatpush.bf16.msrb.mxu0 %v5045_v7  ;;  %v6357_v7 = vld [vmem:[#allocation2 + $0x34] sm:$0xf0]  ;;  %v4965_v10 = vor.u32 %v6514_v1, %v4962_v2  ;;  %v4777_v2 = vor.u32 %v6469_v60, %v4776_v58  ;;  %v4744_v15 = vld [vmem:[#allocation2 + $0x368] sm:$0xf] }
  0x7d   :  { %1642 = vmatpush.bf16.msrb.mxu1 %v5173_v8  ;;  %v4456_v8 = vld [vmem:[#allocation2 + $0x128] sm:$0xf]  ;;  %v4329_v14 = vor.u32 %v6357_v7, %v4328_v6  ;;  %v6425_v32 = vld [vmem:[#allocation2 + $0x254] sm:$0xf0] }
  0x7e   :  { %1655 = vmatpush.bf16.msrb.mxu2 %v4409_v9  ;;  %v6389_v9 = vld [vmem:[#allocation2 + $0x134] sm:$0xf0]  ;;  %v4760_v6 = vld [vmem:[#allocation2 + $0x388] sm:$0xf] }
  0x7f   :  { %1668 = vmatpush.bf16.msrb.mxu3 %v4537_v13  ;;  %v5093_v13 = vor.u32 %v6546_v3, %v5090_v5  ;;  %v4457_v18 = vor.u32 %v6389_v9, %v4456_v8  ;;  %v6433_v5 = vld [vmem:[#allocation2 + $0x294] sm:$0xf0]  ;;  %v4888_v9 = vld [vmem:[#allocation2 + $0x488] sm:$0xf] }
  0x80   :  { %1630 = vmatpush.bf16.msrb.mxu0 %v5029_v19  ;;  %v6353_v19 = vld [vmem:[#allocation2 + $0x14] sm:$0xf0]  ;;  %v4728_v33 = vld [vmem:[#allocation2 + $0x348] sm:$0xf] }
  0x81   :  { %1643 = vmatpush.bf16.msrb.mxu1 %v5157_v20  ;;  %v4440_v20 = vld [vmem:[#allocation2 + $0x108] sm:$0xf]  ;;  %v4313_v37 = vor.u32 %v6353_v19, %v4312_v17  ;;  %v6465_v8 = vld [vmem:[#allocation2 + $0x394] sm:$0xf0] }
  0x82   :  { %1656 = vmatpush.bf16.msrb.mxu2 %v4393_v21  ;;  %v6385_v21 = vld [vmem:[#allocation2 + $0x114] sm:$0xf0]  ;;  %v4712_v46 = vld [vmem:[#allocation2 + $0x328] sm:$0xf] }
  0x83   :  { %1669 = vmatpush.bf16.msrb.mxu3 %v4521_v26  ;;  %v4949_v26 = vor.u32 %v6510_v11, %v4946_v12  ;;  %v6529_v11 = vld [vmem:[#allocation2 + $0x594] sm:$0xf0]  ;;  %v4761_v12 = vor.u32 %v6465_v8, %v4760_v6  ;;  %v4696_v58 = vld [vmem:[#allocation2 + $0x308] sm:$0xf]  ;;  %v6411_v6 = vld [vmem:[#allocation2 + $0x1ec] sm:$0xf] }
  0x84   :  { %1631 = vmatpush.bf16.msrb.mxu0 %v5013_v38  ;;  %v5064_v38 = vld [vmem:[#allocation2 + $0x5e8] sm:$0xf]  ;;  %v6461_v17 = vld [vmem:[#allocation2 + $0x374] sm:$0xf0] }
  0x85   :  { %1644 = vmatpush.bf16.msrb.mxu1 %v5141_v39  ;;  %v6541_v39 = vld [vmem:[#allocation2 + $0x5f4] sm:$0xf0]  ;;  %v4745_v23 = vor.u32 %v6461_v17, %v4744_v15  ;;  %v4824_v60 = vld [vmem:[#allocation2 + $0x408] sm:$0xf]  ;;  %v6375_v15 = vld [vmem:[#allocation2 + $0xcc] sm:$0xf] }
  0x86   :  { %1657 = vmatpush.bf16.msrb.mxu2 %v4377_v40  ;;  %v4441_v40 = vor.u32 %v6385_v21, %v4440_v20  ;;  %v5065_v47 = vor.u32 %v6541_v39, %v5064_v38  ;;  %v6493_v19 = vld [vmem:[#allocation2 + $0x474] sm:$0xf0]  ;;  %v5000_v20 = vld [vmem:[#allocation2 + $0x568] sm:$0xf]  ;;  %v4410_v17 = vld [vmem:[#allocation2 + $0xd8] sm:$0xf0] }
  0x87   :  { %1670 = vmatpush.bf16.msrb.mxu3 %v4505_v44  ;;  %v4664_v44 = vld [vmem:[#allocation2 + $0x2c8] sm:$0xf]  ;;  %v6525_v21 = vld [vmem:[#allocation2 + $0x574] sm:$0xf0] }
  0x88   :  { %1632 = vmatpush.bf16.msrb.mxu0 %v4997_v50  ;;  %v6505_v50 = vld [vmem:[#allocation2 + $0x4d4] sm:$0xf0]  ;;  %v4665_v53 = vor.u32 %v6441_v45, %v4664_v44  ;;  %v5001_v35 = vor.u32 %v6525_v21, %v5000_v20  ;;  %v4984_v39 = vld [vmem:[#allocation2 + $0x548] sm:$0xf]  ;;  %v6439_v20 = vld [vmem:[#allocation2 + $0x2cc] sm:$0xf] }
  0x89   :  { %1645 = vmatpush.bf16.msrb.mxu1 %v5125_v51  ;;  %v5048_v51 = vld [vmem:[#allocation2 + $0x5c8] sm:$0xf]  ;;  %v4921_v55 = vor.u32 %v6505_v50, %v4920_v49  ;;  %v6489_v38 = vld [vmem:[#allocation2 + $0x454] sm:$0xf0]  ;;  %v4666_v21 = vld [vmem:[#allocation2 + $0x2d8] sm:$0xf0] }
  0x8a   :  { %1658 = vmatpush.bf16.msrb.mxu2 %v4361_v52  ;;  %v6537_v52 = vld [vmem:[#allocation2 + $0x5d4] sm:$0xf0]  ;;  %v4584_v44 = vld [vmem:[#allocation2 + $0x228] sm:$0xf] }
  0x8b   :  { %1671 = vmatpush.bf16.msrb.mxu3 %v4489_v56  ;;  %v4648_v56 = vld [vmem:[#allocation2 + $0x2a8] sm:$0xf]  ;;  %v5049_v59 = vor.u32 %v6537_v52, %v5048_v51  ;;  %v6421_v45 = vld [vmem:[#allocation2 + $0x234] sm:$0xf0] }
  0x8c   :  { %1633 = vmatpush.bf16.msrb.mxu0 %v4981_v62  ;;  %v6501_v62 = vld [vmem:[#allocation2 + $0x4b4] sm:$0xf0]  ;;  %v4649_v1 = vor.u32 %v6437_v57, %v4648_v56  ;;  %v4840_v49 = vld [vmem:[#allocation2 + $0x428] sm:$0xf] }
  0x8d   :  { %1646 = vmatpush.bf16.msrb.mxu1 %v5109_v63  ;;  %v5032_v63 = vld [vmem:[#allocation2 + $0x5a8] sm:$0xf]  ;;  %v4905_v3 = vor.u32 %v6501_v62, %v4904_v61  ;;  %v6453_v48 = vld [vmem:[#allocation2 + $0x334] sm:$0xf0] }
  0x8e   :  { %1659 = vmatpush.bf16.msrb.mxu2 %v4345_v0  ;;  %v6533_v0 = vld [vmem:[#allocation2 + $0x5b4] sm:$0xf0]  ;;  %v4968_v51 = vld [vmem:[#allocation2 + $0x528] sm:$0xf]  ;;  %v4713_v56 = vor.u32 %v6453_v48, %v4712_v46  ;;  %v6399_v48 = vld [vmem:[#allocation2 + $0x18c] sm:$0xf] }
  0x8f   :  { %1672 = vmatpush.bf16.msrb.mxu3 %v4473_v4  ;;  %v4632_v4 = vld [vmem:[#allocation2 + $0x288] sm:$0xf]  ;;  %v5033_v7 = vor.u32 %v6533_v0, %v5032_v63  ;;  %v6485_v50 = vld [vmem:[#allocation2 + $0x434] sm:$0xf0] }
  0x90   :  { %1634 = vmatpush.bf16.msrb.mxu0 %v4965_v10  ;;  %v5016_v10 = vld [vmem:[#allocation2 + $0x588] sm:$0xf]  ;;  %v6517_v52 = vld [vmem:[#allocation2 + $0x534] sm:$0xf0]  ;;  %v4841_v57 = vor.u32 %v6485_v50, %v4840_v49  ;;  %v4506_v49 = vld [vmem:[#allocation2 + $0x198] sm:$0xf0] }
  0x91   :  { %1647 = vmatpush.bf16.msrb.mxu1 %v5093_v13  ;;  %v4616_v13 = vld [vmem:[#allocation2 + $0x268] sm:$0xf]  ;;  %v5017_v16 = vor.u32 %v6529_v11, %v5016_v10  ;;  %v4969_v61 = vor.u32 %v6517_v52, %v4968_v51  ;;  %v6481_v62 = vld [vmem:[#allocation2 + $0x414] sm:$0xf0]  ;;  %v4682_v10 = vld [vmem:[#allocation2 + $0x2f8] sm:$0xf0] }
  0x92   :  { %1660 = vmatpush.bf16.msrb.mxu2 %v4329_v14  ;;  %v6429_v14 = vld [vmem:[#allocation2 + $0x274] sm:$0xf0]  ;;  %v4952_v63 = vld [vmem:[#allocation2 + $0x508] sm:$0xf]  ;;  %v6431_v50 = vld [vmem:[#allocation2 + $0x28c] sm:$0xf] }
  0x93   :  { %1673 = vmatpush.bf16.msrb.mxu3 %v4457_v18  ;;  %v4872_v18 = vld [vmem:[#allocation2 + $0x468] sm:$0xf]  ;;  %v4617_v22 = vor.u32 %v6429_v14, %v4616_v13  ;;  %v6513_v0 = vld [vmem:[#allocation2 + $0x514] sm:$0xf0] }
  0x94   :  { %1635 = vmatpush.bf16.msrb.mxu0 %v4949_v26  ;;  %v4873_v24 = vor.u32 %v6493_v19, %v4872_v18  ;;  %v4600_v26 = vld [vmem:[#allocation2 + $0x248] sm:$0xf]  ;;  %v4953_v11 = vor.u32 %v6513_v0, %v4952_v63  ;;  %v6569_v14 = vld [vmem:[#allocation2 + $0x6d4] sm:$0xf0]  ;;  %v6407_v18 = vld [vmem:[#allocation2 + $0x1cc] sm:$0xf] }
  0x95   :  { %1648 = vmatpush.bf16.msrb.mxu1 %v5077_v36  ;;  %v6457_v36 = vld [vmem:[#allocation2 + $0x354] sm:$0xf0]  ;;  %v5176_v13 = vld [vmem:[#allocation2 + $0x6c8] sm:$0xf]  ;;  %v4538_v19 = vld [vmem:[#allocation2 + $0x1d8] sm:$0xf0] }
  0x96   :  { %1661 = vmatpush.bf16.msrb.mxu2 %v4313_v37  ;;  %v4856_v37 = vld [vmem:[#allocation2 + $0x448] sm:$0xf] }
  0x97   :  { %1674 = vmatpush.bf16.msrb.mxu3 %v4441_v40  ;;  %1636 = vmatmul.bf16.vlgmr.msrb.gmra.mxu0 %v7143_v31  ;;  %v6521_v40 = vld [vmem:[#allocation2 + $0x554] sm:$0xf0]  ;;  %v5128_v52 = vld [vmem:[#allocation2 + $0x668] sm:$0xf] }
  0x98   :  { %1680 = vmatpush.bf16.msra.mxu0 %v4681_v41  ;;  %1649 = vmatmul.bf16.vlgmr.msrb.gmra.mxu1 %v7139_v25  ;;  %v6497_v25 = vld [vmem:[#allocation2 + $0x494] sm:$0xf0]  ;;  %v4601_v41 = vor.u32 %v6425_v32, %v4600_v26  ;;  %v5160_v26 = vld [vmem:[#allocation2 + $0x6a8] sm:$0xf] }
  0x99   :  { %1693 = vmatpush.bf16.msra.mxu1 %v4809_v42  ;;  %1662 = vmatmul.bf16.vlgmr.msrb.gmra.mxu2 %v7129_v28  ;;  %v4633_v28 = vor.u32 %v6433_v5, %v4632_v4  ;;  %v4729_v42 = vor.u32 %v6457_v36, %v4728_v33  ;;  %v4426_v5 = vld [vmem:[#allocation2 + $0xf8] sm:$0xf0]  ;;  %v6565_v32 = vld [vmem:[#allocation2 + $0x6b4] sm:$0xf0]  ;;  %v6371_v33 = vld [vmem:[#allocation2 + $0xac] sm:$0xf] }
  0x9a   :  { %1706 = vmatpush.bf16.msra.mxu2 %v4937_v43  ;;  %1675 = vmatmul.bf16.vlgmr.msrb.gmra.mxu3 %v7133_v34  ;;  %v4889_v34 = vor.u32 %v6497_v25, %v4888_v9  ;;  %v4857_v43 = vor.u32 %v6489_v38, %v4856_v37  ;;  %v4825_v9 = vor.u32 %v6481_v62, %v4824_v60  ;;  %v6443_v25 = vld [vmem:[#allocation2 + $0x2ec] sm:$0xf]  ;;  %v4394_v36 = vld [vmem:[#allocation2 + $0xb8] sm:$0xf0]  ;;  %v5112_v0 = vld [vmem:[#allocation2 + $0x648] sm:$0xf] }
  0x9b   :  { %1719 = vmatpush.bf16.msra.mxu3 %v5065_v47  ;;  %v4985_v47 = vor.u32 %v6521_v40, %v4984_v39  ;;  %v6403_v37 = vld [vmem:[#allocation2 + $0x1ac] sm:$0xf]  ;;  %v4522_v38 = vld [vmem:[#allocation2 + $0x1b8] sm:$0xf0] }
  0x9c   :  { %1681 = vmatpush.bf16.msra.mxu0 %v4665_v53  ;;  %v4585_v53 = vor.u32 %v6421_v45, %v4584_v44  ;;  %v6435_v39 = vld [vmem:[#allocation2 + $0x2ac] sm:$0xf]  ;;  %v4650_v40 = vld [vmem:[#allocation2 + $0x2b8] sm:$0xf0]  ;;  %v5144_v44 = vld [vmem:[#allocation2 + $0x688] sm:$0xf] }
  0x9d   :  { %1694 = vmatpush.bf16.msra.mxu1 %v4793_v54  ;;  %v4568_v54 = vld [vmem:[#allocation2 + $0x208] sm:$0xf]  ;;  %v6561_v45 = vld [vmem:[#allocation2 + $0x694] sm:$0xf0]  ;;  %v4653_v46 = vor.u32 %v6435_v39, %v4650_v40  ;;  %v4618_v60 = vld [vmem:[#allocation2 + $0x278] sm:$0xf0] }
  0x9e   :  { %1707 = vmatpush.bf16.msra.mxu2 %v4921_v55  ;;  %v6417_v55 = vld [vmem:[#allocation2 + $0x214] sm:$0xf0]  ;;  %v6475_v39 = vld [vmem:[#allocation2 + $0x3ec] sm:$0xf]  ;;  %v4810_v40 = vld [vmem:[#allocation2 + $0x3f8] sm:$0xf0] }
  0x9f   :  { %1720 = vmatpush.bf16.msra.mxu3 %v5049_v59  ;;  %v6449_v59 = vld [vmem:[#allocation2 + $0x314] sm:$0xf0]  ;;  %v4569_v4 = vor.u32 %v6417_v55, %v4568_v54  ;;  %v6363_v54 = vld [vmem:[#allocation2 + $0x6c] sm:$0xf] }
  0xa0   :  { %1682 = vmatpush.bf16.msra.mxu0 %v4649_v1  ;;  %v5192_v1 = vld [vmem:[#allocation2 + $0x6e8] sm:$0xf]  ;;  %v4697_v8 = vor.u32 %v6449_v59, %v4696_v58  ;;  %v4490_v58 = vld [vmem:[#allocation2 + $0x178] sm:$0xf0]  ;;  %v6427_v59 = vld [vmem:[#allocation2 + $0x26c] sm:$0xf] }
  0xa1   :  { %1695 = vmatpush.bf16.msra.mxu1 %v4777_v2  ;;  %v6573_v2 = vld [vmem:[#allocation2 + $0x6f4] sm:$0xf0] }
  0xa2   :  { %1708 = vmatpush.bf16.msra.mxu2 %v4905_v3  ;;  %v6379_v3 = vld [vmem:[#allocation2 + $0xec] sm:$0xf] }
  0xa3   :  { %1721 = vmatpush.bf16.msra.mxu3 %v5033_v7  ;;  %v4554_v7 = vld [vmem:[#allocation2 + $0x1f8] sm:$0xf0] }
  0xa4   :  { %1683 = vmatpush.bf16.msra.mxu0 %v4633_v28  ;;  %v5193_v28 = vor.u32 %v6573_v2, %v5192_v1  ;;  %v6553_v1 = vld [vmem:[#allocation2 + $0x654] sm:$0xf0]  ;;  %v6359_v2 = vld [vmem:[#allocation2 + $0x4c] sm:$0xf] }
  0xa5   :  { %1696 = vmatpush.bf16.msra.mxu1 %v4761_v12  ;;  %v4429_v12 = vor.u32 %v6379_v3, %v4426_v5  ;;  %v4621_v3 = vor.u32 %v6427_v59, %v4618_v60  ;;  %v6391_v5 = vld [vmem:[#allocation2 + $0x14c] sm:$0xf] }
  0xa6   :  { %1709 = vmatpush.bf16.msra.mxu2 %v4889_v34  ;;  %v4557_v34 = vor.u32 %v6411_v6, %v4554_v7  ;;  %v4474_v6 = vld [vmem:[#allocation2 + $0x158] sm:$0xf0]  ;;  %v6423_v7 = vld [vmem:[#allocation2 + $0x24c] sm:$0xf] }
  0xa7   :  { %1722 = vmatpush.bf16.msra.mxu3 %v5017_v16  ;;  %v4685_v16 = vor.u32 %v6443_v25, %v4682_v10  ;;  %v4477_v10 = vor.u32 %v6391_v5, %v4474_v6  ;;  %v6567_v60 = vld [vmem:[#allocation2 + $0x6cc] sm:$0xf] }
  0xa8   :  { %1684 = vmatpush.bf16.msra.mxu0 %v4617_v22  ;;  %v5177_v22 = vor.u32 %v6569_v14, %v5176_v13  ;;  %v4330_v13 = vld [vmem:[#allocation2 + $0x38] sm:$0xf0]  ;;  %v6387_v14 = vld [vmem:[#allocation2 + $0x12c] sm:$0xf] }
  0xa9   :  { %1697 = vmatpush.bf16.msra.mxu1 %v4745_v23  ;;  %v4413_v23 = vor.u32 %v6375_v15, %v4410_v17  ;;  %v4458_v15 = vld [vmem:[#allocation2 + $0x138] sm:$0xf0]  ;;  %v7169_v5 = vld [vmem:[#allocation1 + $0x36] sm:$0xff] }
  0xaa   :  { %1710 = vmatpush.bf16.msra.mxu2 %v4873_v24  ;;  %v4541_v24 = vor.u32 %v6407_v18, %v4538_v19  ;;  %v4586_v17 = vld [vmem:[#allocation2 + $0x238] sm:$0xf0]  ;;  %v5080_v19 = vld [vmem:[#allocation2 + $0x608] sm:$0xf] }
  0xab   :  { %1723 = vmatpush.bf16.msra.mxu3 %v5001_v35  ;;  %v4669_v35 = vor.u32 %v6439_v20, %v4666_v21  ;;  %v6545_v20 = vld [vmem:[#allocation2 + $0x614] sm:$0xf0] }
  0xac   :  { %1685 = vmatpush.bf16.msra.mxu0 %v4601_v41  ;;  %v5161_v41 = vor.u32 %v6565_v32, %v5160_v26  ;;  %v4314_v26 = vld [vmem:[#allocation2 + $0x18] sm:$0xf0]  ;;  %v6383_v32 = vld [vmem:[#allocation2 + $0x10c] sm:$0xf] }
  0xad   :  { %1698 = vmatpush.bf16.msra.mxu1 %v4729_v42  ;;  %v4397_v42 = vor.u32 %v6371_v33, %v4394_v36  ;;  %v4442_v36 = vld [vmem:[#allocation2 + $0x118] sm:$0xf0] }
  0xae   :  { %1711 = vmatpush.bf16.msra.mxu2 %v4857_v43  ;;  %v4525_v43 = vor.u32 %v6403_v37, %v4522_v38  ;;  %v6415_v37 = vld [vmem:[#allocation2 + $0x20c] sm:$0xf]  ;;  %v4570_v38 = vld [vmem:[#allocation2 + $0x218] sm:$0xf0] }
  0xaf   :  { %1724 = vmatpush.bf16.msra.mxu3 %v4985_v47  ;;  %v4378_v47 = vld [vmem:[#allocation2 + $0x98] sm:$0xf0] }
  0xb0   :  { %1686 = vmatpush.bf16.msra.mxu0 %v4585_v53  ;;  %v6557_v53 = vld [vmem:[#allocation2 + $0x674] sm:$0xf0] }
  0xb1   :  { %1699 = vmatpush.bf16.msra.mxu1 %v4713_v56  ;;  %v4362_v56 = vld [vmem:[#allocation2 + $0x78] sm:$0xf0] }
  0xb2   :  { %1712 = vmatpush.bf16.msra.mxu2 %v4841_v57  ;;  %v6395_v57 = vld [vmem:[#allocation2 + $0x16c] sm:$0xf]  ;;  %v4365_v62 = vor.u32 %v6363_v54, %v4362_v56  ;;  %v4922_v56 = vld [vmem:[#allocation2 + $0x4d8] sm:$0xf0] }
  0xb3   :  { %1725 = vmatpush.bf16.msra.mxu3 %v4969_v61  ;;  %v5129_v61 = vor.u32 %v6557_v53, %v5128_v52  ;;  %v4493_v63 = vor.u32 %v6395_v57, %v4490_v58  ;;  %v6471_v52 = vld [vmem:[#allocation2 + $0x3cc] sm:$0xf]  ;;  %v4794_v53 = vld [vmem:[#allocation2 + $0x3d8] sm:$0xf0] }
  0xb4   :  { %1687 = vmatpush.bf16.msra.mxu0 %v4569_v4  ;;  %v4346_v4 = vld [vmem:[#allocation2 + $0x58] sm:$0xf0]  ;;  %v7161_v21 = vpop.f32.mrf.mxu0  ;;  %v6503_v54 = vld [vmem:[#allocation2 + $0x4cc] sm:$0xf] }
  0xb5   :  { %1700 = vmatpush.bf16.msra.mxu1 %v4697_v8  ;;  %v4602_v8 = vld [vmem:[#allocation2 + $0x258] sm:$0xf0]  ;;  %v4349_v25 = vor.u32 %v6359_v2, %v4346_v4  ;;  %v6535_v57 = vld [vmem:[#allocation2 + $0x5cc] sm:$0xf] }
  0xb6   :  { %1713 = vmatpush.bf16.msra.mxu2 %v4825_v9  ;;  %v5113_v9 = vor.u32 %v6553_v1, %v5112_v0  ;;  %v5050_v58 = vld [vmem:[#allocation2 + $0x5d8] sm:$0xf0]  ;;  %v4925_v0 = vor.u32 %v6503_v54, %v4922_v56  ;;  %v6467_v2 = vld [vmem:[#allocation2 + $0x3ac] sm:$0xf] }
  0xb7   :  { %1726 = vmatpush.bf16.msra.mxu3 %v4953_v11  ;;  %1688 = vmatmul.bf16.vlgmr.msra.gmra.mxu0 %v7127_v27  ;;  %v4634_v27 = vld [vmem:[#allocation2 + $0x298] sm:$0xf0]  ;;  %v5096_v11 = vld [vmem:[#allocation2 + $0x628] sm:$0xf]  ;;  %v5053_v1 = vor.u32 %v6535_v57, %v5050_v58  ;;  %v6499_v4 = vld [vmem:[#allocation2 + $0x4ac] sm:$0xf] }
  0xb8   :  { %1732 = vmatpush.bf16.msrb.mxu0 %v5193_v28  ;;  %1701 = vmatmul.bf16.vlgmr.msra.gmra.mxu1 %v7131_v29  ;;  %v4509_v29 = vor.u32 %v6399_v48, %v4506_v49  ;;  %v4637_v55 = vor.u32 %v6431_v50, %v4634_v27  ;;  %v6549_v28 = vld [vmem:[#allocation2 + $0x634] sm:$0xf0]  ;;  %v5194_v48 = vld [vmem:[#allocation2 + $0x6f8] sm:$0xf0]  ;;  %v4573_v50 = vor.u32 %v6415_v37, %v4570_v38  ;;  %v6519_v56 = vld [vmem:[#allocation2 + $0x54c] sm:$0xf] }
  0xb9   :  { %1745 = vmatpush.bf16.msrb.mxu1 %v4429_v12  ;;  %1714 = vmatmul.bf16.vlgmr.msra.gmra.mxu2 %v7141_v30  ;;  %v6367_v30 = vld [vmem:[#allocation2 + $0x8c] sm:$0xf]  ;;  %v5097_v18 = vor.u32 %v6549_v28, %v5096_v11  ;;  %v4813_v27 = vor.u32 %v6475_v39, %v4810_v40  ;;  %v5162_v11 = vld [vmem:[#allocation2 + $0x6b8] sm:$0xf0] }
  0xba   :  { %1758 = vmatpush.bf16.msrb.mxu2 %v4557_v34  ;;  %1727 = vmatmul.bf16.vlgmr.msra.gmra.mxu3 %v7143_v31  ;;  %v5145_v31 = vor.u32 %v6561_v45, %v5144_v44  ;;  %v4381_v51 = vor.u32 %v6367_v30, %v4378_v47  ;;  %v6355_v12 = vld [vmem:[#allocation2 + $0x2c] sm:$0xf]  ;;  %v4605_v34 = vor.u32 %v6423_v7, %v4602_v8  ;;  %v5066_v45 = vld [vmem:[#allocation2 + $0x5f8] sm:$0xf0] }
  0xbb   :  { %1771 = vmatpush.bf16.msrb.mxu3 %v4685_v16  ;;  %v6419_v16 = vld [vmem:[#allocation2 + $0x22c] sm:$0xf]  ;;  %v4906_v7 = vld [vmem:[#allocation2 + $0x4b8] sm:$0xf0] }
  0xbc   :  { %1733 = vmatpush.bf16.msrb.mxu0 %v5177_v22  ;;  %v4333_v22 = vor.u32 %v6355_v12, %v4330_v13  ;;  %v6539_v44 = vld [vmem:[#allocation2 + $0x5ec] sm:$0xf]  ;;  %v1483_v59 = vpop.f32.mrf.mxu0  ;;  %v6907_v13 = vld [vmem:[#allocation1] sm:$0xff] }
  0xbd   :  { %1746 = vmatpush.bf16.msrb.mxu1 %v4413_v23  ;;  %v4461_v23 = vor.u32 %v6387_v14, %v4458_v15  ;;  %v6571_v47 = vld [vmem:[#allocation2 + $0x6ec] sm:$0xf]  ;;  %v4909_v15 = vor.u32 %v6499_v4, %v4906_v7  ;;  %v4986_v57 = vld [vmem:[#allocation2 + $0x558] sm:$0xf0] }
  0xbe   :  { %1759 = vmatpush.bf16.msrb.mxu2 %v4541_v24  ;;  %v6351_v24 = vld [vmem:[#allocation2 + $0xc] sm:$0xf]  ;;  %v5114_v59 = vld [vmem:[#allocation2 + $0x658] sm:$0xf0] }
  0xbf   :  { %1772 = vmatpush.bf16.msrb.mxu3 %v4669_v35  ;;  %v4589_v35 = vor.u32 %v6419_v16, %v4586_v17  ;;  %v4317_v30 = vor.u32 %v6351_v24, %v4314_v26  ;;  %v6531_v8 = vld [vmem:[#allocation2 + $0x5ac] sm:$0xf]  ;;  %v5018_v24 = vld [vmem:[#allocation2 + $0x598] sm:$0xf0] }
  0xc0   :  { %1734 = vmatpush.bf16.msrb.mxu0 %v5161_v41  ;;  %v6507_v41 = vld [vmem:[#allocation2 + $0x4ec] sm:$0xf]  ;;  %v4842_v7 = vld [vmem:[#allocation2 + $0x438] sm:$0xf0] }
  0xc1   :  { %1747 = vmatpush.bf16.msrb.mxu1 %v4397_v42  ;;  %v5081_v42 = vor.u32 %v6545_v20, %v5080_v19  ;;  %v6906_v28 = vld [vmem:[#allocation1 + $0x12] sm:$0xff] }
  0xc2   :  { %1760 = vmatpush.bf16.msrb.mxu2 %v4525_v43  ;;  %v4938_v43 = vld [vmem:[#allocation2 + $0x4f8] sm:$0xf0]  ;;  %v6463_v17 = vld [vmem:[#allocation2 + $0x38c] sm:$0xf] }
  0xc3   :  { %1773 = vmatpush.bf16.msrb.mxu3 %v4653_v46  ;;  %v4445_v46 = vor.u32 %v6383_v32, %v4442_v36  ;;  %v6495_v19 = vld [vmem:[#allocation2 + $0x48c] sm:$0xf]  ;;  %v5146_v32 = vld [vmem:[#allocation2 + $0x698] sm:$0xf0] }
  0xc4   :  { %1735 = vmatpush.bf16.msrb.mxu0 %v5145_v31  ;;  %v7163_v33 = vpop.f32.mrf.mxu1  ;;  %v6559_v26 = vld [vmem:[#allocation2 + $0x68c] sm:$0xf] }
  0xc5   :  { %1748 = vmatpush.bf16.msrb.mxu1 %v4381_v51  ;;  %v4941_v51 = vor.u32 %v6507_v41, %v4938_v43  ;;  %v6459_v40 = vld [vmem:[#allocation2 + $0x36c] sm:$0xf]  ;;  %v4746_v41 = vld [vmem:[#allocation2 + $0x378] sm:$0xf0]  ;;  %v5149_v43 = vor.u32 %v6559_v26, %v5146_v32 }
  0xc6   :  { %1761 = vmatpush.bf16.msrb.mxu2 %v4509_v29  ;;  %v5069_v29 = vor.u32 %v6539_v44, %v5066_v45  ;;  %v4874_v44 = vld [vmem:[#allocation2 + $0x478] sm:$0xf0]  ;;  %v6523_v45 = vld [vmem:[#allocation2 + $0x56c] sm:$0xf] }
  0xc7   :  { %1774 = vmatpush.bf16.msrb.mxu3 %v4637_v55  ;;  %v5197_v55 = vor.u32 %v6571_v47, %v5194_v48  ;;  %v5130_v47 = vld [vmem:[#allocation2 + $0x678] sm:$0xf0]  ;;  %v4749_v48 = vor.u32 %v6459_v40, %v4746_v41  ;;  %v6551_v58 = vld [vmem:[#allocation2 + $0x64c] sm:$0xf] }
  0xc8   :  { %1736 = vmatpush.bf16.msrb.mxu0 %v5129_v61  ;;  %v7165_v49 = vpop.f32.mrf.mxu2  ;;  %v5178_v61 = vld [vmem:[#allocation2 + $0x6d8] sm:$0xf0]  ;;  %v6483_v4 = vld [vmem:[#allocation2 + $0x42c] sm:$0xf] }
  0xc9   :  { %1749 = vmatpush.bf16.msrb.mxu1 %v4365_v62  ;;  %v7167_v31 = vpop.f32.mrf.mxu3  ;;  %v5181_v6 = vor.u32 %v6567_v60, %v5178_v61  ;;  %v6581_v40 = vld [vmem:[#allocation5 + $0x38] sm:$0xff] }
  0xca   :  { %1762 = vmatpush.bf16.msrb.mxu2 %v4493_v63  ;;  %v4797_v63 = vor.u32 %v6471_v52, %v4794_v53  ;;  %v6487_v52 = vld [vmem:[#allocation2 + $0x44c] sm:$0xf] }
  0xcb   :  { %1775 = vmatpush.bf16.msrb.mxu3 %v4621_v3  ;;  %v4778_v3 = vld [vmem:[#allocation2 + $0x3b8] sm:$0xf0] }
  0xcc   :  { %1737 = vmatpush.bf16.msrb.mxu0 %v5113_v9  ;;  %v1496_v62 = vpop.f32.mrf.mxu1  ;;  %v5034_v9 = vld [vmem:[#allocation2 + $0x5b8] sm:$0xf0] }
  0xcd   :  { %1750 = vmatpush.bf16.msrb.mxu1 %v4349_v25  ;;  %v6905_v25 = vld [vmem:[#allocation1 + $0x9] sm:$0xff]  ;;  %v5037_v16 = vor.u32 %v6531_v8, %v5034_v9  ;;  %v6515_v8 = vld [vmem:[#allocation2 + $0x52c] sm:$0xf]  ;;  %v4970_v9 = vld [vmem:[#allocation2 + $0x538] sm:$0xf0] }
  0xce   :  { %1763 = vmatpush.bf16.msrb.mxu2 %v4477_v10  ;;  %v6563_v10 = vld [vmem:[#allocation2 + $0x6ac] sm:$0xf] }
  0xcf   :  { %1776 = vmatpush.bf16.msrb.mxu3 %v4605_v34  ;;  %v4781_v34 = vor.u32 %v6467_v2, %v4778_v3  ;;  %v5165_v20 = vor.u32 %v6563_v10, %v5162_v11  ;;  %v6451_v2 = vld [vmem:[#allocation2 + $0x32c] sm:$0xf]  ;;  %v4714_v3 = vld [vmem:[#allocation2 + $0x338] sm:$0xf0]  ;;  %v7183_v11 = vld [vmem:[%s7277_s2] sm:$0xf] }
  0xd0   :  { %1738 = vmatpush.bf16.msrb.mxu0 %v5097_v18  ;;  %v1509_v12 = vpop.f32.mrf.mxu2  ;;  %v4762_v18 = vld [vmem:[#allocation2 + $0x398] sm:$0xf0] }
  0xd1   :  { %1751 = vmatpush.bf16.msrb.mxu1 %v4333_v22  ;;  %v1522_v14 = vpop.f32.mrf.mxu3  ;;  %v4890_v22 = vld [vmem:[#allocation2 + $0x498] sm:$0xf0]  ;;  %v4845_v12 = vor.u32 %v6483_v4, %v4842_v7  ;;  %v6574_v7 = vld [vmem:[#allocation5] sm:$0xff] }
  0xd2   :  { %1764 = vmatpush.bf16.msrb.mxu2 %v4461_v23  ;;  %v6527_v23 = vld [vmem:[#allocation2 + $0x58c] sm:$0xf]  ;;  %v4893_v38 = vor.u32 %v6495_v19, %v4890_v22  ;;  %v5098_v10 = vld [vmem:[#allocation2 + $0x638] sm:$0xf0]  ;;  %v328_v22 = vperm.slane %v7183_v11, 0 }
  0xd3   :  { %1777 = vmatpush.bf16.msrb.mxu3 %v4589_v35  ;;  %v4765_v35 = vor.u32 %v6463_v17, %v4762_v18  ;;  %v5021_v39 = vor.u32 %v6527_v23, %v5018_v24  ;;  %v4698_v14 = vld [vmem:[#allocation2 + $0x318] sm:$0xf0]  ;;  %v6511_v19 = vld [vmem:[#allocation2 + $0x50c] sm:$0xf] }
  0xd4   :  { %1739 = vmatpush.bf16.msrb.mxu0 %v5081_v42  ;;  %v7172_v36 = vpop.f32.mrf.mxu0  ;;  %v6491_v42 = vld [vmem:[#allocation2 + $0x46c] sm:$0xf]  ;;  %v4826_v18 = vld [vmem:[#allocation2 + $0x418] sm:$0xf0]  ;;  %v1482_v41 = vadd.f32 %v7161_v21, %v328_v22 }
  0xd5   :  { %1752 = vmatpush.bf16.msrb.mxu1 %v4317_v30  ;;  %v7174_v37 = vpop.f32.mrf.mxu1  ;;  %v5002_v30 = vld [vmem:[#allocation2 + $0x578] sm:$0xf0]  ;;  %v6543_v23 = vld [vmem:[#allocation2 + $0x60c] sm:$0xf] }
  0xd6   :  { %1765 = vmatpush.bf16.msrb.mxu2 %v4445_v46  ;;  %v6555_v46 = vld [vmem:[#allocation2 + $0x66c] sm:$0xf]  ;;  %v5082_v24 = vld [vmem:[#allocation2 + $0x618] sm:$0xf0] }
  0xd7   :  { %1778 = vmatpush.bf16.msrb.mxu3 %v4573_v50  ;;  %1740 = vmatmul.bf16.vlgmr.msrb.gmra.mxu0 %v7169_v5  ;;  %v4877_v50 = vor.u32 %v6491_v42, %v4874_v44  ;;  %v5133_v54 = vor.u32 %v6555_v46, %v5130_v47  ;;  %v6589_v42 = vld [vmem:[#allocation5 + $0x78] sm:$0xff]  ;;  %v1495_v44 = vadd.f32 %v7163_v33, %v1482_v41  ;;  %v6910_v47 = vld [vmem:[#allocation1 + $0x2d] sm:$0xff]  ;;  %v330_v41 = vperm.slane %v7183_v11, 2 }
  0xd8   :  { %1784 = vmatpush.bf16.msra.mxu0 %v4813_v27  ;;  %1753 = vmatmul.bf16.vlgmr.msrb.gmra.mxu1 %v6907_v13  ;;  %v5005_v27 = vor.u32 %v6523_v45, %v5002_v30  ;;  %v6447_v13 = vld [vmem:[#allocation2 + $0x30c] sm:$0xf]  ;;  %v6908_v45 = vld [vmem:[#allocation1 + $0x1b] sm:$0xff]  ;;  %v6909_v46 = vld [vmem:[#allocation1 + $0x24] sm:$0xff] }
  0xd9   :  { %1797 = vmatpush.bf16.msra.mxu1 %v4941_v51  ;;  %1766 = vmatmul.bf16.vlgmr.msrb.gmra.mxu2 %v6905_v25  ;;  %v6455_v51 = vld [vmem:[#allocation2 + $0x34c] sm:$0xf]  ;;  %v4701_v32 = vor.u32 %v6447_v13, %v4698_v14  ;;  %v6588_v30 = vld [vmem:[#allocation5 + $0x70] sm:$0xff] }
  0xda   :  { %1810 = vmatpush.bf16.msra.mxu2 %v5069_v29  ;;  %1779 = vmatmul.bf16.vlgmr.msrb.gmra.mxu3 %v6906_v28  ;;  %v4730_v29 = vld [vmem:[#allocation2 + $0x358] sm:$0xf0]  ;;  %v6547_v25 = vld [vmem:[#allocation2 + $0x62c] sm:$0xf]  ;;  %v4717_v28 = vor.u32 %v6451_v2, %v4714_v3 }
  0xdb   :  { %1823 = vmatpush.bf16.msra.mxu3 %v5197_v55  ;;  %v4858_v55 = vld [vmem:[#allocation2 + $0x458] sm:$0xf0]  ;;  %v4733_v61 = vor.u32 %v6455_v51, %v4730_v29  ;;  %v5101_v17 = vor.u32 %v6547_v25, %v5098_v10  ;;  %v6579_v21 = vld [vmem:[#allocation5 + $0x28] sm:$0xff] }
  0xdc   :  { %1785 = vmatpush.bf16.msra.mxu0 %v4797_v63  ;;  %v7176_v53 = vpop.f32.mrf.mxu2  ;;  %v1535_v62 = vpop.f32.mrf.mxu0  ;;  %v6583_v2 = vld [vmem:[#allocation5 + $0x48] sm:$0xff] }
  0xdd   :  { %1798 = vmatpush.bf16.msra.mxu1 %v4925_v0  ;;  %v7178_v60 = vpop.f32.mrf.mxu3  ;;  %v1548_v63 = vpop.f32.mrf.mxu1  ;;  %v4861_v0 = vor.u32 %v6487_v52, %v4858_v55  ;;  %v6586_v52 = vld [vmem:[#allocation5 + $0x60] sm:$0xff] }
  0xde   :  { %1811 = vmatpush.bf16.msra.mxu2 %v5053_v1  ;;  %v4989_v1 = vor.u32 %v6519_v56, %v4986_v57 }
  0xdf   :  { %1824 = vmatpush.bf16.msra.mxu3 %v5181_v6  ;;  %v5117_v6 = vor.u32 %v6551_v58, %v5114_v59  ;;  %v6576_v58 = vld [vmem:[#allocation5 + $0x10] sm:$0xff] }
  0xe0   :  { %1786 = vmatpush.bf16.msra.mxu0 %v4781_v34  ;;  %v4973_v34 = vor.u32 %v6515_v8, %v4970_v9 }
  0xe1   :  { %1799 = vmatpush.bf16.msra.mxu1 %v4909_v15  ;;  %v6479_v15 = vld [vmem:[#allocation2 + $0x40c] sm:$0xf] }
  0xe2   :  { %1812 = vmatpush.bf16.msra.mxu2 %v5037_v16 }
  0xe3   :  { %1825 = vmatpush.bf16.msra.mxu3 %v5165_v20  ;;  %v4954_v20 = vld [vmem:[#allocation2 + $0x518] sm:$0xf0] }
  0xe4   :  { %1787 = vmatpush.bf16.msra.mxu0 %v4765_v35  ;;  %v1561_v16 = vpop.f32.mrf.mxu2  ;;  %v4829_v35 = vor.u32 %v6479_v15, %v4826_v18  ;;  %v6595_v15 = vld [vmem:[#allocation5 + $0xa8] sm:$0xff]  ;;  %v6594_v18 = vld [vmem:[#allocation5 + $0xa0] sm:$0xff] }
  0xe5   :  { %1800 = vmatpush.bf16.msra.mxu1 %v4893_v38  ;;  %v1574_v26 = vpop.f32.mrf.mxu3  ;;  %v4957_v38 = vor.u32 %v6511_v19, %v4954_v20 }
  0xe6   :  { %1813 = vmatpush.bf16.msra.mxu2 %v5021_v39  ;;  %v5085_v39 = vor.u32 %v6543_v23, %v5082_v24  ;;  %v6593_v23 = vld [vmem:[#allocation5 + $0x98] sm:$0xff]  ;;  %v6592_v26 = vld [vmem:[#allocation5 + $0x90] sm:$0xff] }
  0xe7   :  { %1826 = vmatpush.bf16.msra.mxu3 %v5149_v43  ;;  %v6580_v43 = vld [vmem:[#allocation5 + $0x30] sm:$0xff] }
  0xe8   :  { %1788 = vmatpush.bf16.msra.mxu0 %v4749_v48  ;;  %v1508_v48 = vadd.f32 %v7165_v49, %v1495_v44  ;;  %v329_v49 = vperm.slane %v7183_v11, 1  ;;  %v6605_v44 = vld [vmem:[#allocation5 + $0xf8] sm:$0xff] }
  0xe9   :  { %1801 = vmatpush.bf16.msra.mxu1 %v4877_v50  ;;  %v6587_v50 = vld [vmem:[#allocation5 + $0x68] sm:$0xff] }
  0xea   :  { %1814 = vmatpush.bf16.msra.mxu2 %v5005_v27  ;;  %v6578_v27 = vld [vmem:[#allocation5 + $0x20] sm:$0xff]  ;;  %v1521_v33 = vadd.f32 %v7167_v31, %v1508_v48  ;;  %v6584_v31 = vld [vmem:[#allocation5 + $0x50] sm:$0xff]  ;;  %v1573_v63 = vadd.f32 %v7178_v60, %v329_v49 }
  0xeb   :  { %1827 = vmatpush.bf16.msra.mxu3 %v5133_v54  ;;  %v6577_v54 = vld [vmem:[#allocation5 + $0x18] sm:$0xff] }
  0xec   :  { %1789 = vmatpush.bf16.msra.mxu0 %v4733_v61  ;;  %v1534_v55 = vadd.f32 %v7172_v36, %v1521_v33  ;;  %v6602_v33 = vld [vmem:[#allocation5 + $0xe0] sm:$0xff] }
  0xed   :  { %1802 = vmatpush.bf16.msra.mxu1 %v4861_v0  ;;  %v6575_v0 = vld [vmem:[#allocation5 + $0x8] sm:$0xff] }
  0xee   :  { %1815 = vmatpush.bf16.msra.mxu2 %v4989_v1  ;;  %v1547_v61 = vadd.f32 %v7174_v37, %v1534_v55  ;;  %v6597_v1 = vld [vmem:[#allocation5 + $0xb8] sm:$0xff]  ;;  %v6582_v37 = vld [vmem:[#allocation5 + $0x40] sm:$0xff] }
  0xef   :  { %1828 = vmatpush.bf16.msra.mxu3 %v5117_v6 }
  0xf0   :  { %1790 = vmatpush.bf16.msra.mxu0 %v4717_v28  ;;  %v1560_v36 = vadd.f32 %v7176_v53, %v1547_v61  ;;  %v6596_v53 = vld [vmem:[#allocation5 + $0xb0] sm:$0xff]  ;;  %v6599_v61 = vld [vmem:[#allocation5 + $0xc8] sm:$0xff] }
  0xf1   :  { %1803 = vmatpush.bf16.msra.mxu1 %v4845_v12 }
  0xf2   :  { %1816 = vmatpush.bf16.msra.mxu2 %v4973_v34  ;;  %v1836_v8 = vmax.f32 %v1560_v36, 0.0 }
  0xf3   :  { %1829 = vmatpush.bf16.msra.mxu3 %v5101_v17 }
  0xf4   :  { %1791 = vmatpush.bf16.msra.mxu0 %v4701_v32  ;;  %v1585_v51 = vpop.f32.mrf.mxu0  ;;  %v1840_v25 = vpack.c.bf16 %v1836_v8, %v1836_v8 }
  0xf5   :  { %1804 = vmatpush.bf16.msra.mxu1 %v4829_v35  ;;  %v1598_v29 = vpop.f32.mrf.mxu1  ;;  %v1586_v6 = vadd.f32 %v1585_v51, %v1573_v63  ;;  %v6591_v35 = vld [vmem:[#allocation5 + $0x88] sm:$0xff] }
  0xf6   :  { %1817 = vmatpush.bf16.msra.mxu2 %v4957_v38 }
  0xf7   :  { %1830 = vmatpush.bf16.msra.mxu3 %v5085_v39  ;;  %1792 = vmatmul.bf16.vlgmr.msra.gmra.mxu0 %v6908_v45  ;;  %v1599_v9 = vadd.f32 %v1598_v29, %v1586_v6 }
  0xf8   :  { %2104 = vmatpush.bf16.msrb.mxu0 %v6581_v40  ;;  %1805 = vmatmul.bf16.vlgmr.msra.gmra.mxu1 %v6909_v46  ;;  %v6590_v40 = vld [vmem:[#allocation5 + $0x80] sm:$0xff] }
  0xf9   :  { %2117 = vmatpush.bf16.msrb.mxu1 %v6589_v42  ;;  %1818 = vmatmul.bf16.vlgmr.msra.gmra.mxu2 %v6910_v47  ;;  %v6604_v47 = vld [vmem:[#allocation5 + $0xf0] sm:$0xff] }
  0xfa   :  { %1831 = vmatmul.bf16.vlgmr.msra.gmra.mxu3 %v7169_v5  ;;  %v6585_v5 = vld [vmem:[#allocation5 + $0x58] sm:$0xff]  ;;  %2130 = vmatpush.bf16.msrb.mxu2 %v6597_v1 }
  0xfb   :  { %2143 = vmatpush.bf16.msrb.mxu3 %v6605_v44 }
  0xfc   :  { %2105 = vmatpush.bf16.msrb.mxu0 %v6580_v43  ;;  %v1611_v56 = vpop.f32.mrf.mxu2  ;;  %v1587_v59 = vpop.f32.mrf.mxu0 }
  0xfd   :  { %2118 = vmatpush.bf16.msrb.mxu1 %v6588_v30  ;;  %v1624_v57 = vpop.f32.mrf.mxu3  ;;  %v1600_v62 = vpop.f32.mrf.mxu1  ;;  %v1612_v60 = vadd.f32 %v1611_v56, %v1599_v9 }
  0xfe   :  { %2131 = vmatpush.bf16.msrb.mxu2 %v6596_v53 }
  0xff   :  { %v1625_v10 = vadd.f32 %v1624_v57, %v1612_v60  ;;  %2144 = vmatpush.bf16.msrb.mxu3 %v6604_v47 }
 0x100   :  { %2106 = vmatpush.bf16.msrb.mxu0 %v6579_v21 }
 0x101   :  { %2119 = vmatpush.bf16.msrb.mxu1 %v6587_v50  ;;  %v6603_v50 = vld [vmem:[#allocation5 + $0xe8] sm:$0xff] }
 0x102   :  { %2132 = vmatpush.bf16.msrb.mxu2 %v6595_v15 }
 0x103   :  { %2145 = vmatpush.bf16.msrb.mxu3 %v6603_v50  ;;  %v5426_v50 = vld [vmem:[#allocation7 + $0xd0] sm:$0xf0] }
 0x104   :  { %2107 = vmatpush.bf16.msrb.mxu0 %v6578_v27  ;;  %v1613_v3 = vpop.f32.mrf.mxu2 }
 0x105   :  { %2120 = vmatpush.bf16.msrb.mxu1 %v6586_v52  ;;  %v1626_v4 = vpop.f32.mrf.mxu3  ;;  %v331_v3 = vperm.slane %v7183_v11, 3 }
 0x106   :  { %2133 = vmatpush.bf16.msrb.mxu2 %v6594_v18  ;;  %v6873_v18 = vld [vmem:[%s7279_s4] ss:$0 sm:$0xff] }
 0x107   :  { %2146 = vmatpush.bf16.msrb.mxu3 %v6602_v33  ;;  %v5432_v33 = vld [vmem:[#allocation7 + $0xc8] sm:$0xf] }
 0x108   :  { %2108 = vmatpush.bf16.msrb.mxu0 %v6577_v54  ;;  %v6601_v54 = vld [vmem:[#allocation5 + $0xd8] sm:$0xff] }
 0x109   :  { %2121 = vmatpush.bf16.msrb.mxu1 %v6585_v5  ;;  %v6600_v5 = vld [vmem:[#allocation5 + $0xd0] sm:$0xff] }
 0x10a   :  { %2134 = vmatpush.bf16.msrb.mxu2 %v6593_v23 }
 0x10b   :  { %2147 = vmatpush.bf16.msrb.mxu3 %v6601_v54 }
 0x10c   :  { %2109 = vmatpush.bf16.msrb.mxu0 %v6576_v58 }
 0x10d   :  { %2122 = vmatpush.bf16.msrb.mxu1 %v6584_v31 }
 0x10e   :  { %2135 = vmatpush.bf16.msrb.mxu2 %v6592_v26 }
 0x10f   :  { %2148 = vmatpush.bf16.msrb.mxu3 %v6600_v5  ;;  %v6628_v5 = vld [vmem:[#allocation7 + $0xac] sm:$0xf0] }
 0x110   :  { %2110 = vmatpush.bf16.msrb.mxu0 %v6575_v0  ;;  %v6598_v0 = vld [vmem:[#allocation5 + $0xc0] sm:$0xff] }
 0x111   :  { %2123 = vmatpush.bf16.msrb.mxu1 %v6583_v2 }
 0x112   :  { %2136 = vmatpush.bf16.msrb.mxu2 %v6591_v35  ;;  %v6636_v35 = vld [vmem:[#allocation7 + $0xec] sm:$0xf0] }
 0x113   :  { %2149 = vmatpush.bf16.msrb.mxu3 %v6599_v61 }
 0x114   :  { %2111 = vmatpush.bf16.msrb.mxu0 %v6574_v7  ;;  %v1637_v28 = vpop.f32.mrf.mxu0 }
 0x115   :  { %2124 = vmatpush.bf16.msrb.mxu1 %v6582_v37  ;;  %v1638_v12 = vadd.f32 %v1637_v28, %v1625_v10  ;;  %v1650_v34 = vpop.f32.mrf.mxu1 }
 0x116   :  { %2137 = vmatpush.bf16.msrb.mxu2 %v6590_v40  ;;  %v5442_v40 = vld [vmem:[#allocation7 + $0xf0] sm:$0xf0] }
 0x117   :  { %2112 = vmatmul.bf16.vlgmr.msrb.gmra.mxu0 %v1840_v25  ;;  %v1651_v13 = vadd.f32 %v1650_v34, %v1638_v12  ;;  %2150 = vmatpush.bf16.msrb.mxu3 %v6598_v0 }
 0x119   :  { %v1837_v14 = vmax.f32 %v1651_v13, 0.0 }
 0x11b   :  { %v1841_v16 = vpack.c.bf16 %v1837_v14, %v1837_v14 }
 0x11c   :  { %v1663_v17 = vpop.f32.mrf.mxu2  ;;  %v1639_v20 = vpop.f32.mrf.mxu0 }
 0x11d   :  { %v1676_v19 = vpop.f32.mrf.mxu3  ;;  %2125 = vmatmul.bf16.vlgmr.msrb.gmra.mxu1 %v1841_v16  ;;  %v1652_v22 = vpop.f32.mrf.mxu1  ;;  %v1664_v45 = vadd.f32 %v1663_v17, %v330_v41  ;;  %v5448_v41 = vld [vmem:[#allocation7 + $0xe8] sm:$0xf] }
 0x11f   :  { %v1677_v21 = vadd.f32 %v1676_v19, %v1664_v45  ;;  %v6635_v45 = vld [vmem:[#allocation7 + $0xec] sm:$0xf] }
 0x124   :  { %v1665_v24 = vpop.f32.mrf.mxu2 }
 0x125   :  { %v1678_v32 = vpop.f32.mrf.mxu3 }
 0x126   :  { %v5440_v32 = vld [vmem:[#allocation7 + $0xe0] sm:$0xf] }
 0x134   :  { %v1689_v38 = vpop.f32.mrf.mxu0 }
 0x135   :  { %v1702_v39 = vpop.f32.mrf.mxu1  ;;  %v1690_v51 = vadd.f32 %v1689_v38, %v1677_v21  ;;  %v6634_v38 = vld [vmem:[#allocation7 + $0xe4] sm:$0xf]  ;;  %v6632_v21 = vld [vmem:[#allocation7 + $0xcc] sm:$0xf0] }
 0x137   :  { %v1703_v29 = vadd.f32 %v1702_v39, %v1690_v51  ;;  %v5441_v39 = vor.u32 %v6636_v35, %v5440_v32  ;;  %v5360_v32 = vld [vmem:[#allocation7 + $0x40] sm:$0xf]  ;;  %v6616_v35 = vld [vmem:[#allocation7 + $0x4c] sm:$0xf0] }
 0x139   :  { %2372 = vmatpush.bf16.msra.mxu0 %v5441_v39  ;;  %v6614_v39 = vld [vmem:[#allocation7 + $0x44] sm:$0xf] }
 0x13c   :  { %v1715_v42 = vpop.f32.mrf.mxu2  ;;  %v1691_v30 = vpop.f32.mrf.mxu0 }
 0x13d   :  { %v1728_v43 = vpop.f32.mrf.mxu3  ;;  %v1704_v46 = vpop.f32.mrf.mxu1  ;;  %v1716_v52 = vadd.f32 %v1715_v42, %v1703_v29  ;;  %v6637_v42 = vld [vmem:[#allocation7 + $0xf4] sm:$0xf0]  ;;  %v5450_v30 = vld [vmem:[#allocation7 + $0xf8] sm:$0xf0] }
 0x13e   :  { %v5449_v44 = vor.u32 %v6637_v42, %v5448_v41  ;;  %v5424_v46 = vld [vmem:[#allocation7 + $0xc0] sm:$0xf]  ;;  %v5453_v47 = vor.u32 %v6635_v45, %v5450_v30  ;;  %v6633_v29 = vld [vmem:[#allocation7 + $0xd4] sm:$0xf0]  ;;  %v5368_v41 = vld [vmem:[#allocation7 + $0x48] sm:$0xf] }
 0x13f   :  { %v1729_v55 = vadd.f32 %v1728_v43, %v1716_v52  ;;  %v5445_v43 = vor.u32 %v6634_v38, %v5442_v40  ;;  %v6631_v52 = vld [vmem:[#allocation7 + $0xcc] sm:$0xf]  ;;  %v5433_v54 = vor.u32 %v6633_v29, %v5432_v33  ;;  %v5361_v38 = vor.u32 %v6616_v35, %v5360_v32  ;;  %v5362_v40 = vld [vmem:[#allocation7 + $0x50] sm:$0xf0]  ;;  %v5370_v45 = vld [vmem:[#allocation7 + $0x58] sm:$0xf0] }
 0x140   :  { %2398 = vmatpush.bf16.msra.mxu2 %v5449_v44  ;;  %2411 = vmatpush.bf16.msra.mxu3 %v5453_v47  ;;  %v5365_v42 = vor.u32 %v6614_v39, %v5362_v40  ;;  %v6615_v44 = vld [vmem:[#allocation7 + $0x4c] sm:$0xf]  ;;  %v5344_v47 = vld [vmem:[#allocation7 + $0x20] sm:$0xf]  ;;  %v6613_v33 = vld [vmem:[#allocation7 + $0x34] sm:$0xf0] }
 0x141   :  { %2385 = vmatpush.bf16.msra.mxu1 %v5445_v43  ;;  %v6617_v43 = vld [vmem:[#allocation7 + $0x54] sm:$0xf0]  ;;  %v6296_v32 = vld [vmem:[#allocation8 + $0x690] sm:$0xf]  ;;  %v6851_v35 = vld [vmem:[#allocation8 + $0x6a8] sm:$0xf0] }
 0x142   :  { %v5369_v30 = vor.u32 %v6617_v43, %v5368_v41  ;;  %v6297_v39 = vor.u32 %v6851_v35, %v6296_v32  ;;  %v5568_v40 = vld [vmem:[#allocation8 + $0xe0] sm:$0xf]  ;;  %v6669_v41 = vld [vmem:[#allocation8 + $0xf8] sm:$0xf0]  ;;  %v6044_v43 = vld [vmem:[#allocation8 + $0x498] sm:$0xf] }
 0x143   :  { %v5456_v32 = vld [vmem:[#allocation8] sm:$0xf] }
 0x144   :  { %v1717_v48 = vpop.f32.mrf.mxu2  ;;  %2399 = vmatpush.bf16.msra.mxu2 %v5433_v54  ;;  %v6611_v54 = vld [vmem:[#allocation7 + $0x2c] sm:$0xf] }
 0x145   :  { %v1730_v27 = vpop.f32.mrf.mxu3  ;;  %v6630_v48 = vld [vmem:[#allocation7 + $0xc4] sm:$0xf] }
 0x146   :  { %v5425_v27 = vor.u32 %v6632_v21, %v5424_v46  ;;  %v5429_v51 = vor.u32 %v6630_v48, %v5426_v50  ;;  %v5373_v46 = vor.u32 %v6615_v44, %v5370_v45  ;;  %v6612_v21 = vld [vmem:[#allocation7 + $0x2c] sm:$0xf0]  ;;  %v6610_v48 = vld [vmem:[#allocation7 + $0x24] sm:$0xf]  ;;  %v6788_v44 = vld [vmem:[#allocation8 + $0x4b0] sm:$0xf0] }
 0x147   :  { %v5345_v50 = vor.u32 %v6612_v21, %v5344_v47  ;;  %v6268_v45 = vld [vmem:[#allocation8 + $0x658] sm:$0xf]  ;;  %v6844_v47 = vld [vmem:[#allocation8 + $0x670] sm:$0xf0]  ;;  %v6045_v21 = vor.u32 %v6788_v44, %v6044_v43  ;;  %v6743_v43 = vld [vmem:[#allocation8 + $0x34c] sm:$0xf] }
 0x148   :  { %2373 = vmatpush.bf16.msra.mxu0 %v5425_v27  ;;  %2386 = vmatpush.bf16.msra.mxu1 %v5429_v51  ;;  %v5346_v27 = vld [vmem:[#allocation7 + $0x30] sm:$0xf0]  ;;  %v5352_v51 = vld [vmem:[#allocation7 + $0x28] sm:$0xf] }
 0x149   :  { %v5349_v29 = vor.u32 %v6610_v48, %v5346_v27  ;;  %v6269_v48 = vor.u32 %v6844_v47, %v6268_v45  ;;  %v5569_v27 = vor.u32 %v6669_v41, %v5568_v40  ;;  %v6697_v40 = vld [vmem:[#allocation8 + $0x1d8] sm:$0xf0]  ;;  %v6687_v41 = vld [vmem:[#allocation8 + $0x18c] sm:$0xf]  ;;  %v5904_v47 = vld [vmem:[#allocation8 + $0x380] sm:$0xf] }
 0x154   :  { %v1741_v56 = vpop.f32.mrf.mxu0 }
 0x155   :  { %v1742_v57 = vadd.f32 %v1741_v56, %v1729_v55  ;;  %v1754_v49 = vpop.f32.mrf.mxu1  ;;  %v5434_v55 = vld [vmem:[#allocation7 + $0xd8] sm:$0xf0]  ;;  %v5408_v56 = vld [vmem:[#allocation7 + $0xa0] sm:$0xf] }
 0x156   :  { %v1755_v4 = vadd.f32 %v1754_v49, %v331_v3  ;;  %v6626_v49 = vld [vmem:[#allocation7 + $0xa4] sm:$0xf]  ;;  %v5409_v61 = vor.u32 %v6628_v5, %v5408_v56  ;;  %v5328_v5 = vld [vmem:[#allocation7] sm:$0xf] }
 0x157   :  { %v1838_v58 = vmax.f32 %v1742_v57, 0.0  ;;  %v5437_v57 = vor.u32 %v6631_v52, %v5434_v55  ;;  %v5353_v52 = vor.u32 %v6613_v33, %v5352_v51  ;;  %v5354_v55 = vld [vmem:[#allocation7 + $0x38] sm:$0xf0]  ;;  %v6240_v33 = vld [vmem:[#allocation8 + $0x620] sm:$0xf] }
 0x158   :  { %2374 = vmatpush.bf16.msra.mxu0 %v5409_v61  ;;  %v5357_v56 = vor.u32 %v6611_v54, %v5354_v55  ;;  %v5336_v61 = vld [vmem:[#allocation7 + $0x8] sm:$0xf]  ;;  %v6781_v51 = vld [vmem:[#allocation8 + $0x478] sm:$0xf0] }
 0x159   :  { %v1842_v59 = vpack.c.bf16 %v1838_v58, %v1838_v58  ;;  %v5410_v58 = vld [vmem:[#allocation7 + $0xb0] sm:$0xf0]  ;;  %2412 = vmatpush.bf16.msra.mxu3 %v5437_v57  ;;  %v6608_v57 = vld [vmem:[#allocation7 + $0xc] sm:$0xf0]  ;;  %v5540_v55 = vld [vmem:[#allocation8 + $0xa8] sm:$0xf] }
 0x15a   :  { %v5413_v0 = vor.u32 %v6626_v49, %v5410_v58  ;;  %v6606_v49 = vld [vmem:[#allocation7 + $0x4] sm:$0xf]  ;;  %v5329_v58 = vor.u32 %v6608_v57, %v5328_v5  ;;  %v5764_v57 = vld [vmem:[#allocation8 + $0x268] sm:$0xf] }
 0x15b   :  { %2138 = vmatmul.bf16.vlgmr.msrb.gmra.mxu2 %v1842_v59  ;;  %v5416_v59 = vld [vmem:[#allocation7 + $0xa8] sm:$0xf] }
 0x15c   :  { %v1767_v62 = vpop.f32.mrf.mxu2  ;;  %v1743_v63 = vpop.f32.mrf.mxu0  ;;  %2387 = vmatpush.bf16.msra.mxu1 %v5413_v0  ;;  %v6607_v0 = vld [vmem:[#allocation7 + $0xc] sm:$0xf] }
 0x15d   :  { %v1780_v31 = vpop.f32.mrf.mxu3  ;;  %v1756_v1 = vpop.f32.mrf.mxu1  ;;  %v1768_v6 = vadd.f32 %v1767_v62, %v1755_v4  ;;  %v6629_v62 = vld [vmem:[#allocation7 + $0xb4] sm:$0xf0]  ;;  %v5418_v63 = vld [vmem:[#allocation7 + $0xb8] sm:$0xf0] }
 0x15e   :  { %v5417_v1 = vor.u32 %v6629_v62, %v5416_v59  ;;  %v5330_v59 = vld [vmem:[#allocation7 + $0x10] sm:$0xf0]  ;;  %v6609_v62 = vld [vmem:[#allocation7 + $0x14] sm:$0xf0] }
 0x15f   :  { %v1781_v7 = vadd.f32 %v1780_v31, %v1768_v6  ;;  %v6627_v31 = vld [vmem:[#allocation7 + $0xac] sm:$0xf] }
 0x160   :  { %2400 = vmatpush.bf16.msra.mxu2 %v5417_v1  ;;  %v5338_v1 = vld [vmem:[#allocation7 + $0x18] sm:$0xf0] }
 0x164   :  { %v1769_v36 = vpop.f32.mrf.mxu2 }
 0x165   :  { %v1782_v2 = vpop.f32.mrf.mxu3  ;;  %v5421_v36 = vor.u32 %v6627_v31, %v5418_v63  ;;  %v5333_v31 = vor.u32 %v6606_v49, %v5330_v59  ;;  %v5337_v63 = vor.u32 %v6609_v62, %v5336_v61  ;;  %v6718_v49 = vld [vmem:[#allocation8 + $0x280] sm:$0xf0]  ;;  %v5988_v62 = vld [vmem:[#allocation8 + $0x428] sm:$0xf] }
 0x167   :  { %2413 = vmatpush.bf16.msra.mxu3 %v5421_v36  ;;  %v5341_v36 = vor.u32 %v6607_v0, %v5338_v1  ;;  %v6212_v0 = vld [vmem:[#allocation8 + $0x5e8] sm:$0xf]  ;;  %v6830_v1 = vld [vmem:[#allocation8 + $0x600] sm:$0xf0] }
 0x174   :  { %v1793_v8 = vpop.f32.mrf.mxu0 }
 0x175   :  { %v1806_v37 = vpop.f32.mrf.mxu1  ;;  %v1794_v9 = vadd.f32 %v1793_v8, %v1781_v7  ;;  %v5392_v7 = vld [vmem:[#allocation7 + $0x80] sm:$0xf]  ;;  %v6624_v8 = vld [vmem:[#allocation7 + $0x8c] sm:$0xf0] }
 0x177   :  { %v1807_v25 = vadd.f32 %v1806_v37, %v1794_v9  ;;  %v6622_v37 = vld [vmem:[#allocation7 + $0x84] sm:$0xf]  ;;  %v5393_v9 = vor.u32 %v6624_v8, %v5392_v7 }
 0x178   :  { %v6746_v8 = vld [vmem:[#allocation8 + $0x360] sm:$0xf0] }
 0x179   :  { %2375 = vmatpush.bf16.msra.mxu0 %v5393_v9  ;;  %v6683_v9 = vld [vmem:[#allocation8 + $0x168] sm:$0xf0] }
 0x17c   :  { %v1819_v60 = vpop.f32.mrf.mxu2  ;;  %v1795_v53 = vpop.f32.mrf.mxu0 }
 0x17d   :  { %v1820_v10 = vadd.f32 %v1819_v60, %v1807_v25  ;;  %v1832_v28 = vpop.f32.mrf.mxu3  ;;  %v1808_v12 = vpop.f32.mrf.mxu1  ;;  %v5394_v25 = vld [vmem:[#allocation7 + $0x90] sm:$0xf0]  ;;  %v5400_v60 = vld [vmem:[#allocation7 + $0x88] sm:$0xf]  ;;  %v6623_v53 = vld [vmem:[#allocation7 + $0x8c] sm:$0xf] }
 0x17e   :  { %v5402_v12 = vld [vmem:[#allocation7 + $0x98] sm:$0xf0] }
 0x17f   :  { %v1833_v34 = vadd.f32 %v1832_v28, %v1820_v10  ;;  %v5397_v10 = vor.u32 %v6622_v37, %v5394_v25  ;;  %v6625_v28 = vld [vmem:[#allocation7 + $0x94] sm:$0xf0]  ;;  %v5624_v37 = vld [vmem:[#allocation8 + $0x150] sm:$0xf]  ;;  %v2159_v25 = vlaneseq }
 0x181   :  { %v1839_v13 = vmax.f32 %v1833_v34, 0.0  ;;  %v5401_v34 = vor.u32 %v6625_v28, %v5400_v60  ;;  %2388 = vmatpush.bf16.msra.mxu1 %v5397_v10  ;;  %v5848_v10 = vld [vmem:[#allocation8 + $0x310] sm:$0xf]  ;;  %v6739_v28 = vld [vmem:[#allocation8 + $0x328] sm:$0xf0] }
 0x183   :  { %v1843_v14 = vpack.c.bf16 %v1839_v13, %v1839_v13  ;;  %v5405_v13 = vor.u32 %v6623_v53, %v5402_v12  ;;  %2401 = vmatpush.bf16.msra.mxu2 %v5401_v34  ;;  %v6100_v53 = vld [vmem:[#allocation8 + $0x508] sm:$0xf]  ;;  %v5625_v12 = vor.u32 %v6683_v9, %v5624_v37  ;;  %v6802_v34 = vld [vmem:[#allocation8 + $0x520] sm:$0xf0]  ;;  %v6213_v9 = vor.u32 %v6830_v1, %v6212_v0  ;;  %v6074_v0 = vld [vmem:[#allocation8 + $0x4ec] sm:$0xf0] }
 0x184   :  { %v1821_v15 = vpop.f32.mrf.mxu2  ;;  %v6848_v1 = vld [vmem:[#allocation8 + $0x694] sm:$0xf] }
 0x185   :  { %v1834_v16 = vpop.f32.mrf.mxu3  ;;  %2151 = vmatmul.bf16.vlgmr.msrb.gmra.mxu3 %v1843_v14  ;;  %v5376_v14 = vld [vmem:[#allocation7 + $0x60] sm:$0xf]  ;;  %v6620_v15 = vld [vmem:[#allocation7 + $0x6c] sm:$0xf0] }
 0x186   :  { %v6618_v16 = vld [vmem:[#allocation7 + $0x64] sm:$0xf]  ;;  %2414 = vmatpush.bf16.msra.mxu3 %v5405_v13  ;;  %v6324_v13 = vld [vmem:[#allocation8 + $0x6c8] sm:$0xf] }
 0x194   :  { %v2113_v17 = vpop.f32.mrf.mxu0 }
 0x195   :  { %v2114_v19 = vadd.f32 %v6873_v18, %v2113_v17  ;;  %v5377_v17 = vor.u32 %v6620_v15, %v5376_v14  ;;  %v5384_v18 = vld [vmem:[#allocation7 + $0x68] sm:$0xf]  ;;  %v6858_v14 = vld [vmem:[#allocation8 + $0x6e0] sm:$0xf0]  ;;  %v5849_v15 = vor.u32 %v6739_v28, %v5848_v10  ;;  %v6767_v10 = vld [vmem:[#allocation8 + $0x408] sm:$0xf0] }
 0x196   :  { %v6184_v28 = vld [vmem:[#allocation8 + $0x5b0] sm:$0xf] }
 0x197   :  { %2376 = vmatpush.bf16.msra.mxu0 %v5377_v17  ;;  %v6325_v17 = vor.u32 %v6858_v14, %v6324_v13  ;;  %v6648_v13 = vld [vmem:[#allocation8 + $0x50] sm:$0xf0]  ;;  %v5708_v14 = vld [vmem:[#allocation8 + $0x1f8] sm:$0xf] }
 0x19a   :  { %v2126_v20 = vpop.f32.mrf.mxu1 }
 0x19b   :  { %v2127_v22 = vadd.f32 %v2126_v20, %v2114_v19  ;;  %v6621_v19 = vld [vmem:[#allocation7 + $0x74] sm:$0xf0]  ;;  %2377 = vmatpush.bf16.msra.mxu0 %v5361_v38 }
 0x19c   :  { %v2115_v11 = vpop.f32.mrf.mxu0 }
 0x19d   :  { %v5378_v11 = vld [vmem:[#allocation7 + $0x70] sm:$0xf0] }
 0x19e   :  { %v5381_v20 = vor.u32 %v6618_v16, %v5378_v11  ;;  %v6101_v16 = vor.u32 %v6802_v34, %v6100_v53  ;;  %v5596_v11 = vld [vmem:[#allocation8 + $0x118] sm:$0xf]  ;;  %v6823_v53 = vld [vmem:[#allocation8 + $0x5c8] sm:$0xf0] }
 0x19f   :  { %2378 = vmatpush.bf16.msra.mxu0 %v5345_v50  ;;  %v6016_v50 = vld [vmem:[#allocation8 + $0x460] sm:$0xf]  ;;  %v5484_v34 = vld [vmem:[#allocation8 + $0x38] sm:$0xf] }
 0x1a0   :  { %2389 = vmatpush.bf16.msra.mxu1 %v5381_v20  ;;  %v6732_v20 = vld [vmem:[#allocation8 + $0x2f0] sm:$0xf0]  ;;  %v6017_v59 = vor.u32 %v6781_v51, %v6016_v50  ;;  %v6809_v50 = vld [vmem:[#allocation8 + $0x558] sm:$0xf0] }
 0x1a2   :  { %v2128_v23 = vpop.f32.mrf.mxu1 }
 0x1a3   :  { %v6619_v23 = vld [vmem:[#allocation7 + $0x6c] sm:$0xf]  ;;  %2379 = vmatpush.bf16.msra.mxu0 %v5329_v58 }
 0x1a4   :  { %2390 = vmatpush.bf16.msra.mxu1 %v5365_v42 }
 0x1a8   :  { %2391 = vmatpush.bf16.msra.mxu1 %v5349_v29  ;;  %v6837_v29 = vld [vmem:[#allocation8 + $0x638] sm:$0xf0] }
 0x1a9   :  { %v6241_v61 = vor.u32 %v6837_v29, %v6240_v33 }
 0x1ac   :  { %2392 = vmatpush.bf16.msra.mxu1 %v5333_v31 }
 0x1de   :  { %v2139_v24 = vpop.f32.mrf.mxu2 }
 0x1df   :  { %v2140_v2 = vadd.f32 %v2139_v24, %v2127_v22  ;;  %v5385_v22 = vor.u32 %v6621_v19, %v5384_v18  ;;  %v5386_v24 = vld [vmem:[#allocation7 + $0x78] sm:$0xf0]  ;;  %v6676_v18 = vld [vmem:[#allocation8 + $0x130] sm:$0xf0]  ;;  %v5820_v19 = vld [vmem:[#allocation8 + $0x2d8] sm:$0xf] }
 0x1e0   :  { %v5597_v38 = vor.u32 %v6676_v18, %v5596_v11  ;;  %v5821_v42 = vor.u32 %v6732_v20, %v5820_v19  ;;  %v6185_v11 = vor.u32 %v6823_v53, %v6184_v28  ;;  %v5932_v18 = vld [vmem:[#allocation8 + $0x3b8] sm:$0xf]  ;;  %v5485_v19 = vor.u32 %v6648_v13, %v5484_v34  ;;  %v6760_v20 = vld [vmem:[#allocation8 + $0x3d0] sm:$0xf0]  ;;  %v6841_v28 = vld [vmem:[#allocation8 + $0x65c] sm:$0xf] }
 0x1e1   :  { %2402 = vmatpush.bf16.msra.mxu2 %v5385_v22  ;;  %v6072_v22 = vld [vmem:[#allocation8 + $0x4d0] sm:$0xf]  ;;  %v5933_v44 = vor.u32 %v6760_v20, %v5932_v18  ;;  %v6270_v53 = vld [vmem:[#allocation8 + $0x674] sm:$0xf0]  ;;  %v6666_v13 = vld [vmem:[#allocation8 + $0xe4] sm:$0xf] }
 0x1e2   :  { %v6778_v18 = vld [vmem:[#allocation8 + $0x464] sm:$0xf] }
 0x1e3   :  { %v6834_v20 = vld [vmem:[#allocation8 + $0x624] sm:$0xf] }
 0x1e5   :  { %2403 = vmatpush.bf16.msra.mxu2 %v5369_v30  ;;  %v5792_v30 = vld [vmem:[#allocation8 + $0x2a0] sm:$0xf] }
 0x1e6   :  { %v2141_v26 = vpop.f32.mrf.mxu2 }
 0x1e7   :  { %v5389_v26 = vor.u32 %v6619_v23, %v5386_v24  ;;  %v6795_v23 = vld [vmem:[#allocation8 + $0x4e8] sm:$0xf0]  ;;  %v2160_v24 = vand.u32 127, %v2159_v25  ;;  %v5960_v25 = vld [vmem:[#allocation8 + $0x3f0] sm:$0xf] }
 0x1e9   :  { %2415 = vmatpush.bf16.msra.mxu3 %v5389_v26  ;;  %2404 = vmatpush.bf16.msra.mxu2 %v5353_v52  ;;  %v6073_v26 = vor.u32 %v6795_v23, %v6072_v22  ;;  %vm2161_vm0 = vcmp.lt.s32.totalorder %v2160_v24, 20  ;;  %v6156_v22 = vld [vmem:[#allocation8 + $0x578] sm:$0xf]  ;;  %v6816_v23 = vld [vmem:[#allocation8 + $0x590] sm:$0xf0] }
 0x1ea   :  { %v6157_v45 = vor.u32 %v6816_v23, %v6156_v22  ;;  %v6242_v22 = vld [vmem:[#allocation8 + $0x63c] sm:$0xf0] }
 0x1ed   :  { %2416 = vmatpush.bf16.msra.mxu3 %v5373_v46  ;;  %2405 = vmatpush.bf16.msra.mxu2 %v5337_v63  ;;  %v6725_v46 = vld [vmem:[#allocation8 + $0x2b8] sm:$0xf0]  ;;  %v6774_v63 = vld [vmem:[#allocation8 + $0x440] sm:$0xf0] }
 0x1ee   :  { %v5793_v54 = vor.u32 %v6725_v46, %v5792_v30  ;;  %v5989_v37 = vor.u32 %v6774_v63, %v5988_v62  ;;  %v5878_v46 = vld [vmem:[#allocation8 + $0x364] sm:$0xf0]  ;;  %v6792_v63 = vld [vmem:[#allocation8 + $0x4d4] sm:$0xf] }
 0x1f1   :  { %2417 = vmatpush.bf16.msra.mxu3 %v5357_v56  ;;  %3882 = vmatpush.bf16.msrb.mxu2 %v6101_v16  ;;  %v6662_v56 = vld [vmem:[#allocation8 + $0xc0] sm:$0xf0]  ;;  %v2166_v16 = vld [vmem:[%s7284_s9] sm:$0x3] }
 0x1f2   :  { %v5541_v31 = vor.u32 %v6662_v56, %v5540_v55  ;;  %v6326_v55 = vld [vmem:[#allocation8 + $0x6e4] sm:$0xf0] }
 0x1f5   :  { %2418 = vmatpush.bf16.msra.mxu3 %v5341_v36  ;;  %3883 = vmatpush.bf16.msrb.mxu2 %v6073_v26 }
 0x1f9   :  { %3895 = vmatpush.bf16.msrb.mxu3 %v6325_v17  ;;  %3884 = vmatpush.bf16.msrb.mxu2 %v6045_v21  ;;  %v5961_v17 = vor.u32 %v6767_v10, %v5960_v25  ;;  %v6753_v21 = vld [vmem:[#allocation8 + $0x398] sm:$0xf0]  ;;  %v6046_v10 = vld [vmem:[#allocation8 + $0x4b4] sm:$0xf0] }
 0x1fd   :  { %3896 = vmatpush.bf16.msrb.mxu3 %v6297_v39  ;;  %3885 = vmatpush.bf16.msrb.mxu2 %v6017_v59  ;;  %v5680_v39 = vld [vmem:[#allocation8 + $0x1c0] sm:$0xf]  ;;  %v5905_v59 = vor.u32 %v6753_v21, %v5904_v47  ;;  %v6771_v21 = vld [vmem:[#allocation8 + $0x42c] sm:$0xf] }
 0x1fe   :  { %v5681_v29 = vor.u32 %v6697_v40, %v5680_v39  ;;  %v6245_v40 = vor.u32 %v6834_v20, %v6242_v22  ;;  %v6747_v20 = vld [vmem:[#allocation8 + $0x368] sm:$0xf0] }
 0x201   :  { %3897 = vmatpush.bf16.msrb.mxu3 %v6269_v48  ;;  %3886 = vmatpush.bf16.msrb.mxu2 %v5989_v37  ;;  %v6128_v48 = vld [vmem:[#allocation8 + $0x540] sm:$0xf]  ;;  %v5822_v37 = vld [vmem:[#allocation8 + $0x2f4] sm:$0xf0] }
 0x205   :  { %3898 = vmatpush.bf16.msrb.mxu3 %v6241_v61  ;;  %3887 = vmatpush.bf16.msrb.mxu2 %v5961_v17  ;;  %v6129_v61 = vor.u32 %v6809_v50, %v6128_v48  ;;  %v5990_v48 = vld [vmem:[#allocation8 + $0x444] sm:$0xf0]  ;;  %v6827_v50 = vld [vmem:[#allocation8 + $0x5ec] sm:$0xf] }
 0x208   :  { %v2152_v3 = vpop.f32.mrf.mxu3 }
 0x209   :  { %v7201_v4 = vadd.f32 %v2152_v3, %v2140_v2  ;;  %v5652_v2 = vld [vmem:[#allocation8 + $0x188] sm:$0xf]  ;;  %v6690_v3 = vld [vmem:[#allocation8 + $0x1a0] sm:$0xf0]  ;;  %3899 = vmatpush.bf16.msrb.mxu3 %v6213_v9  ;;  %3888 = vmatpush.bf16.msrb.mxu2 %v5933_v44  ;;  %v6077_v9 = vor.u32 %v6792_v63, %v6074_v0  ;;  %v5514_v44 = vld [vmem:[#allocation8 + $0x8c] sm:$0xf0] }
 0x20a   :  { %v5653_v7 = vor.u32 %v6690_v3, %v5652_v2  ;;  %v5765_v2 = vor.u32 %v6718_v49, %v5764_v57  ;;  %v5512_v3 = vld [vmem:[#allocation8 + $0x70] sm:$0xf]  ;;  %v6680_v57 = vld [vmem:[#allocation8 + $0x154] sm:$0xf]  ;;  %v6694_v63 = vld [vmem:[#allocation8 + $0x1c4] sm:$0xf] }
 0x20b   :  { %2156 = vst [vmem:[%s7286_s11] sm:$0x3] %v7201_v4  ;;  %2157 = vrot.lane.b32.xlu0 %v7201_v4, %s7040_s25  ;;  %v6736_v49 = vld [vmem:[#allocation8 + $0x314] sm:$0xf] }
 0x20c   :  { %3856 = vmatpush.bf16.msrb.mxu0 %v5653_v7  ;;  %v5736_v7 = vld [vmem:[#allocation8 + $0x230] sm:$0xf] }
 0x20d   :  { %3900 = vmatpush.bf16.msrb.mxu3 %v6185_v11  ;;  %3889 = vmatpush.bf16.msrb.mxu2 %v5905_v59  ;;  %v6273_v11 = vor.u32 %v6841_v28, %v6270_v53  ;;  %v6186_v59 = vld [vmem:[#allocation8 + $0x5cc] sm:$0xf0]  ;;  %v6130_v28 = vld [vmem:[#allocation8 + $0x55c] sm:$0xf0] }
 0x210   :  { %v2154_v6 = vpop.f32.mrf.mxu3  ;;  %3857 = vmatpush.bf16.msrb.mxu0 %v5625_v12 }
 0x211   :  { %v5876_v6 = vld [vmem:[#allocation8 + $0x348] sm:$0xf]  ;;  %3901 = vmatpush.bf16.msrb.mxu3 %v6157_v45  ;;  %v6708_v45 = vld [vmem:[#allocation8 + $0x234] sm:$0xf] }
 0x212   :  { %v5877_v60 = vor.u32 %v6746_v8, %v5876_v6  ;;  %v6655_v6 = vld [vmem:[#allocation8 + $0x88] sm:$0xf0] }
 0x213   :  { %v6711_v8 = vld [vmem:[#allocation8 + $0x248] sm:$0xf0] }
 0x214   :  { %3869 = vmatpush.bf16.msrb.mxu1 %v5877_v60  ;;  %3858 = vmatpush.bf16.msrb.mxu0 %v5597_v38  ;;  %v5513_v60 = vor.u32 %v6655_v6, %v5512_v3  ;;  %v5737_v12 = vor.u32 %v6711_v8, %v5736_v7  ;;  %v6641_v38 = vld [vmem:[#allocation8 + $0x18] sm:$0xf0]  ;;  %v5598_v7 = vld [vmem:[#allocation8 + $0x134] sm:$0xf0] }
 0x215   :  { %v5457_v33 = vor.u32 %v6641_v38, %v5456_v32  ;;  %v6673_v6 = vld [vmem:[#allocation8 + $0x11c] sm:$0xf]  ;;  %3902 = vmatpush.bf16.msrb.mxu3 %v6129_v61  ;;  %v5542_v32 = vld [vmem:[#allocation8 + $0xc4] sm:$0xf0] }
 0x216   :  { %v6729_v8 = vld [vmem:[#allocation8 + $0x2dc] sm:$0xf]  ;;  %v5766_v38 = vld [vmem:[#allocation8 + $0x284] sm:$0xf0] }
 0x217   :  { %v5825_v34 = vor.u32 %v6729_v8, %v5822_v37  ;;  %v6158_v8 = vld [vmem:[#allocation8 + $0x594] sm:$0xf0] }
 0x218   :  { %3870 = vmatpush.bf16.msrb.mxu1 %v5849_v15  ;;  %3859 = vmatpush.bf16.msrb.mxu0 %v5569_v27  ;;  %v6704_v15 = vld [vmem:[#allocation8 + $0x210] sm:$0xf0]  ;;  %v6799_v27 = vld [vmem:[#allocation8 + $0x50c] sm:$0xf] }
 0x219   :  { %v5709_v26 = vor.u32 %v6704_v15, %v5708_v14  ;;  %v5570_v14 = vld [vmem:[#allocation8 + $0xfc] sm:$0xf0]  ;;  %v6722_v15 = vld [vmem:[#allocation8 + $0x2a4] sm:$0xf] }
 0x21a   :  { %v5573_v23 = vor.u32 %v6666_v13, %v5570_v14 }
 0x21c   :  { %3871 = vmatpush.bf16.msrb.mxu1 %v5821_v42  ;;  %3860 = vmatpush.bf16.msrb.mxu0 %v5541_v31  ;;  %v5654_v42 = vld [vmem:[#allocation8 + $0x1a4] sm:$0xf0] }
 0x21d   :  { %v5657_v56 = vor.u32 %v6687_v41, %v5654_v42 }
 0x220   :  { %3872 = vmatpush.bf16.msrb.mxu1 %v5793_v54  ;;  %3861 = vmatpush.bf16.msrb.mxu0 %v5513_v60  ;;  %v6855_v54 = vld [vmem:[#allocation8 + $0x6cc] sm:$0xf]  ;;  %v6785_v60 = vld [vmem:[#allocation8 + $0x49c] sm:$0xf] }
 0x221   :  { %v6329_v31 = vor.u32 %v6855_v54, %v6326_v55  ;;  %v6049_v17 = vor.u32 %v6785_v60, %v6046_v10  ;;  %v6701_v55 = vld [vmem:[#allocation8 + $0x1fc] sm:$0xf]  ;;  %v6806_v10 = vld [vmem:[#allocation8 + $0x544] sm:$0xf] }
 0x222   :  { %v6133_v53 = vor.u32 %v6806_v10, %v6130_v28  ;;  %v6789_v28 = vld [vmem:[#allocation8 + $0x4b8] sm:$0xf0] }
 0x224   :  { %3873 = vmatpush.bf16.msrb.mxu1 %v5765_v2  ;;  %3862 = vmatpush.bf16.msrb.mxu0 %v5485_v19  ;;  %v6018_v19 = vld [vmem:[#allocation8 + $0x47c] sm:$0xf0] }
 0x225   :  { %v6021_v39 = vor.u32 %v6778_v18, %v6018_v19  ;;  %v6691_v18 = vld [vmem:[#allocation8 + $0x1a8] sm:$0xf0]  ;;  %v5884_v19 = vld [vmem:[#allocation8 + $0x350] sm:$0xf] }
 0x228   :  { %3874 = vmatpush.bf16.msrb.mxu1 %v5737_v12  ;;  %3863 = vmatpush.bf16.msrb.mxu0 %v5457_v33  ;;  %v5601_v12 = vor.u32 %v6673_v6, %v5598_v7  ;;  %v6813_v7 = vld [vmem:[#allocation8 + $0x57c] sm:$0xf] }
 0x229   :  { %v6161_v37 = vor.u32 %v6813_v7, %v6158_v8 }
 0x22c   :  { %3875 = vmatpush.bf16.msrb.mxu1 %v5709_v26  ;;  %v6659_v26 = vld [vmem:[#allocation8 + $0xac] sm:$0xf] }
 0x22d   :  { %v5545_v41 = vor.u32 %v6659_v26, %v5542_v32 }
 0x230   :  { %3876 = vmatpush.bf16.msrb.mxu1 %v5681_v29  ;;  %v6645_v29 = vld [vmem:[#allocation8 + $0x3c] sm:$0xf] }
 0x27d   :  { %v2158_v52 = vpop.permute.xlu0 %2157 }
 0x27e   :  { %v2162_v5 = vsel %vm2161_vm0, %v2158_v52, 0.0  ;;  %v6102_v52 = vld [vmem:[#allocation8 + $0x524] sm:$0xf0] }
 0x27f   :  { %v2163_v58 = vmul.f32 0.5, %v2162_v5  ;;  %v5881_v5 = vor.u32 %v6743_v43, %v5878_v46  ;;  %v6105_v62 = vor.u32 %v6799_v27, %v6102_v52  ;;  %v6652_v43 = vld [vmem:[#allocation8 + $0x74] sm:$0xf]  ;;  %v5993_v27 = vor.u32 %v6771_v21, %v5990_v48  ;;  %v5486_v52 = vld [vmem:[#allocation8 + $0x54] sm:$0xf0] }
 0x280   :  { %v5517_v46 = vor.u32 %v6652_v43, %v5514_v44  ;;  %v5489_v54 = vor.u32 %v6645_v29, %v5486_v52  ;;  %v6740_v43 = vld [vmem:[#allocation8 + $0x330] sm:$0xf0]  ;;  %v6332_v21 = vld [vmem:[#allocation8 + $0x6d0] sm:$0xf]  ;;  %v6859_v29 = vld [vmem:[#allocation8 + $0x6e8] sm:$0xf0] }
 0x281   :  { %v2164_v36 = vmul.f32 1.442695, %v2163_v58  ;;  %v5850_v58 = vld [vmem:[#allocation8 + $0x32c] sm:$0xf0]  ;;  %v5604_v52 = vld [vmem:[#allocation8 + $0x120] sm:$0xf] }
 0x282   :  { %v5853_v3 = vor.u32 %v6736_v49, %v5850_v58  ;;  %v6820_v49 = vld [vmem:[#allocation8 + $0x5b4] sm:$0xf] }
 0x283   :  { %6874 = vpow2.f32 %v2164_v36  ;;  %v6298_v36 = vld [vmem:[#allocation8 + $0x6ac] sm:$0xf0]  ;;  %v6189_v61 = vor.u32 %v6820_v49, %v6186_v59  ;;  %v6333_v49 = vor.u32 %v6859_v29, %v6332_v21  ;;  %v6080_v59 = vld [vmem:[#allocation8 + $0x4d8] sm:$0xf]  ;;  %v6649_v21 = vld [vmem:[#allocation8 + $0x58] sm:$0xf0] }
 0x284   :  { %v6301_v25 = vor.u32 %v6848_v1, %v6298_v36  ;;  %v5682_v1 = vld [vmem:[#allocation8 + $0x1dc] sm:$0xf0]  ;;  %v6768_v29 = vld [vmem:[#allocation8 + $0x410] sm:$0xf0] }
 0x285   :  { %v5685_v36 = vor.u32 %v6694_v63, %v5682_v1  ;;  %v6852_v1 = vld [vmem:[#allocation8 + $0x6b0] sm:$0xf0] }
 0x289   :  { %v6875_v24 = vpop.eup %6874 }
 0x28a   :  { %v2167_v35 = vmul.f32 %v6875_v24, %v2166_v16  ;;  %v5794_v16 = vld [vmem:[#allocation8 + $0x2bc] sm:$0xf0] }
 0x28b   :  { %v5797_v24 = vor.u32 %v6722_v15, %v5794_v16  ;;  %v5660_v16 = vld [vmem:[#allocation8 + $0x190] sm:$0xf] }
 0x28c   :  { %v2168_v30 = vadd.f32 %v2167_v35, %v7201_v4  ;;  %v5626_v4 = vld [vmem:[#allocation8 + $0x16c] sm:$0xf0]  ;;  %v6715_v35 = vld [vmem:[#allocation8 + $0x26c] sm:$0xf]  ;;  %v5661_v32 = vor.u32 %v6691_v18, %v5660_v16  ;;  %v6782_v18 = vld [vmem:[#allocation8 + $0x480] sm:$0xf0] }
 0x28d   :  { %v5629_v2 = vor.u32 %v6680_v57, %v5626_v4  ;;  %v5769_v42 = vor.u32 %v6715_v35, %v5766_v38  ;;  %v6764_v57 = vld [vmem:[#allocation8 + $0x3f4] sm:$0xf]  ;;  %v5962_v4 = vld [vmem:[#allocation8 + $0x40c] sm:$0xf0]  ;;  %v5885_v35 = vor.u32 %v6747_v20, %v5884_v19  ;;  %v5632_v38 = vld [vmem:[#allocation8 + $0x158] sm:$0xf] }
 0x28e   :  { %v2169_v51 = vpack.c.bf16 %v2168_v30, %v2168_v30  ;;  %v5738_v30 = vld [vmem:[#allocation8 + $0x24c] sm:$0xf0]  ;;  %v5965_v58 = vor.u32 %v6764_v57, %v5962_v4  ;;  %v6248_v19 = vld [vmem:[#allocation8 + $0x628] sm:$0xf]  ;;  %v6838_v20 = vld [vmem:[#allocation8 + $0x640] sm:$0xf0] }
 0x28f   :  { %v5741_v47 = vor.u32 %v6708_v45, %v5738_v30 }
 0x290   :  { %2380 = vmatmul.bf16.vlgmr.msra.gmra.mxu0 %v2169_v51  ;;  %2393 = vmatmul.bf16.vlgmr.msra.gmra.mxu1 %v2169_v51 }
 0x291   :  { %2406 = vmatmul.bf16.vlgmr.msra.gmra.mxu2 %v2169_v51  ;;  %2419 = vmatmul.bf16.vlgmr.msra.gmra.mxu3 %v2169_v51  ;;  %v6214_v51 = vld [vmem:[#allocation8 + $0x604] sm:$0xf0] }
 0x292   :  { %3908 = vmatpush.bf16.msra.mxu0 %v5657_v56  ;;  %3921 = vmatpush.bf16.msra.mxu1 %v5881_v5  ;;  %v6217_v33 = vor.u32 %v6827_v50, %v6214_v51  ;;  %v5710_v56 = vld [vmem:[#allocation8 + $0x214] sm:$0xf0] }
 0x293   :  { %3934 = vmatpush.bf16.msra.mxu2 %v6105_v62  ;;  %3947 = vmatpush.bf16.msra.mxu3 %v6329_v31  ;;  %v5713_v5 = vor.u32 %v6701_v55, %v5710_v56  ;;  %v6638_v62 = vld [vmem:[#allocation8 + $0x4] sm:$0xf]  ;;  %v5458_v31 = vld [vmem:[#allocation8 + $0x1c] sm:$0xf0]  ;;  %v6733_v56 = vld [vmem:[#allocation8 + $0x2f8] sm:$0xf0] }
 0x294   :  { %v5461_v0 = vor.u32 %v6638_v62, %v5458_v31  ;;  %v5828_v55 = vld [vmem:[#allocation8 + $0x2e0] sm:$0xf] }
 0x295   :  { %v5829_v63 = vor.u32 %v6733_v56, %v5828_v55 }
 0x296   :  { %3909 = vmatpush.bf16.msra.mxu0 %v5629_v2  ;;  %3922 = vmatpush.bf16.msra.mxu1 %v5853_v3  ;;  %v6757_v2 = vld [vmem:[#allocation8 + $0x3bc] sm:$0xf]  ;;  %v5934_v3 = vld [vmem:[#allocation8 + $0x3d4] sm:$0xf0] }
 0x297   :  { %3935 = vmatpush.bf16.msra.mxu2 %v6077_v9  ;;  %3948 = vmatpush.bf16.msra.mxu3 %v6301_v25  ;;  %v5937_v6 = vor.u32 %v6757_v2, %v5934_v3  ;;  %v6750_v9 = vld [vmem:[#allocation8 + $0x384] sm:$0xf]  ;;  %v5906_v25 = vld [vmem:[#allocation8 + $0x39c] sm:$0xf0]  ;;  %v5800_v3 = vld [vmem:[#allocation8 + $0x2a8] sm:$0xf] }
 0x298   :  { %v5909_v60 = vor.u32 %v6750_v9, %v5906_v25  ;;  %v6670_v2 = vld [vmem:[#allocation8 + $0x100] sm:$0xf0]  ;;  %v6052_v25 = vld [vmem:[#allocation8 + $0x4a0] sm:$0xf] }
 0x299   :  { %v6053_v16 = vor.u32 %v6789_v28, %v6052_v25  ;;  %v6681_v25 = vld [vmem:[#allocation8 + $0x15c] sm:$0xf] }
 0x29a   :  { %3910 = vmatpush.bf16.msra.mxu0 %v5601_v12  ;;  %3923 = vmatpush.bf16.msra.mxu1 %v5825_v34  ;;  %v2202_v12 = vld [vmem:[%s7281_s6] sm:$0xf] }
 0x29b   :  { %3936 = vmatpush.bf16.msra.mxu2 %v6049_v17  ;;  %3949 = vmatpush.bf16.msra.mxu3 %v6273_v11  ;;  %v2204_v34 = vperm.slane %v2202_v12, 0  ;;  %v2205_v13 = vperm.slane %v2202_v12, 1  ;;  %v2207_v26 = vperm.slane %v2202_v12, 3 }
 0x29e   :  { %3911 = vmatpush.bf16.msra.mxu0 %v5573_v23  ;;  %3924 = vmatpush.bf16.msra.mxu1 %v5797_v24  ;;  %v2206_v24 = vperm.slane %v2202_v12, 2  ;;  %v6845_v12 = vld [vmem:[#allocation8 + $0x678] sm:$0xf0] }
 0x29f   :  { %3937 = vmatpush.bf16.msra.mxu2 %v6021_v39  ;;  %3950 = vmatpush.bf16.msra.mxu3 %v6245_v40  ;;  %v6684_v39 = vld [vmem:[#allocation8 + $0x170] sm:$0xf0] }
 0x2a0   :  { %v5633_v30 = vor.u32 %v6684_v39, %v5632_v38  ;;  %v6249_v39 = vor.u32 %v6838_v20, %v6248_v19 }
 0x2a2   :  { %3912 = vmatpush.bf16.msra.mxu0 %v5545_v41  ;;  %3925 = vmatpush.bf16.msra.mxu1 %v5769_v42  ;;  %v5856_v42 = vld [vmem:[#allocation8 + $0x318] sm:$0xf] }
 0x2a3   :  { %3938 = vmatpush.bf16.msra.mxu2 %v5993_v27  ;;  %3951 = vmatpush.bf16.msra.mxu3 %v6217_v33  ;;  %v5857_v33 = vor.u32 %v6740_v43, %v5856_v42  ;;  %v5996_v42 = vld [vmem:[#allocation8 + $0x430] sm:$0xf]  ;;  %v6775_v43 = vld [vmem:[#allocation8 + $0x448] sm:$0xf0] }
 0x2a6   :  { %3913 = vmatpush.bf16.msra.mxu0 %v5517_v46  ;;  %3926 = vmatpush.bf16.msra.mxu1 %v5741_v47  ;;  %v6108_v46 = vld [vmem:[#allocation8 + $0x510] sm:$0xf]  ;;  %v6803_v47 = vld [vmem:[#allocation8 + $0x528] sm:$0xf0] }
 0x2a7   :  { %3939 = vmatpush.bf16.msra.mxu2 %v5965_v58  ;;  %3952 = vmatpush.bf16.msra.mxu3 %v6189_v61  ;;  %v6109_v4 = vor.u32 %v6803_v47, %v6108_v46  ;;  %v6796_v61 = vld [vmem:[#allocation8 + $0x4f0] sm:$0xf0]  ;;  %v5492_v47 = vld [vmem:[#allocation8 + $0x40] sm:$0xf] }
 0x2a8   :  { %v5493_v55 = vor.u32 %v6649_v21, %v5492_v47  ;;  %v6667_v47 = vld [vmem:[#allocation8 + $0xec] sm:$0xf]  ;;  %v5578_v21 = vld [vmem:[#allocation8 + $0x104] sm:$0xf0] }
 0x2aa   :  { %3914 = vmatpush.bf16.msra.mxu0 %v5489_v54  ;;  %3927 = vmatpush.bf16.msra.mxu1 %v5713_v5  ;;  %v6677_v54 = vld [vmem:[#allocation8 + $0x138] sm:$0xf0] }
 0x2ab   :  { %3940 = vmatpush.bf16.msra.mxu2 %v5937_v6  ;;  %3953 = vmatpush.bf16.msra.mxu3 %v6161_v37  ;;  %v5605_v58 = vor.u32 %v6677_v54, %v5604_v52  ;;  %v6726_v6 = vld [vmem:[#allocation8 + $0x2c0] sm:$0xf0]  ;;  %v6081_v37 = vor.u32 %v6796_v61, %v6080_v59  ;;  %v6192_v52 = vld [vmem:[#allocation8 + $0x5b8] sm:$0xf]  ;;  %v6824_v54 = vld [vmem:[#allocation8 + $0x5d0] sm:$0xf0] }
 0x2ac   :  { %v5801_v10 = vor.u32 %v6726_v6, %v5800_v3  ;;  %v5662_v59 = vld [vmem:[#allocation8 + $0x1ac] sm:$0xf0]  ;;  %v6164_v3 = vld [vmem:[#allocation8 + $0x580] sm:$0xf]  ;;  %v6817_v6 = vld [vmem:[#allocation8 + $0x598] sm:$0xf0] }
 0x2ae   :  { %3915 = vmatpush.bf16.msra.mxu0 %v5461_v0  ;;  %3928 = vmatpush.bf16.msra.mxu1 %v5685_v36  ;;  %v6304_v0 = vld [vmem:[#allocation8 + $0x698] sm:$0xf]  ;;  %v5576_v36 = vld [vmem:[#allocation8 + $0xe8] sm:$0xf] }
 0x2af   :  { %3941 = vmatpush.bf16.msra.mxu2 %v5909_v60  ;;  %3954 = vmatpush.bf16.msra.mxu3 %v6133_v53  ;;  %v6305_v9 = vor.u32 %v6852_v1, %v6304_v0  ;;  %v5577_v60 = vor.u32 %v6670_v2, %v5576_v36  ;;  %v6276_v53 = vld [vmem:[#allocation8 + $0x660] sm:$0xf]  ;;  %v6744_v0 = vld [vmem:[#allocation8 + $0x354] sm:$0xf]  ;;  %v5886_v1 = vld [vmem:[#allocation8 + $0x36c] sm:$0xf0] }
 0x2b0   :  { %v5940_v36 = vld [vmem:[#allocation8 + $0x3c0] sm:$0xf]  ;;  %v6761_v2 = vld [vmem:[#allocation8 + $0x3d8] sm:$0xf0] }
 0x2b1   :  { %v5941_v28 = vor.u32 %v6761_v2, %v5940_v36 }
 0x30d   :  { %v2381_v14 = vpop.f32.mrf.mxu0  ;;  %v2394_v15 = vpop.f32.mrf.mxu1 }
 0x30e   :  { %v2382_v17 = vadd.f32 %v2381_v14, %v2204_v34  ;;  %v2395_v11 = vadd.f32 %v2394_v15, %v2205_v13  ;;  %v5548_v34 = vld [vmem:[#allocation8 + $0xb0] sm:$0xf]  ;;  %v6663_v13 = vld [vmem:[#allocation8 + $0xc8] sm:$0xf0] }
 0x30f   :  { %v5772_v14 = vld [vmem:[#allocation8 + $0x270] sm:$0xf]  ;;  %v6719_v15 = vld [vmem:[#allocation8 + $0x288] sm:$0xf0] }
 0x310   :  { %v2424_v22 = vmax.f32 %v2382_v17, 0.0  ;;  %v2425_v23 = vmax.f32 %v2395_v11, 0.0  ;;  %v6277_v17 = vor.u32 %v6845_v12, %v6276_v53  ;;  %v6024_v11 = vld [vmem:[#allocation8 + $0x468] sm:$0xf]  ;;  %v6165_v53 = vor.u32 %v6817_v6, %v6164_v3  ;;  %v5858_v12 = vld [vmem:[#allocation8 + $0x334] sm:$0xf0] }
 0x311   :  { %v6025_v38 = vor.u32 %v6782_v18, %v6024_v11  ;;  %v6856_v11 = vld [vmem:[#allocation8 + $0x6d4] sm:$0xf]  ;;  %v6334_v18 = vld [vmem:[#allocation8 + $0x6ec] sm:$0xf0]  ;;  %v6653_v3 = vld [vmem:[#allocation8 + $0x7c] sm:$0xf] }
 0x312   :  { %v7217_v40 = vpack.c.bf16 %v2424_v22, %v2424_v22  ;;  %v7219_v41 = vpack.c.bf16 %v2425_v23, %v2425_v23  ;;  %v5549_v22 = vor.u32 %v6663_v13, %v5548_v34  ;;  %v5773_v23 = vor.u32 %v6719_v15, %v5772_v14  ;;  %v5912_v34 = vld [vmem:[#allocation8 + $0x388] sm:$0xf]  ;;  %v6754_v13 = vld [vmem:[#allocation8 + $0x3a0] sm:$0xf0]  ;;  %v5522_v6 = vld [vmem:[#allocation8 + $0x94] sm:$0xf0] }
 0x313   :  { %v6136_v14 = vld [vmem:[#allocation8 + $0x548] sm:$0xf]  ;;  %v6810_v15 = vld [vmem:[#allocation8 + $0x560] sm:$0xf0] }
 0x314   :  { %v2407_v44 = vpop.f32.mrf.mxu2  ;;  %v2420_v45 = vpop.f32.mrf.mxu3  ;;  %3864 = vmatmul.bf16.vlgmr.msrb.gmra.mxu0 %v7217_v40  ;;  %3877 = vmatmul.bf16.vlgmr.msrb.gmra.mxu1 %v7219_v41 }
 0x315   :  { %v2408_v48 = vadd.f32 %v2407_v44, %v2206_v24  ;;  %v2421_v50 = vadd.f32 %v2420_v45, %v2207_v26  ;;  %3960 = vmatpush.bf16.msrb.mxu0 %v5661_v32  ;;  %3973 = vmatpush.bf16.msrb.mxu1 %v5885_v35  ;;  %v2383_v27 = vpop.f32.mrf.mxu0  ;;  %v2396_v51 = vpop.f32.mrf.mxu1  ;;  %v5520_v24 = vld [vmem:[#allocation8 + $0x78] sm:$0xf]  ;;  %v6656_v26 = vld [vmem:[#allocation8 + $0x90] sm:$0xf0]  ;;  %v6220_v44 = vld [vmem:[#allocation8 + $0x5f0] sm:$0xf] }
 0x316   :  { %v5744_v32 = vld [vmem:[#allocation8 + $0x238] sm:$0xf]  ;;  %v6712_v35 = vld [vmem:[#allocation8 + $0x250] sm:$0xf0]  ;;  %v6831_v45 = vld [vmem:[#allocation8 + $0x608] sm:$0xf0]  ;;  %v5997_v27 = vor.u32 %v6775_v43, %v5996_v42 }
 0x317   :  { %v2426_v5 = vmax.f32 %v2408_v48, 0.0  ;;  %v2427_v57 = vmax.f32 %v2421_v50, 0.0  ;;  %v5745_v46 = vor.u32 %v6712_v35, %v5744_v32  ;;  %v5716_v48 = vld [vmem:[#allocation8 + $0x200] sm:$0xf]  ;;  %v6705_v50 = vld [vmem:[#allocation8 + $0x218] sm:$0xf0]  ;;  %v6221_v51 = vor.u32 %v6831_v45, %v6220_v44 }
 0x318   :  { %v5717_v56 = vor.u32 %v6705_v50, %v5716_v48  ;;  %v6730_v32 = vld [vmem:[#allocation8 + $0x2e4] sm:$0xf]  ;;  %v5830_v35 = vld [vmem:[#allocation8 + $0x2fc] sm:$0xf0]  ;;  %v6793_v42 = vld [vmem:[#allocation8 + $0x4dc] sm:$0xf] }
 0x319   :  { %v7223_v62 = vpack.c.bf16 %v2426_v5, %v2426_v5  ;;  %v7225_v31 = vpack.c.bf16 %v2427_v57, %v2427_v57  ;;  %3961 = vmatpush.bf16.msrb.mxu0 %v5633_v30  ;;  %3974 = vmatpush.bf16.msrb.mxu1 %v5857_v33  ;;  %v5521_v30 = vor.u32 %v6656_v26, %v5520_v24  ;;  %v5968_v33 = vld [vmem:[#allocation8 + $0x3f8] sm:$0xf]  ;;  %v5464_v5 = vld [vmem:[#allocation8 + $0x8] sm:$0xf]  ;;  %v6642_v57 = vld [vmem:[#allocation8 + $0x20] sm:$0xf0] }
 0x31a   :  { %v5969_v61 = vor.u32 %v6768_v29, %v5968_v33  ;;  %v6137_v24 = vor.u32 %v6810_v15, %v6136_v14  ;;  %v5606_v26 = vld [vmem:[#allocation8 + $0x13c] sm:$0xf0]  ;;  %v6082_v43 = vld [vmem:[#allocation8 + $0x4f4] sm:$0xf0]  ;;  %v6849_v44 = vld [vmem:[#allocation8 + $0x69c] sm:$0xf] }
 0x31b   :  { %3890 = vmatmul.bf16.vlgmr.msrb.gmra.mxu2 %v7223_v62  ;;  %3903 = vmatmul.bf16.vlgmr.msrb.gmra.mxu3 %v7225_v31  ;;  %v6306_v45 = vld [vmem:[#allocation8 + $0x6b4] sm:$0xf0]  ;;  %v6723_v48 = vld [vmem:[#allocation8 + $0x2ac] sm:$0xf]  ;;  %v5802_v50 = vld [vmem:[#allocation8 + $0x2c4] sm:$0xf0] }
 0x31c   :  { %3986 = vmatpush.bf16.msrb.mxu2 %v6109_v4  ;;  %3999 = vmatpush.bf16.msrb.mxu3 %v6333_v49  ;;  %v2409_v7 = vpop.f32.mrf.mxu2  ;;  %v2422_v8 = vpop.f32.mrf.mxu3  ;;  %v5688_v4 = vld [vmem:[#allocation8 + $0x1c8] sm:$0xf]  ;;  %v6698_v49 = vld [vmem:[#allocation8 + $0x1e0] sm:$0xf0]  ;;  %v6054_v29 = vld [vmem:[#allocation8 + $0x4bc] sm:$0xf0] }
 0x31d   :  { %3962 = vmatpush.bf16.msrb.mxu0 %v5605_v58  ;;  %3975 = vmatpush.bf16.msrb.mxu1 %v5829_v63  ;;  %v6688_v58 = vld [vmem:[#allocation8 + $0x194] sm:$0xf]  ;;  %v6193_v63 = vor.u32 %v6824_v54, %v6192_v52  ;;  %v5465_v7 = vor.u32 %v6642_v57, %v5464_v5  ;;  %v5689_v8 = vor.u32 %v6698_v49, %v5688_v4  ;;  %v6786_v33 = vld [vmem:[#allocation8 + $0x4a4] sm:$0xf]  ;;  %v6278_v54 = vld [vmem:[#allocation8 + $0x67c] sm:$0xf0] }
 0x31e   :  { %v6842_v52 = vld [vmem:[#allocation8 + $0x664] sm:$0xf]  ;;  %v6660_v5 = vld [vmem:[#allocation8 + $0xb4] sm:$0xf]  ;;  %v5550_v57 = vld [vmem:[#allocation8 + $0xcc] sm:$0xf0] }
 0x31f   :  { %v6716_v4 = vld [vmem:[#allocation8 + $0x274] sm:$0xf]  ;;  %v5774_v49 = vld [vmem:[#allocation8 + $0x28c] sm:$0xf0]  ;;  %v5553_v36 = vor.u32 %v6660_v5, %v5550_v57  ;;  %v6702_v14 = vld [vmem:[#allocation8 + $0x204] sm:$0xf] }
 0x320   :  { %3987 = vmatpush.bf16.msrb.mxu2 %v6081_v37  ;;  %4000 = vmatpush.bf16.msrb.mxu3 %v6305_v9  ;;  %v5665_v37 = vor.u32 %v6688_v58, %v5662_v59  ;;  %v5889_v9 = vor.u32 %v6744_v0, %v5886_v1  ;;  %v6057_v58 = vor.u32 %v6786_v33, %v6054_v29  ;;  %v6835_v0 = vld [vmem:[#allocation8 + $0x62c] sm:$0xf]  ;;  %v6250_v1 = vld [vmem:[#allocation8 + $0x644] sm:$0xf0]  ;;  %v5718_v15 = vld [vmem:[#allocation8 + $0x21c] sm:$0xf0] }
 0x321   :  { %3963 = vmatpush.bf16.msrb.mxu0 %v5577_v60  ;;  %3976 = vmatpush.bf16.msrb.mxu1 %v5801_v10  ;;  %v5634_v60 = vld [vmem:[#allocation8 + $0x174] sm:$0xf0]  ;;  %v6737_v10 = vld [vmem:[#allocation8 + $0x31c] sm:$0xf]  ;;  %v6281_v59 = vor.u32 %v6842_v52, %v6278_v54  ;;  %v5777_v2 = vor.u32 %v6716_v4, %v5774_v49  ;;  %v5640_v33 = vld [vmem:[#allocation8 + $0x160] sm:$0xf] }
 0x322   :  { %v5637_v19 = vor.u32 %v6681_v25, %v5634_v60  ;;  %v5861_v20 = vor.u32 %v6737_v10, %v5858_v12  ;;  %v6772_v25 = vld [vmem:[#allocation8 + $0x434] sm:$0xf]  ;;  %v5998_v60 = vld [vmem:[#allocation8 + $0x44c] sm:$0xf0]  ;;  %v6685_v29 = vld [vmem:[#allocation8 + $0x178] sm:$0xf0] }
 0x323   :  { %v6828_v10 = vld [vmem:[#allocation8 + $0x5f4] sm:$0xf]  ;;  %v5864_v52 = vld [vmem:[#allocation8 + $0x320] sm:$0xf]  ;;  %v6751_v5 = vld [vmem:[#allocation8 + $0x38c] sm:$0xf] }
 0x324   :  { %3988 = vmatpush.bf16.msrb.mxu2 %v6053_v16  ;;  %4001 = vmatpush.bf16.msrb.mxu3 %v6277_v17  ;;  %v6800_v16 = vld [vmem:[#allocation8 + $0x514] sm:$0xf]  ;;  %v6110_v17 = vld [vmem:[#allocation8 + $0x52c] sm:$0xf0]  ;;  %v5914_v57 = vld [vmem:[#allocation8 + $0x3a4] sm:$0xf0] }
 0x325   :  { %3916 = vmatmul.bf16.vlgmr.msra.gmra.mxu0 %v7217_v40  ;;  %3929 = vmatmul.bf16.vlgmr.msra.gmra.mxu1 %v7219_v41  ;;  %v6807_v4 = vld [vmem:[#allocation8 + $0x54c] sm:$0xf]  ;;  %v6138_v49 = vld [vmem:[#allocation8 + $0x564] sm:$0xf0] }
 0x326   :  { %3964 = vmatpush.bf16.msrb.mxu0 %v5549_v22  ;;  %3977 = vmatpush.bf16.msrb.mxu1 %v5773_v23  ;;  %v6674_v22 = vld [vmem:[#allocation8 + $0x124] sm:$0xf]  ;;  %v5913_v23 = vor.u32 %v6754_v13, %v5912_v34  ;;  %v5494_v13 = vld [vmem:[#allocation8 + $0x5c] sm:$0xf0] }
 0x327   :  { %v6646_v34 = vld [vmem:[#allocation8 + $0x44] sm:$0xf] }
 0x328   :  { %3989 = vmatpush.bf16.msrb.mxu2 %v6025_v38  ;;  %4002 = vmatpush.bf16.msrb.mxu3 %v6249_v39  ;;  %v6113_v38 = vor.u32 %v6800_v16, %v6110_v17  ;;  %v6337_v39 = vor.u32 %v6856_v11, %v6334_v18  ;;  %v6001_v16 = vor.u32 %v6772_v25, %v5998_v60  ;;  %v6765_v11 = vld [vmem:[#allocation8 + $0x3fc] sm:$0xf]  ;;  %v5970_v18 = vld [vmem:[#allocation8 + $0x414] sm:$0xf0]  ;;  %v6088_v25 = vld [vmem:[#allocation8 + $0x4e0] sm:$0xf] }
 0x329   :  { %v6797_v60 = vld [vmem:[#allocation8 + $0x4f8] sm:$0xf0] }
 0x32a   :  { %3965 = vmatpush.bf16.msrb.mxu0 %v5521_v30  ;;  %3978 = vmatpush.bf16.msrb.mxu1 %v5745_v46  ;;  %v5609_v30 = vor.u32 %v6674_v22, %v5606_v26  ;;  %v5833_v46 = vor.u32 %v6730_v32, %v5830_v35  ;;  %v5497_v22 = vor.u32 %v6646_v34, %v5494_v13  ;;  %v5466_v26 = vld [vmem:[#allocation8 + $0x24] sm:$0xf0]  ;;  %v6695_v32 = vld [vmem:[#allocation8 + $0x1cc] sm:$0xf]  ;;  %v5584_v34 = vld [vmem:[#allocation8 + $0xf0] sm:$0xf] }
 0x32b   :  { %3942 = vmatmul.bf16.vlgmr.msra.gmra.mxu2 %v7223_v62  ;;  %3955 = vmatmul.bf16.vlgmr.msra.gmra.mxu3 %v7225_v31  ;;  %v5690_v35 = vld [vmem:[#allocation8 + $0x1e4] sm:$0xf0]  ;;  %v6671_v13 = vld [vmem:[#allocation8 + $0x108] sm:$0xf0] }
 0x32c   :  { %3990 = vmatpush.bf16.msrb.mxu2 %v5997_v27  ;;  %4003 = vmatpush.bf16.msrb.mxu3 %v6221_v51  ;;  %v6085_v27 = vor.u32 %v6793_v42, %v6082_v43  ;;  %v6309_v51 = vor.u32 %v6849_v44, %v6306_v45  ;;  %v5973_v42 = vor.u32 %v6765_v11, %v5970_v18  ;;  %v5892_v44 = vld [vmem:[#allocation8 + $0x358] sm:$0xf]  ;;  %v6748_v45 = vld [vmem:[#allocation8 + $0x370] sm:$0xf0]  ;;  %v6060_v11 = vld [vmem:[#allocation8 + $0x4a8] sm:$0xf] }
 0x32d   :  { %v6790_v18 = vld [vmem:[#allocation8 + $0x4c0] sm:$0xf0] }
 0x32e   :  { %3966 = vmatpush.bf16.msrb.mxu0 %v5493_v55  ;;  %3979 = vmatpush.bf16.msrb.mxu1 %v5717_v56  ;;  %v5581_v55 = vor.u32 %v6667_v47, %v5578_v21  ;;  %v5805_v56 = vor.u32 %v6723_v48, %v5802_v50  ;;  %v6814_v47 = vld [vmem:[#allocation8 + $0x584] sm:$0xf]  ;;  %v6166_v21 = vld [vmem:[#allocation8 + $0x59c] sm:$0xf0]  ;;  %v5693_v50 = vor.u32 %v6695_v32, %v5690_v35 }
 0x32f   :  { %v6061_v32 = vor.u32 %v6790_v18, %v6060_v11  ;;  %v6682_v11 = vld [vmem:[#allocation8 + $0x164] sm:$0xf]  ;;  %v5642_v18 = vld [vmem:[#allocation8 + $0x17c] sm:$0xf0] }
 0x330   :  { %3991 = vmatpush.bf16.msrb.mxu2 %v5969_v61  ;;  %4004 = vmatpush.bf16.msrb.mxu3 %v6193_v63  ;;  %v6779_v61 = vld [vmem:[#allocation8 + $0x46c] sm:$0xf]  ;;  %v6026_v63 = vld [vmem:[#allocation8 + $0x484] sm:$0xf0] }
 0x332   :  { %3967 = vmatpush.bf16.msrb.mxu0 %v5465_v7  ;;  %3980 = vmatpush.bf16.msrb.mxu1 %v5689_v8  ;;  %v6709_v7 = vld [vmem:[#allocation8 + $0x23c] sm:$0xf]  ;;  %v5746_v8 = vld [vmem:[#allocation8 + $0x254] sm:$0xf0] }
 0x333   :  { %v5749_v12 = vor.u32 %v6709_v7, %v5746_v8 }
 0x334   :  { %3992 = vmatpush.bf16.msrb.mxu2 %v5941_v28  ;;  %4005 = vmatpush.bf16.msrb.mxu3 %v6165_v53  ;;  %v6222_v28 = vld [vmem:[#allocation8 + $0x60c] sm:$0xf0]  ;;  %v5525_v53 = vor.u32 %v6653_v3, %v5522_v6  ;;  %v5612_v3 = vld [vmem:[#allocation8 + $0x128] sm:$0xf]  ;;  %v6678_v6 = vld [vmem:[#allocation8 + $0x140] sm:$0xf0] }
 0x335   :  { %3968 = vmatmul.bf16.vlgmr.msrb.gmra.mxu0 %v7217_v40  ;;  %3981 = vmatmul.bf16.vlgmr.msrb.gmra.mxu1 %v7219_v41  ;;  %v6225_v17 = vor.u32 %v6828_v10, %v6222_v28  ;;  %v6312_v10 = vld [vmem:[#allocation8 + $0x6a0] sm:$0xf]  ;;  %v6853_v28 = vld [vmem:[#allocation8 + $0x6b8] sm:$0xf0] }
 0x336   :  { %4012 = vmatpush.bf16.msra.mxu0 %v5665_v37  ;;  %4025 = vmatpush.bf16.msra.mxu1 %v5889_v9  ;;  %v6029_v37 = vor.u32 %v6779_v61, %v6026_v63  ;;  %v6253_v9 = vor.u32 %v6835_v0, %v6250_v1  ;;  %v6340_v61 = vld [vmem:[#allocation8 + $0x6d8] sm:$0xf]  ;;  %v6860_v63 = vld [vmem:[#allocation8 + $0x6f0] sm:$0xf0]  ;;  %v5641_v0 = vor.u32 %v6685_v29, %v5640_v33 }
 0x337   :  { %v6341_v8 = vor.u32 %v6860_v63, %v6340_v61  ;;  %v6004_v33 = vld [vmem:[#allocation8 + $0x438] sm:$0xf]  ;;  %v6776_v29 = vld [vmem:[#allocation8 + $0x450] sm:$0xf0]  ;;  %v5976_v61 = vld [vmem:[#allocation8 + $0x400] sm:$0xf] }
 0x338   :  { %3993 = vmatpush.bf16.msrb.mxu2 %v5913_v23  ;;  %4006 = vmatpush.bf16.msrb.mxu3 %v6137_v24  ;;  %v5721_v23 = vor.u32 %v6702_v14, %v5718_v15  ;;  %v6639_v24 = vld [vmem:[#allocation8 + $0xc] sm:$0xf]  ;;  %v6089_v14 = vor.u32 %v6797_v60, %v6088_v25  ;;  %v6313_v15 = vor.u32 %v6853_v28, %v6312_v10  ;;  %v6769_v63 = vld [vmem:[#allocation8 + $0x418] sm:$0xf0]  ;;  %v5670_v60 = vld [vmem:[#allocation8 + $0x1b4] sm:$0xf0] }
 0x339   :  { %v5469_v48 = vor.u32 %v6639_v24, %v5466_v26  ;;  %v5556_v24 = vld [vmem:[#allocation8 + $0xb8] sm:$0xf]  ;;  %v6664_v26 = vld [vmem:[#allocation8 + $0xd0] sm:$0xf0]  ;;  %v6689_v25 = vld [vmem:[#allocation8 + $0x19c] sm:$0xf] }
 0x33a   :  { %4013 = vmatpush.bf16.msra.mxu0 %v5637_v19  ;;  %4026 = vmatpush.bf16.msra.mxu1 %v5861_v20  ;;  %v6821_v19 = vld [vmem:[#allocation8 + $0x5bc] sm:$0xf]  ;;  %v6194_v20 = vld [vmem:[#allocation8 + $0x5d4] sm:$0xf0] }
 0x33b   :  { %3994 = vmatmul.bf16.vlgmr.msrb.gmra.mxu2 %v7223_v62  ;;  %4007 = vmatmul.bf16.vlgmr.msrb.gmra.mxu3 %v7225_v31  ;;  %v6197_v43 = vor.u32 %v6821_v19, %v6194_v20  ;;  %v6284_v19 = vld [vmem:[#allocation8 + $0x668] sm:$0xf]  ;;  %v6846_v20 = vld [vmem:[#allocation8 + $0x680] sm:$0xf0]  ;;  %v6745_v10 = vld [vmem:[#allocation8 + $0x35c] sm:$0xf] }
 0x33c   :  { %4038 = vmatpush.bf16.msra.mxu2 %v6113_v38  ;;  %4051 = vmatpush.bf16.msra.mxu3 %v6337_v39  ;;  %v5668_v38 = vld [vmem:[#allocation8 + $0x198] sm:$0xf]  ;;  %v6692_v39 = vld [vmem:[#allocation8 + $0x1b0] sm:$0xf0]  ;;  %v6285_v35 = vor.u32 %v6846_v20, %v6284_v19  ;;  %v6738_v19 = vld [vmem:[#allocation8 + $0x324] sm:$0xf] }
 0x33d   :  { %v5894_v28 = vld [vmem:[#allocation8 + $0x374] sm:$0xf0] }
 0x33e   :  { %4014 = vmatpush.bf16.msra.mxu0 %v5609_v30  ;;  %4027 = vmatpush.bf16.msra.mxu1 %v5833_v46  ;;  %v6758_v30 = vld [vmem:[#allocation8 + $0x3c4] sm:$0xf]  ;;  %v5942_v46 = vld [vmem:[#allocation8 + $0x3dc] sm:$0xf0] }
 0x33f   :  { %v5945_v54 = vor.u32 %v6758_v30, %v5942_v46  ;;  %v5557_v30 = vor.u32 %v6664_v26, %v5556_v24  ;;  %v5920_v24 = vld [vmem:[#allocation8 + $0x390] sm:$0xf]  ;;  %v6755_v26 = vld [vmem:[#allocation8 + $0x3a8] sm:$0xf0] }
 0x340   :  { %4039 = vmatpush.bf16.msra.mxu2 %v6085_v27  ;;  %4052 = vmatpush.bf16.msra.mxu3 %v6309_v51  ;;  %v5669_v27 = vor.u32 %v6692_v39, %v5668_v38  ;;  %v5893_v51 = vor.u32 %v6748_v45, %v5892_v44  ;;  %v5780_v38 = vld [vmem:[#allocation8 + $0x278] sm:$0xf]  ;;  %v6720_v39 = vld [vmem:[#allocation8 + $0x290] sm:$0xf0]  ;;  %v6256_v44 = vld [vmem:[#allocation8 + $0x630] sm:$0xf] }
 0x341   :  { %v6839_v45 = vld [vmem:[#allocation8 + $0x648] sm:$0xf0]  ;;  %v5781_v46 = vor.u32 %v6720_v39, %v5780_v38  ;;  %v6801_v38 = vld [vmem:[#allocation8 + $0x51c] sm:$0xf]  ;;  %v6118_v39 = vld [vmem:[#allocation8 + $0x534] sm:$0xf0] }
 0x342   :  { %4015 = vmatpush.bf16.msra.mxu0 %v5581_v55  ;;  %4028 = vmatpush.bf16.msra.mxu1 %v5805_v56  ;;  %v6169_v55 = vor.u32 %v6814_v47, %v6166_v21  ;;  %v6741_v56 = vld [vmem:[#allocation8 + $0x338] sm:$0xf0]  ;;  %v5528_v47 = vld [vmem:[#allocation8 + $0x80] sm:$0xf] }
 0x343   :  { %v5865_v1 = vor.u32 %v6741_v56, %v5864_v52  ;;  %v6657_v21 = vld [vmem:[#allocation8 + $0x98] sm:$0xf0]  ;;  %v6228_v52 = vld [vmem:[#allocation8 + $0x5f8] sm:$0xf] }
 0x344   :  { %4040 = vmatpush.bf16.msra.mxu2 %v6057_v58  ;;  %4053 = vmatpush.bf16.msra.mxu3 %v6281_v59  ;;  %v6116_v58 = vld [vmem:[#allocation8 + $0x518] sm:$0xf]  ;;  %v6804_v59 = vld [vmem:[#allocation8 + $0x530] sm:$0xf0] }
 0x345   :  { %v6117_v7 = vor.u32 %v6804_v59, %v6116_v58  ;;  %v5724_v58 = vld [vmem:[#allocation8 + $0x208] sm:$0xf]  ;;  %v6706_v59 = vld [vmem:[#allocation8 + $0x220] sm:$0xf0] }
 0x346   :  { %4016 = vmatpush.bf16.msra.mxu0 %v5553_v36  ;;  %4029 = vmatpush.bf16.msra.mxu1 %v5777_v2  ;;  %v5917_v36 = vor.u32 %v6751_v5, %v5914_v57  ;;  %v6141_v2 = vor.u32 %v6807_v4, %v6138_v49  ;;  %v5500_v5 = vld [vmem:[#allocation8 + $0x48] sm:$0xf]  ;;  %v6650_v57 = vld [vmem:[#allocation8 + $0x60] sm:$0xf0]  ;;  %v6005_v4 = vor.u32 %v6776_v29, %v6004_v33  ;;  %v6090_v29 = vld [vmem:[#allocation8 + $0x4fc] sm:$0xf0] }
 0x347   :  { %v6794_v33 = vld [vmem:[#allocation8 + $0x4e4] sm:$0xf] }
 0x348   :  { %4041 = vmatpush.bf16.msra.mxu2 %v6029_v37  ;;  %4054 = vmatpush.bf16.msra.mxu3 %v6253_v9  ;;  %v5836_v37 = vld [vmem:[#allocation8 + $0x2e8] sm:$0xf]  ;;  %v6734_v9 = vld [vmem:[#allocation8 + $0x300] sm:$0xf0] }
 0x34a   :  { %4017 = vmatpush.bf16.msra.mxu0 %v5525_v53  ;;  %4030 = vmatpush.bf16.msra.mxu1 %v5749_v12  ;;  %v5613_v53 = vor.u32 %v6678_v6, %v5612_v3  ;;  %v5837_v12 = vor.u32 %v6734_v9, %v5836_v37  ;;  %v5472_v3 = vld [vmem:[#allocation8 + $0x10] sm:$0xf]  ;;  %v6643_v6 = vld [vmem:[#allocation8 + $0x28] sm:$0xf0] }
 0x34b   :  { %v6699_v9 = vld [vmem:[#allocation8 + $0x1e8] sm:$0xf0] }
 0x34c   :  { %4042 = vmatpush.bf16.msra.mxu2 %v6001_v16  ;;  %4055 = vmatpush.bf16.msra.mxu3 %v6225_v17  ;;  %v5808_v16 = vld [vmem:[#allocation8 + $0x2b0] sm:$0xf]  ;;  %v6727_v17 = vld [vmem:[#allocation8 + $0x2c8] sm:$0xf0] }
 0x34e   :  { %4018 = vmatpush.bf16.msra.mxu0 %v5497_v22  ;;  %4031 = vmatpush.bf16.msra.mxu1 %v5721_v23  ;;  %v5585_v22 = vor.u32 %v6671_v13, %v5584_v34  ;;  %v5809_v23 = vor.u32 %v6727_v17, %v5808_v16  ;;  %v6172_v34 = vld [vmem:[#allocation8 + $0x588] sm:$0xf]  ;;  %v6818_v13 = vld [vmem:[#allocation8 + $0x5a0] sm:$0xf0]  ;;  %v5673_v16 = vor.u32 %v6689_v25, %v5670_v60  ;;  %v6780_v25 = vld [vmem:[#allocation8 + $0x474] sm:$0xf] }
 0x34f   :  { %v5897_v17 = vor.u32 %v6745_v10, %v5894_v28  ;;  %v6034_v60 = vld [vmem:[#allocation8 + $0x48c] sm:$0xf0]  ;;  %v6836_v10 = vld [vmem:[#allocation8 + $0x634] sm:$0xf] }
 0x350   :  { %4043 = vmatpush.bf16.msra.mxu2 %v5973_v42  ;;  %4056 = vmatpush.bf16.msra.mxu3 %v6197_v43  ;;  %v6032_v42 = vld [vmem:[#allocation8 + $0x470] sm:$0xf]  ;;  %v6783_v43 = vld [vmem:[#allocation8 + $0x488] sm:$0xf0] }
 0x351   :  { %v6258_v28 = vld [vmem:[#allocation8 + $0x64c] sm:$0xf0] }
 0x352   :  { %4019 = vmatpush.bf16.msra.mxu0 %v5469_v48  ;;  %4032 = vmatpush.bf16.msra.mxu1 %v5693_v50  ;;  %v6033_v48 = vor.u32 %v6783_v43, %v6032_v42  ;;  %v6257_v50 = vor.u32 %v6839_v45, %v6256_v44  ;;  %v6857_v42 = vld [vmem:[#allocation8 + $0x6dc] sm:$0xf]  ;;  %v6342_v43 = vld [vmem:[#allocation8 + $0x6f4] sm:$0xf0]  ;;  %v5645_v44 = vor.u32 %v6682_v11, %v5642_v18 }
 0x353   :  { %v6773_v11 = vld [vmem:[#allocation8 + $0x43c] sm:$0xf]  ;;  %v6006_v18 = vld [vmem:[#allocation8 + $0x454] sm:$0xf0] }
 0x354   :  { %4044 = vmatpush.bf16.msra.mxu2 %v5945_v54  ;;  %4057 = vmatpush.bf16.msra.mxu3 %v6169_v55  ;;  %v6832_v54 = vld [vmem:[#allocation8 + $0x610] sm:$0xf0]  ;;  %v5529_v55 = vor.u32 %v6657_v21, %v5528_v47  ;;  %v6675_v47 = vld [vmem:[#allocation8 + $0x12c] sm:$0xf]  ;;  %v5614_v21 = vld [vmem:[#allocation8 + $0x144] sm:$0xf0] }
 0x355   :  { %4020 = vmatmul.bf16.vlgmr.msra.gmra.mxu0 %v7217_v40  ;;  %4033 = vmatmul.bf16.vlgmr.msra.gmra.mxu1 %v7219_v41  ;;  %v6229_v49 = vor.u32 %v6832_v54, %v6228_v52  ;;  %v6850_v52 = vld [vmem:[#allocation8 + $0x6a4] sm:$0xf]  ;;  %v6314_v54 = vld [vmem:[#allocation8 + $0x6bc] sm:$0xf0] }
 0x356   :  { %4064 = vmatpush.bf16.msrb.mxu0 %v5669_v27  ;;  %4077 = vmatpush.bf16.msrb.mxu1 %v5893_v51  ;;  %v5752_v27 = vld [vmem:[#allocation8 + $0x240] sm:$0xf]  ;;  %v6713_v51 = vld [vmem:[#allocation8 + $0x258] sm:$0xf0] }
 0x357   :  { %v5753_v56 = vor.u32 %v6713_v51, %v5752_v27  ;;  %v6731_v27 = vld [vmem:[#allocation8 + $0x2ec] sm:$0xf]  ;;  %v5838_v51 = vld [vmem:[#allocation8 + $0x304] sm:$0xf0] }
 0x358   :  { %4045 = vmatpush.bf16.msra.mxu2 %v5917_v36  ;;  %4058 = vmatpush.bf16.msra.mxu3 %v6141_v2  ;;  %v5501_v36 = vor.u32 %v6650_v57, %v5500_v5  ;;  %v5725_v2 = vor.u32 %v6706_v59, %v5724_v58  ;;  %v6668_v5 = vld [vmem:[#allocation8 + $0xf4] sm:$0xf]  ;;  %v5586_v57 = vld [vmem:[#allocation8 + $0x10c] sm:$0xf0] }
 0x359   :  { %v6724_v58 = vld [vmem:[#allocation8 + $0x2b4] sm:$0xf]  ;;  %v5810_v59 = vld [vmem:[#allocation8 + $0x2cc] sm:$0xf0] }
 0x35a   :  { %4065 = vmatpush.bf16.msrb.mxu0 %v5641_v0  ;;  %4078 = vmatpush.bf16.msrb.mxu1 %v5865_v1  ;;  %v6200_v0 = vld [vmem:[#allocation8 + $0x5c0] sm:$0xf]  ;;  %v6825_v1 = vld [vmem:[#allocation8 + $0x5d8] sm:$0xf0] }
 0x35b   :  { %4046 = vmatmul.bf16.vlgmr.msra.gmra.mxu2 %v7223_v62  ;;  %4059 = vmatmul.bf16.vlgmr.msra.gmra.mxu3 %v7225_v31  ;;  %v6201_v37 = vor.u32 %v6825_v1, %v6200_v0  ;;  %v6843_v0 = vld [vmem:[#allocation8 + $0x66c] sm:$0xf]  ;;  %v6286_v1 = vld [vmem:[#allocation8 + $0x684] sm:$0xf0] }
 0x35c   :  { %4090 = vmatpush.bf16.msrb.mxu2 %v6117_v7  ;;  %4103 = vmatpush.bf16.msrb.mxu3 %v6341_v8  ;;  %v5696_v7 = vld [vmem:[#allocation8 + $0x1d0] sm:$0xf]  ;;  %v5977_v8 = vor.u32 %v6769_v63, %v5976_v61  ;;  %v6787_v61 = vld [vmem:[#allocation8 + $0x4ac] sm:$0xf]  ;;  %v6062_v63 = vld [vmem:[#allocation8 + $0x4c4] sm:$0xf0] }
 0x35e   :  { %4066 = vmatpush.bf16.msrb.mxu0 %v5613_v53  ;;  %4079 = vmatpush.bf16.msrb.mxu1 %v5837_v12  ;;  %v5948_v53 = vld [vmem:[#allocation8 + $0x3c8] sm:$0xf]  ;;  %v6762_v12 = vld [vmem:[#allocation8 + $0x3e0] sm:$0xf0] }
 0x35f   :  { %v5949_v20 = vor.u32 %v6762_v12, %v5948_v53 }
 0x360   :  { %4091 = vmatpush.bf16.msrb.mxu2 %v6089_v14  ;;  %4104 = vmatpush.bf16.msrb.mxu3 %v6313_v15  ;;  %v5473_v14 = vor.u32 %v6643_v6, %v5472_v3  ;;  %v5697_v15 = vor.u32 %v6699_v9, %v5696_v7  ;;  %v6661_v3 = vld [vmem:[#allocation8 + $0xbc] sm:$0xf]  ;;  %v5558_v6 = vld [vmem:[#allocation8 + $0xd4] sm:$0xf0]  ;;  %v6065_v7 = vor.u32 %v6787_v61, %v6062_v63  ;;  %v6686_v63 = vld [vmem:[#allocation8 + $0x180] sm:$0xf0] }
 0x361   :  { %v5782_v9 = vld [vmem:[#allocation8 + $0x294] sm:$0xf0]  ;;  %v5561_v53 = vor.u32 %v6661_v3, %v5558_v6  ;;  %v6752_v3 = vld [vmem:[#allocation8 + $0x394] sm:$0xf]  ;;  %v5922_v6 = vld [vmem:[#allocation8 + $0x3ac] sm:$0xf0] }
 0x362   :  { %4067 = vmatpush.bf16.msrb.mxu0 %v5585_v22  ;;  %4080 = vmatpush.bf16.msrb.mxu1 %v5809_v23  ;;  %v6173_v22 = vor.u32 %v6818_v13, %v6172_v34  ;;  %v5866_v23 = vld [vmem:[#allocation8 + $0x33c] sm:$0xf0]  ;;  %v6654_v34 = vld [vmem:[#allocation8 + $0x84] sm:$0xf] }
 0x363   :  { %v5869_v45 = vor.u32 %v6738_v19, %v5866_v23  ;;  %v5530_v13 = vld [vmem:[#allocation8 + $0x9c] sm:$0xf0]  ;;  %v6829_v19 = vld [vmem:[#allocation8 + $0x5fc] sm:$0xf] }
 0x364   :  { %4092 = vmatpush.bf16.msrb.mxu2 %v6061_v32  ;;  %4105 = vmatpush.bf16.msrb.mxu3 %v6285_v35  ;;  %v6144_v32 = vld [vmem:[#allocation8 + $0x550] sm:$0xf]  ;;  %v6811_v35 = vld [vmem:[#allocation8 + $0x568] sm:$0xf0] }
 0x366   :  { %4068 = vmatpush.bf16.msrb.mxu0 %v5557_v30  ;;  %4081 = vmatpush.bf16.msrb.mxu1 %v5781_v46  ;;  %v5921_v30 = vor.u32 %v6755_v26, %v5920_v24  ;;  %v6145_v46 = vor.u32 %v6811_v35, %v6144_v32  ;;  %v6647_v24 = vld [vmem:[#allocation8 + $0x4c] sm:$0xf]  ;;  %v5502_v26 = vld [vmem:[#allocation8 + $0x64] sm:$0xf0]  ;;  %v6009_v32 = vor.u32 %v6773_v11, %v6006_v18 }
 0x367   :  { %v6735_v11 = vld [vmem:[#allocation8 + $0x308] sm:$0xf0] }
 0x368   :  { %4093 = vmatpush.bf16.msrb.mxu2 %v6033_v48  ;;  %4106 = vmatpush.bf16.msrb.mxu3 %v6257_v50  ;;  %v6121_v48 = vor.u32 %v6801_v38, %v6118_v39  ;;  %v6345_v50 = vor.u32 %v6857_v42, %v6342_v43  ;;  %v6703_v38 = vld [vmem:[#allocation8 + $0x20c] sm:$0xf]  ;;  %v5726_v39 = vld [vmem:[#allocation8 + $0x224] sm:$0xf0]  ;;  %v6766_v42 = vld [vmem:[#allocation8 + $0x404] sm:$0xf] }
 0x369   :  { %v5978_v43 = vld [vmem:[#allocation8 + $0x41c] sm:$0xf0] }
 0x36a   :  { %4069 = vmatpush.bf16.msrb.mxu0 %v5529_v55  ;;  %4082 = vmatpush.bf16.msrb.mxu1 %v5753_v56  ;;  %v5617_v55 = vor.u32 %v6675_v47, %v5614_v21  ;;  %v5841_v56 = vor.u32 %v6731_v27, %v5838_v51  ;;  %v6640_v47 = vld [vmem:[#allocation8 + $0x14] sm:$0xf]  ;;  %v5474_v21 = vld [vmem:[#allocation8 + $0x2c] sm:$0xf0] }
 0x36b   :  { %v5698_v51 = vld [vmem:[#allocation8 + $0x1ec] sm:$0xf0] }
 0x36c   :  { %4094 = vmatpush.bf16.msrb.mxu2 %v6005_v4  ;;  %4107 = vmatpush.bf16.msrb.mxu3 %v6229_v49  ;;  %v6093_v4 = vor.u32 %v6794_v33, %v6090_v29  ;;  %v6317_v49 = vor.u32 %v6850_v52, %v6314_v54  ;;  %v5676_v33 = vld [vmem:[#allocation8 + $0x1a0] sm:$0xf]  ;;  %v6693_v29 = vld [vmem:[#allocation8 + $0x1b8] sm:$0xf0] }
 0x36d   :  { %v5900_v52 = vld [vmem:[#allocation8 + $0x360] sm:$0xf]  ;;  %v6749_v54 = vld [vmem:[#allocation8 + $0x378] sm:$0xf0] }
 0x36e   :  { %4070 = vmatpush.bf16.msrb.mxu0 %v5501_v36  ;;  %4083 = vmatpush.bf16.msrb.mxu1 %v5725_v2  ;;  %v5589_v36 = vor.u32 %v6668_v5, %v5586_v57  ;;  %v5813_v2 = vor.u32 %v6724_v58, %v5810_v59  ;;  %v6815_v5 = vld [vmem:[#allocation8 + $0x58c] sm:$0xf]  ;;  %v6174_v57 = vld [vmem:[#allocation8 + $0x5a4] sm:$0xf0]  ;;  %v5677_v59 = vor.u32 %v6693_v29, %v5676_v33  ;;  %v5564_v33 = vld [vmem:[#allocation8 + $0xc0] sm:$0xf] }
 0x36f   :  { %v5648_v58 = vld [vmem:[#allocation8 + $0x168] sm:$0xf]  ;;  %v5901_v61 = vor.u32 %v6749_v54, %v5900_v52  ;;  %v6665_v29 = vld [vmem:[#allocation8 + $0xd8] sm:$0xf0] }
 0x370   :  { %4095 = vmatpush.bf16.msrb.mxu2 %v5977_v8  ;;  %4108 = vmatpush.bf16.msrb.mxu3 %v6201_v37  ;;  %v6289_v8 = vor.u32 %v6843_v0, %v6286_v1  ;;  %v6717_v37 = vld [vmem:[#allocation8 + $0x27c] sm:$0xf]  ;;  %v5872_v0 = vld [vmem:[#allocation8 + $0x328] sm:$0xf]  ;;  %v6742_v1 = vld [vmem:[#allocation8 + $0x340] sm:$0xf0] }
 0x371   :  { %v5785_v12 = vor.u32 %v6717_v37, %v5782_v9  ;;  %v6124_v37 = vld [vmem:[#allocation8 + $0x520] sm:$0xf]  ;;  %v6805_v9 = vld [vmem:[#allocation8 + $0x538] sm:$0xf0] }
 0x372   :  { %4071 = vmatpush.bf16.msrb.mxu0 %v5473_v14  ;;  %4084 = vmatpush.bf16.msrb.mxu1 %v5697_v15  ;;  %v6037_v14 = vor.u32 %v6780_v25, %v6034_v60  ;;  %v6261_v15 = vor.u32 %v6836_v10, %v6258_v28  ;;  %v6348_v25 = vld [vmem:[#allocation8 + $0x6e0] sm:$0xf]  ;;  %v6861_v60 = vld [vmem:[#allocation8 + $0x6f8] sm:$0xf0]  ;;  %v5649_v28 = vor.u32 %v6686_v63, %v5648_v58 }
 0x373   :  { %v7248_v10 = vld [vmem:[%s7283_s8] sm:$0xff]  ;;  %v5565_v58 = vor.u32 %v6665_v29, %v5564_v33  ;;  %s7049_s8 = smov [#allocation10]  }
 0x374   :  { %4096 = vmatpush.bf16.msrb.mxu2 %v5949_v20  ;;  %4109 = vmatpush.bf16.msrb.mxu3 %v6173_v22  ;;  %v6230_v20 = vld [vmem:[#allocation8 + $0x614] sm:$0xf0]  ;;  %v5533_v22 = vor.u32 %v6654_v34, %v5530_v13  ;;  %v5620_v13 = vld [vmem:[#allocation8 + $0x130] sm:$0xf]  ;;  %v2690_v18 = vperm.slane %v7248_v10, 0  ;;  %s4284_s28 = sshll.u32 %s7049_s8, 4  ;;  %s4285_s28 = int_to_ptr.vmem [resolvable:$true] %s4284_s28 }
 0x375   :  { %4072 = vmatmul.bf16.vlgmr.msrb.gmra.mxu0 %v7217_v40  ;;  %4085 = vmatmul.bf16.vlgmr.msrb.gmra.mxu1 %v7219_v41  ;;  %v6233_v35 = vor.u32 %v6829_v19, %v6230_v20  ;;  %v6096_v19 = vld [vmem:[#allocation8 + $0x4e8] sm:$0xf]  ;;  %v6798_v20 = vld [vmem:[#allocation8 + $0x500] sm:$0xf0]  ;;  %v5928_v29 = vld [vmem:[#allocation8 + $0x398] sm:$0xf] }
 0x376   :  { %4116 = vmatpush.bf16.msra.mxu0 %v5673_v16  ;;  %4129 = vmatpush.bf16.msra.mxu1 %v5897_v17  ;;  %v6710_v16 = vld [vmem:[#allocation8 + $0x244] sm:$0xf]  ;;  %v5754_v17 = vld [vmem:[#allocation8 + $0x25c] sm:$0xf0] }
 0x377   :  { %v5757_v23 = vor.u32 %v6710_v16, %v5754_v17  ;;  %v6125_v16 = vor.u32 %v6805_v9, %v6124_v37  ;;  %v6349_v17 = vor.u32 %v6861_v60, %v6348_v25  ;;  %v6236_v37 = vld [vmem:[#allocation8 + $0x600] sm:$0xf]  ;;  %v6833_v9 = vld [vmem:[#allocation8 + $0x618] sm:$0xf0] }
 0x378   :  { %4097 = vmatpush.bf16.msrb.mxu2 %v5921_v30  ;;  %4110 = vmatpush.bf16.msrb.mxu3 %v6145_v46  ;;  %v5505_v30 = vor.u32 %v6647_v24, %v5502_v26  ;;  %v5729_v46 = vor.u32 %v6703_v38, %v5726_v39  ;;  %v5592_v38 = vld [vmem:[#allocation8 + $0xf8] sm:$0xf]  ;;  %v6672_v39 = vld [vmem:[#allocation8 + $0x110] sm:$0xf0] }
 0x37a   :  { %4117 = vmatpush.bf16.msra.mxu0 %v5645_v44  ;;  %4130 = vmatpush.bf16.msra.mxu1 %v5869_v45  ;;  %v6822_v44 = vld [vmem:[#allocation8 + $0x5c4] sm:$0xf]  ;;  %v6202_v45 = vld [vmem:[#allocation8 + $0x5dc] sm:$0xf0] }
 0x37b   :  { %4098 = vmatmul.bf16.vlgmr.msrb.gmra.mxu2 %v7223_v62  ;;  %4111 = vmatmul.bf16.vlgmr.msrb.gmra.mxu3 %v7225_v31  ;;  %v6205_v27 = vor.u32 %v6822_v44, %v6202_v45  ;;  %v5816_v45 = vld [vmem:[#allocation8 + $0x2b8] sm:$0xf] }
 0x37c   :  { %4142 = vmatpush.bf16.msra.mxu2 %v6121_v48  ;;  %4155 = vmatpush.bf16.msra.mxu3 %v6345_v50  ;;  %v6696_v48 = vld [vmem:[#allocation8 + $0x1d4] sm:$0xf]  ;;  %v5981_v50 = vor.u32 %v6766_v42, %v5978_v43  ;;  %v6097_v43 = vor.u32 %v6798_v20, %v6096_v19  ;;  %v6208_v19 = vld [vmem:[#allocation8 + $0x5c8] sm:$0xf]  ;;  %v6826_v20 = vld [vmem:[#allocation8 + $0x5e0] sm:$0xf0] }
 0x37e   :  { %4118 = vmatpush.bf16.msra.mxu0 %v5617_v55  ;;  %4131 = vmatpush.bf16.msra.mxu1 %v5841_v56  ;;  %v6759_v55 = vld [vmem:[#allocation8 + $0x3cc] sm:$0xf]  ;;  %v5950_v56 = vld [vmem:[#allocation8 + $0x3e4] sm:$0xf0] }
 0x380   :  { %4143 = vmatpush.bf16.msra.mxu2 %v6093_v4  ;;  %4156 = vmatpush.bf16.msra.mxu3 %v6317_v49  ;;  %v5477_v4 = vor.u32 %v6640_v47, %v5474_v21  ;;  %v5701_v49 = vor.u32 %v6696_v48, %v5698_v51  ;;  %v6791_v47 = vld [vmem:[#allocation8 + $0x4c8] sm:$0xf0]  ;;  %v6292_v21 = vld [vmem:[#allocation8 + $0x670] sm:$0xf] }
 0x381   :  { %v6847_v48 = vld [vmem:[#allocation8 + $0x688] sm:$0xf0] }
 0x382   :  { %4119 = vmatpush.bf16.msra.mxu0 %v5589_v36  ;;  %4132 = vmatpush.bf16.msra.mxu1 %v5813_v2  ;;  %v5953_v36 = vor.u32 %v6759_v55, %v5950_v56  ;;  %v6177_v2 = vor.u32 %v6815_v5, %v6174_v57  ;;  %v6293_v54 = vor.u32 %v6847_v48, %v6292_v21  ;;  %v5788_v55 = vld [vmem:[#allocation8 + $0x280] sm:$0xf]  ;;  %v6721_v56 = vld [vmem:[#allocation8 + $0x298] sm:$0xf0]  ;;  %v6040_v5 = vld [vmem:[#allocation8 + $0x478] sm:$0xf] }
 0x383   :  { %v6784_v57 = vld [vmem:[#allocation8 + $0x490] sm:$0xf0] }
 0x384   :  { %4144 = vmatpush.bf16.msra.mxu2 %v6065_v7  ;;  %4157 = vmatpush.bf16.msra.mxu3 %v6289_v8  ;;  %v6808_v7 = vld [vmem:[#allocation8 + $0x554] sm:$0xf]  ;;  %v6146_v8 = vld [vmem:[#allocation8 + $0x56c] sm:$0xf0] }
 0x385   :  { %v6149_v34 = vor.u32 %v6808_v7, %v6146_v8  ;;  %v6012_v7 = vld [vmem:[#allocation8 + $0x440] sm:$0xf]  ;;  %v6777_v8 = vld [vmem:[#allocation8 + $0x458] sm:$0xf0] }
 0x386   :  { %4120 = vmatpush.bf16.msra.mxu0 %v5561_v53  ;;  %4133 = vmatpush.bf16.msra.mxu1 %v5785_v12  ;;  %v5873_v53 = vor.u32 %v6742_v1, %v5872_v0  ;;  %v5925_v12 = vor.u32 %v6752_v3, %v5922_v6  ;;  %v5536_v0 = vld [vmem:[#allocation8 + $0x88] sm:$0xf]  ;;  %v6658_v1 = vld [vmem:[#allocation8 + $0xa0] sm:$0xf0] }
 0x387   :  { %v5760_v3 = vld [vmem:[#allocation8 + $0x248] sm:$0xf]  ;;  %v6714_v6 = vld [vmem:[#allocation8 + $0x260] sm:$0xf0]  ;;  %v5537_v25 = vor.u32 %v6658_v1, %v5536_v0 }
 0x388   :  { %4145 = vmatpush.bf16.msra.mxu2 %v6037_v14  ;;  %4158 = vmatpush.bf16.msra.mxu3 %v6261_v15  ;;  %v6679_v14 = vld [vmem:[#allocation8 + $0x148] sm:$0xf0]  ;;  %v5844_v15 = vld [vmem:[#allocation8 + $0x2f0] sm:$0xf]  ;;  %v5761_v60 = vor.u32 %v6714_v6, %v5760_v3 }
 0x389   :  { %v5621_v24 = vor.u32 %v6679_v14, %v5620_v13  ;;  %v5845_v26 = vor.u32 %v6735_v11, %v5844_v15  ;;  %v6013_v13 = vor.u32 %v6777_v8, %v6012_v7  ;;  %v6237_v14 = vor.u32 %v6833_v9, %v6236_v37  ;;  %v5732_v15 = vld [vmem:[#allocation8 + $0x210] sm:$0xf] }
 0x38a   :  { %4121 = vmatpush.bf16.msra.mxu0 %v5533_v22  ;;  %4134 = vmatpush.bf16.msra.mxu1 %v5757_v23  ;;  %v6320_v22 = vld [vmem:[#allocation8 + $0x6a8] sm:$0xf]  ;;  %v6854_v23 = vld [vmem:[#allocation8 + $0x6c0] sm:$0xf0] }
 0x38b   :  { %v6321_v44 = vor.u32 %v6854_v23, %v6320_v22 }
 0x38c   :  { %4146 = vmatpush.bf16.msra.mxu2 %v6009_v32  ;;  %4159 = vmatpush.bf16.msra.mxu3 %v6233_v35 }
 0x38e   :  { %4122 = vmatpush.bf16.msra.mxu0 %v5505_v30  ;;  %4135 = vmatpush.bf16.msra.mxu1 %v5729_v46  ;;  %v6728_v30 = vld [vmem:[#allocation8 + $0x2d0] sm:$0xf0]  ;;  %v6068_v46 = vld [vmem:[#allocation8 + $0x4b0] sm:$0xf] }
 0x38f   :  { %v5817_v51 = vor.u32 %v6728_v30, %v5816_v45  ;;  %v6069_v52 = vor.u32 %v6791_v47, %v6068_v46  ;;  %v5956_v45 = vld [vmem:[#allocation8 + $0x3d0] sm:$0xf]  ;;  %v6763_v30 = vld [vmem:[#allocation8 + $0x3e8] sm:$0xf0] }
 0x390   :  { %4147 = vmatpush.bf16.msra.mxu2 %v5981_v50  ;;  %4160 = vmatpush.bf16.msra.mxu3 %v6205_v27  ;;  %v5593_v27 = vor.u32 %v6672_v39, %v5592_v38  ;;  %v6180_v46 = vld [vmem:[#allocation8 + $0x590] sm:$0xf]  ;;  %v6819_v47 = vld [vmem:[#allocation8 + $0x5a8] sm:$0xf0] }
 0x391   :  { %v3865_v32 = vpop.f32.mrf.mxu0  ;;  %v3878_v35 = vpop.f32.mrf.mxu1  ;;  %v6181_v33 = vor.u32 %v6819_v47, %v6180_v46 }
 0x392   :  { %4123 = vmatpush.bf16.msra.mxu0 %v5477_v4  ;;  %4136 = vmatpush.bf16.msra.mxu1 %v5701_v49  ;;  %v3866_v42 = vadd.f32 %v3865_v32, %v2690_v18  ;;  %v6264_v4 = vld [vmem:[#allocation8 + $0x638] sm:$0xf]  ;;  %v6840_v49 = vld [vmem:[#allocation8 + $0x650] sm:$0xf0]  ;;  %v6770_v18 = vld [vmem:[#allocation8 + $0x420] sm:$0xf0] }
 0x393   :  { %v6644_v32 = vld [vmem:[#allocation8 + $0x30] sm:$0xf0] }
 0x394   :  { %4148 = vmatpush.bf16.msra.mxu2 %v5953_v36  ;;  %4161 = vmatpush.bf16.msra.mxu3 %v6177_v2  ;;  %v3879_v50 = vadd.f32 %v3878_v35, %v3866_v42  ;;  %v6041_v36 = vor.u32 %v6784_v57, %v6040_v5  ;;  %v6265_v2 = vor.u32 %v6840_v49, %v6264_v4 }
 0x395   :  { %4124 = vmatmul.bf16.vlgmr.msra.gmra.mxu0 %v7217_v40  ;;  %4137 = vmatmul.bf16.vlgmr.msra.gmra.mxu1 %v7219_v41  ;;  %v6209_v42 = vor.u32 %v6826_v20, %v6208_v19 }
 0x396   :  { %4168 = vmatpush.bf16.msrb.mxu0 %v5677_v59  ;;  %4181 = vmatpush.bf16.msrb.mxu1 %v5901_v61  ;;  %v5789_v59 = vor.u32 %v6721_v56, %v5788_v55  ;;  %v6812_v55 = vld [vmem:[#allocation8 + $0x570] sm:$0xf0] }
 0x398   :  { %4149 = vmatpush.bf16.msra.mxu2 %v5925_v12  ;;  %4162 = vmatpush.bf16.msra.mxu3 %v6149_v34 }
 0x399   :  { %v3867_v61 = vpop.f32.mrf.mxu0  ;;  %v3880_v63 = vpop.f32.mrf.mxu1 }
 0x39a   :  { %4169 = vmatpush.bf16.msrb.mxu0 %v5649_v28  ;;  %4182 = vmatpush.bf16.msrb.mxu1 %v5873_v53  ;;  %v5508_v28 = vld [vmem:[#allocation8 + $0x50] sm:$0xf]  ;;  %v6651_v53 = vld [vmem:[#allocation8 + $0x68] sm:$0xf0] }
 0x39b   :  { %4150 = vmatmul.bf16.vlgmr.msra.gmra.mxu2 %v7223_v62  ;;  %4163 = vmatmul.bf16.vlgmr.msra.gmra.mxu3 %v7225_v31  ;;  %v5509_v23 = vor.u32 %v6651_v53, %v5508_v28 }
 0x39c   :  { %4194 = vmatpush.bf16.msrb.mxu2 %v6125_v16  ;;  %4207 = vmatpush.bf16.msrb.mxu3 %v6349_v17  ;;  %v6707_v16 = vld [vmem:[#allocation8 + $0x228] sm:$0xf0]  ;;  %v5984_v17 = vld [vmem:[#allocation8 + $0x408] sm:$0xf] }
 0x39d   :  { %v5985_v39 = vor.u32 %v6770_v18, %v5984_v17 }
 0x39e   :  { %4170 = vmatpush.bf16.msrb.mxu0 %v5621_v24  ;;  %4183 = vmatpush.bf16.msrb.mxu1 %v5845_v26  ;;  %v3891_v12 = vpop.f32.mrf.mxu2  ;;  %v3904_v34 = vpop.f32.mrf.mxu3  ;;  %v5733_v24 = vor.u32 %v6707_v16, %v5732_v15  ;;  %v5480_v26 = vld [vmem:[#allocation8 + $0x18] sm:$0xf] }
 0x39f   :  { %v3892_v11 = vadd.f32 %v3891_v12, %v3879_v50  ;;  %v5481_v21 = vor.u32 %v6644_v32, %v5480_v26 }
 0x3a0   :  { %4195 = vmatpush.bf16.msrb.mxu2 %v6097_v43  ;;  %4208 = vmatpush.bf16.msrb.mxu3 %v6321_v44  ;;  %v5704_v43 = vld [vmem:[#allocation8 + $0x1d8] sm:$0xf]  ;;  %v6700_v44 = vld [vmem:[#allocation8 + $0x1f0] sm:$0xf0] }
 0x3a1   :  { %v7255_v22 = vadd.f32 %v3904_v34, %v3892_v11  ;;  %v5705_v48 = vor.u32 %v6700_v44, %v5704_v43  ;;  %v2693_v34 = vperm.slane %v7248_v10, 3 }
 0x3a2   :  { %4171 = vmatpush.bf16.msrb.mxu0 %v5593_v27  ;;  %4184 = vmatpush.bf16.msrb.mxu1 %v5817_v51  ;;  %v3917_v35 = vpop.f32.mrf.mxu0  ;;  %v3930_v38 = vpop.f32.mrf.mxu1  ;;  %v5957_v51 = vor.u32 %v6763_v30, %v5956_v45 }
 0x3a3   :  { %v4220_v18 = vsub.f32 0.0, %v7255_v22 }
 0x3a4   :  { %4196 = vmatpush.bf16.msrb.mxu2 %v6069_v52  ;;  %4209 = vmatpush.bf16.msrb.mxu3 %v6293_v54  ;;  %v6756_v52 = vld [vmem:[#allocation8 + $0x3b0] sm:$0xf0]  ;;  %v6152_v54 = vld [vmem:[#allocation8 + $0x558] sm:$0xf] }
 0x3a5   :  { %v5929_v57 = vor.u32 %v6756_v52, %v5928_v29  ;;  %v6153_v4 = vor.u32 %v6812_v55, %v6152_v54  ;;  %v4227_v32 = vmul.f32 1.442695, %v4220_v18 }
 0x3a6   :  { %4172 = vmatpush.bf16.msrb.mxu0 %v5565_v58  ;;  %4185 = vmatpush.bf16.msrb.mxu1 %v5789_v59  ;;  %v3893_v50 = vpop.f32.mrf.mxu2  ;;  %v3906_v27 = vpop.f32.mrf.mxu3 }
 0x3a8   :  { %4197 = vmatpush.bf16.msrb.mxu2 %v6041_v36  ;;  %4210 = vmatpush.bf16.msrb.mxu3 %v6265_v2 }
 0x3aa   :  { %4173 = vmatpush.bf16.msrb.mxu0 %v5537_v25  ;;  %4186 = vmatpush.bf16.msrb.mxu1 %v5761_v60  ;;  %v3919_v56 = vpop.f32.mrf.mxu0  ;;  %v3932_v5 = vpop.f32.mrf.mxu1 }
 0x3ac   :  { %4198 = vmatpush.bf16.msrb.mxu2 %v6013_v13  ;;  %4211 = vmatpush.bf16.msrb.mxu3 %v6237_v14 }
 0x3ae   :  { %4174 = vmatpush.bf16.msrb.mxu0 %v5509_v23  ;;  %4187 = vmatpush.bf16.msrb.mxu1 %v5733_v24  ;;  %v3943_v49 = vpop.f32.mrf.mxu2  ;;  %v3956_v58 = vpop.f32.mrf.mxu3 }
 0x3b0   :  { %4199 = vmatpush.bf16.msrb.mxu2 %v5985_v39  ;;  %4212 = vmatpush.bf16.msrb.mxu3 %v6209_v42 }
 0x3b2   :  { %4175 = vmatpush.bf16.msrb.mxu0 %v5481_v21  ;;  %4188 = vmatpush.bf16.msrb.mxu1 %v5705_v48  ;;  %v3969_v59 = vpop.f32.mrf.mxu0  ;;  %v3982_v61 = vpop.f32.mrf.mxu1  ;;  %v2694_v21 = vperm.slane %v7248_v10, 4 }
 0x3b4   :  { %4200 = vmatpush.bf16.msrb.mxu2 %v5957_v51  ;;  %4213 = vmatpush.bf16.msrb.mxu3 %v6181_v33 }
 0x3b5   :  { %4176 = vmatmul.bf16.vlgmr.msrb.gmra.mxu0 %v7217_v40  ;;  %4189 = vmatmul.bf16.vlgmr.msrb.gmra.mxu1 %v7219_v41  ;;  %v2691_v40 = vperm.slane %v7248_v10, 1  ;;  %v2692_v41 = vperm.slane %v7248_v10, 2 }
 0x3b6   :  { %v3945_v63 = vpop.f32.mrf.mxu2  ;;  %v3958_v0 = vpop.f32.mrf.mxu3 }
 0x3b7   :  { %v3918_v6 = vadd.f32 %v3917_v35, %v2691_v40  ;;  %v3970_v37 = vadd.f32 %v3969_v59, %v2692_v41 }
 0x3b8   :  { %4201 = vmatpush.bf16.msrb.mxu2 %v5929_v57  ;;  %4214 = vmatpush.bf16.msrb.mxu3 %v6153_v4 }
 0x3b9   :  { %v3931_v9 = vadd.f32 %v3930_v38, %v3918_v6  ;;  %v3983_v25 = vadd.f32 %v3982_v61, %v3970_v37  ;;  %v2695_v37 = vperm.slane %v7248_v10, 5 }
 0x3ba   :  { %v3971_v1 = vpop.f32.mrf.mxu0  ;;  %v3984_v36 = vpop.f32.mrf.mxu1 }
 0x3bb   :  { %4202 = vmatmul.bf16.vlgmr.msrb.gmra.mxu2 %v7223_v62  ;;  %4215 = vmatmul.bf16.vlgmr.msrb.gmra.mxu3 %v7225_v31  ;;  %v3944_v62 = vadd.f32 %v3943_v49, %v3931_v9 }
 0x3bd   :  { %v3957_v53 = vadd.f32 %v3956_v58, %v3944_v62 }
 0x3be   :  { %v3995_v2 = vpop.f32.mrf.mxu2  ;;  %v4008_v3 = vpop.f32.mrf.mxu3 }
 0x3bf   :  { %v3996_v31 = vadd.f32 %v3995_v2, %v3983_v25  ;;  %v4221_v13 = vsub.f32 0.0, %v3957_v53 }
 0x3c1   :  { %v4009_v12 = vadd.f32 %v4008_v3, %v3996_v31  ;;  %v4229_v11 = vmul.f32 1.442695, %v4221_v13  ;;  %v2696_v13 = vperm.slane %v7248_v10, 6 }
 0x3c3   :  { %v4222_v14 = vsub.f32 0.0, %v4009_v12  ;;  %6876 = vpow2.f32 %v4229_v11 }
 0x3c5   :  { %v4231_v19 = vmul.f32 1.442695, %v4222_v14 }
 0x3c6   :  { %v3997_v7 = vpop.f32.mrf.mxu2  ;;  %v4010_v8 = vpop.f32.mrf.mxu3 }
 0x3c7   :  { %6878 = vpow2.f32 %v4231_v19 }
 0x3c8   :  { %6880 = vpow2.f32 %v4227_v32 }
 0x3c9   :  { %v6877_v39 = vpop.eup %6876 }
 0x3ca   :  { %v4242_v30 = vadd.f32 1.0, %v6877_v39 }
 0x3cd   :  { %v6879_v45 = vpop.eup %6878 }
 0x3ce   :  { %v4243_v46 = vadd.f32 1.0, %v6879_v45  ;;  %v6881_v22 = vpop.eup %6880 }
 0x3cf   :  { %v4241_v48 = vadd.f32 1.0, %v6881_v22 }
 0x3d2   :  { %v4021_v60 = vpop.f32.mrf.mxu0  ;;  %v4034_v28 = vpop.f32.mrf.mxu1 }
 0x3d3   :  { %v4022_v15 = vadd.f32 %v4021_v60, %v2693_v34 }
 0x3d5   :  { %v4035_v20 = vadd.f32 %v4034_v28, %v4022_v15 }
 0x3da   :  { %v4023_v16 = vpop.f32.mrf.mxu0  ;;  %v4036_v17 = vpop.f32.mrf.mxu1 }
 0x3de   :  { %v4047_v23 = vpop.f32.mrf.mxu2  ;;  %v4060_v24 = vpop.f32.mrf.mxu3 }
 0x3df   :  { %v4048_v26 = vadd.f32 %v4047_v23, %v4035_v20 }
 0x3e1   :  { %v4061_v35 = vadd.f32 %v4060_v24, %v4048_v26 }
 0x3e3   :  { %v4223_v38 = vsub.f32 0.0, %v4061_v35 }
 0x3e5   :  { %v4233_v42 = vmul.f32 1.442695, %v4223_v38 }
 0x3e6   :  { %v4049_v43 = vpop.f32.mrf.mxu2  ;;  %v4062_v44 = vpop.f32.mrf.mxu3 }
 0x3e7   :  { %6882 = vpow2.f32 %v4233_v42 }
 0x3e8   :  { %6884 = vrcp.f32 %v4242_v30 }
 0x3e9   :  { %6886 = vrcp.f32 %v4243_v46 }
 0x3ed   :  { %v6883_v47 = vpop.eup %6882 }
 0x3ee   :  { %v4244_v50 = vadd.f32 1.0, %v6883_v47  ;;  %v6885_v29 = vpop.eup %6884 }
 0x3ef   :  { %v6887_v54 = vpop.eup %6886  ;;  %v4262_v55 = vrot.slane %v6885_v29, 6 }
 0x3f0   :  { %6888 = vrcp.f32 %v4244_v50  ;;  %v4263_v5 = vrot.slane %v6887_v54, 4 }
 0x3f1   :  { %6890 = vrcp.f32 %v4241_v48 }
 0x3f2   :  { %v4073_v27 = vpop.f32.mrf.mxu0  ;;  %v4086_v51 = vpop.f32.mrf.mxu1 }
 0x3f3   :  { %v4074_v33 = vadd.f32 %v4073_v27, %v2694_v21 }
 0x3f5   :  { %v4087_v52 = vadd.f32 %v4086_v51, %v4074_v33 }
 0x3f6   :  { %v6889_v56 = vpop.eup %6888 }
 0x3f7   :  { %v4264_v57 = vrot.slane %v6889_v56, 2  ;;  %v6891_v4 = vpop.eup %6890 }
 0x3f8   :  { %v4268_v59 = vsel %vm4267_vm1, %v6891_v4, %v4262_v55 }
 0x3f9   :  { %v4270_v61 = vsel %vm4269_vm2, %v4263_v5, %v4264_v57 }
 0x3fa   :  { %v4075_v49 = vpop.f32.mrf.mxu0  ;;  %v4088_v58 = vpop.f32.mrf.mxu1  ;;  %v4272_v63 = vsel %vm4271_vm3, %v4268_v59, %v4270_v61 }
 0x3fb   :  { %4277 = vst [vmem:[#allocation10] sm:$0xff] %v4272_v63 }
 0x3fe   :  { %v4099_v0 = vpop.f32.mrf.mxu2  ;;  %v4112_v1 = vpop.f32.mrf.mxu3 }
 0x3ff   :  { %v4100_v34 = vadd.f32 %v4099_v0, %v4087_v52 }
 0x401   :  { %v4113_v15 = vadd.f32 %v4112_v1, %v4100_v34 }
 0x403   :  { %v4224_v19 = vsub.f32 0.0, %v4113_v15 }
 0x405   :  { %v4235_v32 = vmul.f32 1.442695, %v4224_v19 }
 0x406   :  { %v4101_v36 = vpop.f32.mrf.mxu2  ;;  %v4114_v2 = vpop.f32.mrf.mxu3 }
 0x412   :  { %v4125_v3 = vpop.f32.mrf.mxu0  ;;  %v4138_v40 = vpop.f32.mrf.mxu1 }
 0x413   :  { %v4126_v9 = vadd.f32 %v4125_v3, %v2695_v37 }
 0x415   :  { %v4139_v31 = vadd.f32 %v4138_v40, %v4126_v9 }
 0x41a   :  { %v4127_v41 = vpop.f32.mrf.mxu0  ;;  %v4140_v6 = vpop.f32.mrf.mxu1 }
 0x41e   :  { %v4151_v7 = vpop.f32.mrf.mxu2  ;;  %v4164_v8 = vpop.f32.mrf.mxu3 }
 0x41f   :  { %v4152_v60 = vadd.f32 %v4151_v7, %v4139_v31 }
 0x421   :  { %v4165_v28 = vadd.f32 %v4164_v8, %v4152_v60 }
 0x423   :  { %v4225_v14 = vsub.f32 0.0, %v4165_v28 }
 0x425   :  { %v4237_v17 = vmul.f32 1.442695, %v4225_v14 }
 0x426   :  { %v4153_v62 = vpop.f32.mrf.mxu2  ;;  %v4166_v25 = vpop.f32.mrf.mxu3 }
 0x427   :  { %6892 = vpow2.f32 %v4237_v17 }
 0x428   :  { %6894 = vpow2.f32 %v4235_v32 }
 0x42d   :  { %v6893_v39 = vpop.eup %6892 }
 0x42e   :  { %v4246_v44 = vadd.f32 1.0, %v6893_v39  ;;  %v6895_v45 = vpop.eup %6894 }
 0x42f   :  { %v4245_v46 = vadd.f32 1.0, %v6895_v45 }
 0x432   :  { %v4177_v53 = vpop.f32.mrf.mxu0  ;;  %v4190_v12 = vpop.f32.mrf.mxu1 }
 0x433   :  { %v4178_v16 = vadd.f32 %v4177_v53, %v2696_v13 }
 0x435   :  { %v4191_v20 = vadd.f32 %v4190_v12, %v4178_v16 }
 0x43a   :  { %v4179_v11 = vpop.f32.mrf.mxu0  ;;  %v4192_v18 = vpop.f32.mrf.mxu1 }
 0x43e   :  { %v4203_v23 = vpop.f32.mrf.mxu2  ;;  %v4216_v24 = vpop.f32.mrf.mxu3 }
 0x43f   :  { %v4204_v26 = vadd.f32 %v4203_v23, %v4191_v20 }
 0x441   :  { %v4217_v35 = vadd.f32 %v4216_v24, %v4204_v26 }
 0x443   :  { %v4226_v38 = vsub.f32 0.0, %v4217_v35 }
 0x445   :  { %v4239_v42 = vmul.f32 1.442695, %v4226_v38 }
 0x446   :  { %v4205_v43 = vpop.f32.mrf.mxu2  ;;  %v4218_v10 = vpop.f32.mrf.mxu3 }
 0x447   :  { %6896 = vpow2.f32 %v4239_v42 }
 0x448   :  { %6898 = vrcp.f32 %v4246_v44 }
 0x44d   :  { %v6897_v30 = vpop.eup %6896 }
 0x44e   :  { %v4247_v22 = vadd.f32 1.0, %v6897_v30  ;;  %v6899_v47 = vpop.eup %6898 }
 0x44f   :  { %v4265_v21 = vrot.slane %v6899_v47, 6 }
 0x450   :  { %6900 = vrcp.f32 %v4247_v22 }
 0x451   :  { %6902 = vrcp.f32 %v4245_v46 }
 0x456   :  { %v6901_v48 = vpop.eup %6900 }
 0x457   :  { %v6903_v50 = vpop.eup %6902  ;;  %v4266_v27 = vrot.slane %v6901_v48, 4 }
 0x458   :  { %v4273_v51 = vsel %vm4267_vm1, %v6903_v50, %v4265_v21 }
 0x459   :  { %v4274_v33 = vsel %vm4271_vm3, %v4273_v51, %v4266_v27 }
 0x45a   :  { %4278 = vst [vmem:[#allocation10 + $0x8] sm:$0x3f] %v4274_v33 }
 0x45b   :  { %4289 = dma.vmem_to_hbm [thread:$0]  %s4285_s28, 224, %s4287_s30, [#allocation4]  }
 0x45c   :  { %7037 = dma.done.wait [#allocation4], 224  }
 0x45d   :  { %7038 = vsyncadd [#allocation4], 4294967072 }
 0x45e   :  { %4298 = vsyncpa [#allocation3], 1 }
 0x45f   :  { %4299 = vsyncpa [#allocation6], 1 }
 0x460   :  { %4300 = vsyncpa [#allocation9], 1 }
 0x461   :  { %4301 = vsyncpa [#allocation4], 1 }

</bundles_post_ra>
